<compile_context>
chip_gen: v7x
topology: tpu7x:2x2x1
jax: 0.10.0
libtpu: 0.0.40
codegen_flags: <defaults>
</compile_context>

<pallas_src>
import functools
from typing import List

import jax
import jax.numpy as jnp
from jax import lax
from jax.experimental import pallas as pl
from jax.experimental.pallas import tpu as pltpu


def _round_up(x: int, m: int) -> int:
    return ((x + m - 1) // m) * m


def _decoder_chunk_kernel(
    gemb_ref,      # (Tc, Bp, 4Hp) f32   emb @ W_ih_emb^T + (b_ih+b_hh), gate-blocked, padded
    pk_ref,        # (Bp, Mp, Hp)  edt   projected attention keys (key_layer applied host-side)
    pv_ref,        # (Bp, Mp, Hp)  edt   projected attention values (key_layer, as in reference)
    maskb_ref,     # (Bp, Mp)      f32   additive attention mask bias (0 valid / -1e30 invalid)
    h0_ref,        # (Bp, Hp)      f32   initial hidden (num_layers == 1)
    c0_ref,        # (Bp, Hp)      f32   initial cell
    w_h5_ref,      # (Hp, 5Hp)     bf16  [Wq^T | Whh^T gate-blocked]  (fused h matmul)
    wih_c_ref,     # (Hp, 4Hp)     bf16  W_ih[:, H:]^T gate-blocked   (context -> gates)
    we_ref,        # (1, Hp)       edt   attention.energy_layer.weight
    hseq_ref,      # OUT (Tc, Bp, Hp) bf16  per-step hidden state
    ctxseq_ref,    # OUT (Tc, Bp, Hp) bf16  per-step attention context
    attnsum_ref,   # OUT (Bp, Mp)     f32   sum of attention weights over real time steps
    h_scr,         # scratch (Bp, Hp) f32   recurrent hidden state (persists across chunks)
    c_scr,         # scratch (Bp, Hp) f32   recurrent cell state
    *,
    t_real: int,   # number of real (unpadded) time steps
    energy_dtype,  # bf16 on v6e/v7x, f32 on v5e/older
):
    chunk = pl.program_id(0)
    tc = gemb_ref.shape[0]
    bp, hp = h_scr.shape
    mp = attnsum_ref.shape[1]

    @pl.when(chunk == 0)
    def _init():
        h_scr[...] = h0_ref[...]
        c_scr[...] = c0_ref[...]
        attnsum_ref[...] = jnp.zeros_like(attnsum_ref)

    # Hoisted out of the unrolled step body (JAX does not CSE broadcast_in_dim).
    we_b = jnp.broadcast_to(we_ref[0].astype(energy_dtype), (bp, mp, hp))   # (Bp, Mp, Hp)
    w_h5 = w_h5_ref[...]
    wih_c = wih_c_ref[...]

    def step(i, carry):
        h, c, attn_acc = carry                               # f32 (Bp,Hp), (Bp,Hp), (Bp,Mp)
        h_b = h.astype(jnp.bfloat16)

        # Fused h-dependent matmul: [attention query proj | hidden -> gates].
        hmix = jnp.dot(h_b, w_h5, preferred_element_type=jnp.float32)      # (Bp, 5Hp)
        pq = hmix[:, :hp]                                                   # (Bp, Hp)
        gates_h = hmix[:, hp:]                                              # (Bp, 4Hp)

        # ---- LearnedAttention (Bahdanau additive attention) ----
        e = jnp.tanh(pq.astype(energy_dtype)[:, None, :] + pk_ref[...])     # (Bp, Mp, Hp)
        scores = jnp.sum((e * we_b).astype(jnp.float32), axis=-1) + maskb_ref[...]
        smax = jnp.max(scores, axis=-1, keepdims=True)
        p = jnp.exp(scores - smax)
        attn = p * pl.reciprocal(jnp.sum(p, axis=-1, keepdims=True), approx=True)
        ctx = jnp.sum((attn.astype(energy_dtype)[:, :, None] * pv_ref[...]
                       ).astype(jnp.float32), axis=1)                       # (Bp, Hp)
        ctx_b = ctx.astype(jnp.bfloat16)

        # ---- LSTM cell (PyTorch gate order i,f,g,o); emb part + bias precomputed host-side ----
        gates = (gemb_ref[i] + gates_h
                 + jnp.dot(ctx_b, wih_c, preferred_element_type=jnp.float32))  # (Bp, 4Hp)
        i_g = jax.nn.sigmoid(gates[:, 0:hp])
        f_g = jax.nn.sigmoid(gates[:, hp:2 * hp])
        g_g = jnp.tanh(gates[:, 2 * hp:3 * hp])
        o_g = jax.nn.sigmoid(gates[:, 3 * hp:4 * hp])
        c_new = f_g * c + i_g * g_g
        h_new = o_g * jnp.tanh(c_new)

        # Output projections are deferred to the wrapper; store state + context only (bf16).
        hseq_ref[i] = h_new.astype(jnp.bfloat16)
        ctxseq_ref[i] = ctx_b

        # only real (unpadded) time steps contribute to the attention-weight sum
        valid = ((chunk * tc + i) < t_real).astype(jnp.float32)
        return h_new, c_new, attn_acc + attn * valid

    carry0 = (h_scr[...], c_scr[...], jnp.zeros((bp, mp), jnp.float32))
    h_f, c_f, attn_chunk = lax.fori_loop(0, tc, step, carry0, unroll=True)
    h_scr[...] = h_f
    c_scr[...] = c_f
    attnsum_ref[...] += attn_chunk


def _default_energy_dtype():
    # bf16 VPU/EUP exists on v6e/v7x; keep f32 elementwise math on v5e and older generations.
    try:
        kind = jax.devices()[0].device_kind.lower()
    except Exception:
        return jnp.float32
    return jnp.bfloat16 if ("v6" in kind or "v7" in kind) else jnp.float32


def _vmem_limit_bytes():
    # Generation-aware VMEM request (v7x: 64 MiB/TC, v5e/v6e: 128 MiB) with headroom.
    try:
        cap = pltpu.get_tpu_info().vmem_capacity_bytes
        return int(cap * 3 // 4)
    except Exception:
        return 32 * 1024 * 1024


def make_params(key, hidden_size: int, output_size: int, padding_idx: int = 0):
    H, V = hidden_size, output_size
    ks = jax.random.split(key, 10)

    def init(k, shape, scale=0.1):
        return scale * jax.random.normal(k, shape, dtype=jnp.float32)

    emb = init(ks[0], (V, H))
    emb = emb.at[padding_idx].set(0.0)  # nn.Embedding(padding_idx=0) zeroes that row
    return dict(
        embedding=emb,
        wk=init(ks[1], (H, H)),            # attention.key_layer (no bias)
        wq=init(ks[2], (H, H)),            # attention.query_layer (no bias)
        we=init(ks[3], (1, H)),            # attention.energy_layer (no bias)
        w_ih=init(ks[4], (4 * H, 2 * H)),  # lstm.weight_ih_l0
        w_hh=init(ks[5], (4 * H, H)),      # lstm.weight_hh_l0
        b_ih=init(ks[6], (1, 4 * H)),
        b_hh=init(ks[7], (1, 4 * H)),
        w_out_hidden=init(ks[8], (H, 3 * H)),   # output_to_hidden (no bias)
        w_hidden_out=init(ks[9], (V, H)),       # hidden_to_output (no bias)
    )


def bahdanau_decoder_forward(params, target_tokens, target_lengths: List[int], hidden,
                             attention_keys, attention_values,
                             attention_values_lengths: List[int], *,
                             time_chunk: int = 16, energy_dtype=None):
    """Mirrors BahdanauDecoder.forward (conditional_attention=None, eval mode)."""
    B, T = target_tokens.shape
    M, _, H = attention_values.shape
    f32, bf16 = jnp.float32, jnp.bfloat16
    edt = _default_energy_dtype() if energy_dtype is None else energy_dtype

    Bp = _round_up(B, 8)                # sublane-pad batch
    Hp = _round_up(H, 128)              # lane-pad hidden
    Mp = _round_up(M, 8)                # sublane-pad memory
    Tc = int(time_chunk)
    T_pad = _round_up(T, Tc)
    n_chunks = T_pad // Tc
    dB, dH, dM = Bp - B, Hp - H, Mp - M

    # -------------- host-side precompute (everything off the serial recurrence) --------------
    # embedding lookup (dropout == identity in eval mode)
    emb_all = params["embedding"].astype(f32)[target_tokens]               # (B, T, H)

    w_ih = params["w_ih"].astype(f32)                                       # (4H, 2H)
    b_gate = (params["b_ih"] + params["b_hh"]).astype(f32)[0]               # (4H,) folded bias

    # emb-dependent gate pre-activations + folded bias as one dense XLA matmul
    gemb = jnp.einsum("bth,gh->btg", emb_all, w_ih[:, :H]) + b_gate         # (B, T, 4H)
    gemb = jnp.transpose(gemb, (1, 0, 2)).reshape(T, B, 4, H)
    gemb = jnp.pad(gemb, ((0, T_pad - T), (0, dB), (0, 0), (0, dH)))
    gemb = gemb.reshape(T_pad, Bp, 4 * Hp).astype(f32)                      # gate-blocked, padded

    # key/value projections as large XLA matmuls (reference applies key_layer to both)
    wk = params["wk"].astype(f32)
    keys = jnp.transpose(attention_keys, (1, 0, 2)).astype(f32)             # (B, M, H)
    vals = jnp.transpose(attention_values, (1, 0, 2)).astype(f32)           # (B, M, H)
    pk = jnp.pad(jnp.einsum("bmh,oh->bmo", keys, wk),
                 ((0, dB), (0, dM), (0, dH))).astype(edt)                   # (Bp, Mp, Hp)
    pv = jnp.pad(jnp.einsum("bmh,oh->bmo", vals, wk),
                 ((0, dB), (0, dM), (0, dH))).astype(edt)

    # finite additive mask bias (padded batch rows / memory cols are fully masked out)
    lengths = jnp.pad(jnp.asarray(attention_values_lengths, dtype=jnp.int32), (0, dB))
    valid = jnp.arange(Mp, dtype=jnp.int32)[None, :] < lengths[:, None]
    mask_bias = jnp.where(valid, 0.0, -1e30).astype(f32)                    # (Bp, Mp)

    h0 = jnp.pad(hidden[0][0].astype(f32), ((0, dB), (0, dH)))              # (Bp, Hp), L == 1
    c0 = jnp.pad(hidden[1][0].astype(f32), ((0, dB), (0, dH)))

    # fused / pre-transposed / gate-blocked / padded weights (no .T or concat inside the kernel)
    def gate_blocked_t(w):    # (4H, H_in) -> (Hp, 4Hp): transposed, per-gate-padded blocks
        wt = w.T.reshape(H, 4, H)
        wt = jnp.pad(wt, ((0, dH), (0, 0), (0, dH)))
        return wt.reshape(Hp, 4 * Hp)

    wq_t = jnp.pad(params["wq"].astype(f32).T, ((0, dH), (0, dH)))          # (Hp, Hp)
    whh_t = gate_blocked_t(params["w_hh"].astype(f32))                      # (Hp, 4Hp)
    w_h5 = jnp.concatenate([wq_t, whh_t], axis=1).astype(bf16)              # (Hp, 5Hp) fused
    wih_c = gate_blocked_t(w_ih[:, H:]).astype(bf16)                        # (Hp, 4Hp)
    we = jnp.pad(params["we"].astype(f32), ((0, 0), (0, dH))).astype(edt)   # (1, Hp)

    def inv(shape):  # grid-invariant full-array block
        nd = len(shape)
        return pl.BlockSpec(shape, lambda t, _nd=nd: (0,) * _nd)

    grid_spec = pltpu.PrefetchScalarGridSpec(
        num_scalar_prefetch=0,
        grid=(n_chunks,),
        in_specs=[
            pl.BlockSpec((Tc, Bp, 4 * Hp), lambda t: (t, 0, 0)),   # gemb chunk
            inv((Bp, Mp, Hp)),                                     # pk
            inv((Bp, Mp, Hp)),                                     # pv
            inv((Bp, Mp)),                                         # mask bias
            inv((Bp, Hp)), inv((Bp, Hp)),                          # h0, c0
            inv((Hp, 5 * Hp)),                                     # fused [wq | whh]
            inv((Hp, 4 * Hp)),                                     # wih (context half)
            inv((1, Hp)),                                          # energy weight
        ],
        out_specs=[
            pl.BlockSpec((Tc, Bp, Hp), lambda t: (t, 0, 0)),       # hidden sequence (bf16)
            pl.BlockSpec((Tc, Bp, Hp), lambda t: (t, 0, 0)),       # context sequence (bf16)
            pl.BlockSpec((Bp, Mp), lambda t: (0, 0)),              # accumulated attention
        ],
        scratch_shapes=[
            pltpu.VMEM((Bp, Hp), jnp.float32),                     # h state (carried over chunks)
            pltpu.VMEM((Bp, Hp), jnp.float32),                     # c state
        ],
    )

    kernel = functools.partial(_decoder_chunk_kernel, t_real=T, energy_dtype=edt)
    hseq, ctxseq, attn_sum = pl.pallas_call(
        kernel,
        out_shape=(
            jax.ShapeDtypeStruct((T_pad, Bp, Hp), jnp.bfloat16),
            jax.ShapeDtypeStruct((T_pad, Bp, Hp), jnp.bfloat16),
            jax.ShapeDtypeStruct((Bp, Mp), jnp.float32),
        ),
        grid_spec=grid_spec,
        compiler_params=pltpu.CompilerParams(
            dimension_semantics=("arbitrary",),       # recurrent carry across time chunks
            vmem_limit_bytes=_vmem_limit_bytes(),
        ),
    )(gemb, pk, pv, mask_bias, h0, c0, w_h5, wih_c, we)

    # -------------- deferred output projections: dense MXU matmuls in the wrapper --------------
    h_seq = hseq[:T, :B, :H]
    ctx_seq = ctxseq[:T, :B, :H]
    emb_tbh = jnp.transpose(emb_all, (1, 0, 2))                              # (T, B, H)
    pre_in = jnp.concatenate([emb_tbh.astype(bf16), h_seq, ctx_seq], axis=-1)  # (T, B, 3H)
    pre = jnp.dot(pre_in, params["w_out_hidden"].T.astype(bf16),
                  preferred_element_type=jnp.float32)                        # output_to_hidden
    logits = jnp.dot(pre.astype(bf16), params["w_hidden_out"].T.astype(bf16),
                     preferred_element_type=jnp.float32)                     # hidden_to_output

    attn_sum = attn_sum[:B, :M]
    seq_len = list(target_lengths)  # sort/unsort in the reference is a no-op on returned tensors
    return logits, seq_len, attn_sum


def _reference_forward(params, target_tokens, target_lengths, hidden,
                       attention_keys, attention_values, attention_values_lengths):
    """Pure-JAX f32 reference mirroring the PyTorch module (for a correctness check)."""
    B, T = target_tokens.shape
    M, _, H = attention_values.shape
    emb_all = params["embedding"][target_tokens]                    # (B, T, H)
    keys = jnp.transpose(attention_keys, (1, 0, 2))
    vals = jnp.transpose(attention_values, (1, 0, 2))
    wk, wq, we = params["wk"], params["wq"], params["we"]
    pk = keys @ wk.T
    pv = vals @ wk.T
    lengths = jnp.asarray(attention_values_lengths)
    mask = jnp.arange(M)[None, :] < lengths[:, None]
    h, c = hidden[0][0], hidden[1][0]
    w_ih, w_hh = params["w_ih"], params["w_hh"]
    b = params["b_ih"][0] + params["b_hh"][0]
    wo, wout = params["w_out_hidden"], params["w_hidden_out"]
    logits_list, attn_sum = [], jnp.zeros((B, M), jnp.float32)
    for t in range(T):
        emb = emb_all[:, t]
        pq = h @ wq.T
        e = jnp.tanh(pq[:, None, :] + pk)
        scores = jnp.einsum("bmh,h->bm", e, we[0])
        scores = jnp.where(mask, scores, -jnp.inf)
        attn = jax.nn.softmax(scores, axis=-1)
        context = jnp.einsum("bm,bmh->bh", attn, pv)
        x = jnp.concatenate([emb, context], axis=-1)
        gates = x @ w_ih.T + h @ w_hh.T + b
        i_g = jax.nn.sigmoid(gates[:, :H]); f_g = jax.nn.sigmoid(gates[:, H:2 * H])
        g_g = jnp.tanh(gates[:, 2 * H:3 * H]); o_g = jax.nn.sigmoid(gates[:, 3 * H:])
        c = f_g * c + i_g * g_g
        h = o_g * jnp.tanh(c)
        pre = jnp.concatenate([emb, h, context], axis=-1) @ wo.T
        logits_list.append(pre @ wout.T)
        attn_sum = attn_sum + attn
    return jnp.stack(logits_list, axis=0), attn_sum


if __name__ == "__main__":
    B, T, M, H, V = 2, 6, 8, 32, 16  # batch, target steps, num_memory, hidden, output symbols
    key = jax.random.PRNGKey(0)
    kp, kt, kv, km = jax.random.split(key, 4)

    params = make_params(kp, hidden_size=H, output_size=V, padding_idx=0)

    target_tokens = jax.random.randint(kt, (B, T), 0, V, dtype=jnp.int32)
    target_lengths = [T, T - 2]

    # initialize_hidden: same encoder message for hidden and cell, num_layers == 1
    encoder_message = 0.1 * jax.random.normal(km, (B, H), dtype=jnp.float32)
    h0 = jnp.broadcast_to(encoder_message[None], (1, B, H))
    hidden = (h0, h0)

    # encoded_commands used for both attention keys and values (as in forward())
    attention_values = 0.1 * jax.random.normal(kv, (M, B, H), dtype=jnp.float32)
    attention_keys = attention_values
    attention_values_lengths = [M, 5]  # max equals M (sequence_mask requirement)

    logits, seq_len, attn_sum = bahdanau_decoder_forward(
        params, target_tokens, target_lengths, hidden,
        attention_keys, attention_values, attention_values_lengths,
        time_chunk=4)  # T=6 -> padded to 8, two chunks (exercises cross-chunk state carry)
    jax.block_until_ready((logits, attn_sum))

    assert logits.shape == (T, B, V)
    assert attn_sum.shape == (B, M)
    assert bool(jnp.all(jnp.isfinite(logits)))

    # correctness check vs. pure-JAX f32 reference (bf16 matmul operands -> loose tolerance)
    ref_logits, ref_attn = _reference_forward(
        params, target_tokens, target_lengths, hidden,
        attention_keys, attention_values, attention_values_lengths)
    assert bool(jnp.allclose(logits, ref_logits, atol=1e-2, rtol=2e-2)), \
        float(jnp.max(jnp.abs(logits - ref_logits)))
    assert bool(jnp.allclose(attn_sum, ref_attn, atol=2e-2, rtol=2e-2)), \
        float(jnp.max(jnp.abs(attn_sum - ref_attn)))

    print("KERNEL_OK")
</pallas_src>

<mosaic_0001>
module attributes {stable_mosaic.version = 11 : i64} {
  func.func @_decoder_chunk_kernel(%arg0: i32, %arg1: memref<4x8x512xf32, #tpu.memory_space<vmem>>, %arg2: memref<8x8x128xf32, #tpu.memory_space<vmem>>, %arg3: memref<8x8x128xf32, #tpu.memory_space<vmem>>, %arg4: memref<8x8xf32, #tpu.memory_space<vmem>>, %arg5: memref<8x128xf32, #tpu.memory_space<vmem>>, %arg6: memref<8x128xf32, #tpu.memory_space<vmem>>, %arg7: memref<128x640xbf16, #tpu.memory_space<vmem>>, %arg8: memref<128x512xbf16, #tpu.memory_space<vmem>>, %arg9: memref<1x128xf32, #tpu.memory_space<vmem>>, %arg10: memref<4x8x128xbf16, #tpu.memory_space<vmem>>, %arg11: memref<4x8x128xbf16, #tpu.memory_space<vmem>>, %arg12: memref<8x8xf32, #tpu.memory_space<vmem>>, %arg13: memref<8x128xf32, #tpu.memory_space<vmem>>, %arg14: memref<8x128xf32, #tpu.memory_space<vmem>>) attributes {dimension_semantics = [#tpu.dimension_semantics<arbitrary>], iteration_bounds = array<i64: 2>, scalar_prefetch = 0 : i64, scratch_operands = 2 : i64, tpu.core_type = #tpu.core_type<tc>, window_params = [{transform_indices = @transform_0, window_bounds = array<i64: 4, 8, 512>}, {pipeline_mode = #tpu.pipeline_mode<synchronous>, transform_indices = @transform_1, window_bounds = array<i64: 8, 8, 128>}, {pipeline_mode = #tpu.pipeline_mode<synchronous>, transform_indices = @transform_2, window_bounds = array<i64: 8, 8, 128>}, {pipeline_mode = #tpu.pipeline_mode<synchronous>, transform_indices = @transform_3, window_bounds = array<i64: 8, 8>}, {pipeline_mode = #tpu.pipeline_mode<synchronous>, transform_indices = @transform_4, window_bounds = array<i64: 8, 128>}, {pipeline_mode = #tpu.pipeline_mode<synchronous>, transform_indices = @transform_5, window_bounds = array<i64: 8, 128>}, {pipeline_mode = #tpu.pipeline_mode<synchronous>, transform_indices = @transform_6, window_bounds = array<i64: 128, 640>}, {pipeline_mode = #tpu.pipeline_mode<synchronous>, transform_indices = @transform_7, window_bounds = array<i64: 128, 512>}, {pipeline_mode = #tpu.pipeline_mode<synchronous>, transform_indices = @transform_8, window_bounds = array<i64: 1, 128>}, {transform_indices = @transform_9, window_bounds = array<i64: 4, 8, 128>}, {transform_indices = @transform_10, window_bounds = array<i64: 4, 8, 128>}, {pipeline_mode = #tpu.pipeline_mode<synchronous>, transform_indices = @transform_11, window_bounds = array<i64: 8, 8>}]} {
    %c0_i32 = arith.constant 0 : i32
    %0 = arith.cmpi eq, %arg0, %c0_i32 : i32
    %1 = arith.extui %0 : i1 to i32
    %c0_i32_0 = arith.constant 0 : i32
    %2 = arith.cmpi ne, %1, %c0_i32_0 : i32
    scf.if %2 {
      %c0_118 = arith.constant 0 : index
      %c0_119 = arith.constant 0 : index
      %325 = vector.load %arg5[%c0_118, %c0_119] : memref<8x128xf32, #tpu.memory_space<vmem>>, vector<8x128xf32>
      %c0_120 = arith.constant 0 : index
      %c0_121 = arith.constant 0 : index
      %326 = vector.load %arg13[%c0_120, %c0_121] : memref<8x128xf32, #tpu.memory_space<vmem>>, vector<8x128xf32>
      tpu.vector_store %arg13[%c0_120, %c0_121], %325 {strides = array<i32>} : memref<8x128xf32, #tpu.memory_space<vmem>>, vector<8x128xf32>,
      %c0_122 = arith.constant 0 : index
      %c0_123 = arith.constant 0 : index
      %327 = vector.load %arg6[%c0_122, %c0_123] : memref<8x128xf32, #tpu.memory_space<vmem>>, vector<8x128xf32>
      %c0_124 = arith.constant 0 : index
      %c0_125 = arith.constant 0 : index
      %328 = vector.load %arg14[%c0_124, %c0_125] : memref<8x128xf32, #tpu.memory_space<vmem>>, vector<8x128xf32>
      tpu.vector_store %arg14[%c0_124, %c0_125], %327 {strides = array<i32>} : memref<8x128xf32, #tpu.memory_space<vmem>>, vector<8x128xf32>,
      %cst_126 = arith.constant 0.000000e+00 : f32
      %329 = vector.broadcast %cst_126 : f32 to vector<8x8xf32>
      %c0_127 = arith.constant 0 : index
      %c0_128 = arith.constant 0 : index
      %330 = vector.load %arg12[%c0_127, %c0_128] : memref<8x8xf32, #tpu.memory_space<vmem>>, vector<8x8xf32>
      tpu.vector_store %arg12[%c0_127, %c0_128], %329 {strides = array<i32>} : memref<8x8xf32, #tpu.memory_space<vmem>>, vector<8x8xf32>,
    } else {
    }
    %c0 = arith.constant 0 : index
    %c0_1 = arith.constant 0 : index
    %3 = vector.load %arg9[%c0, %c0_1] : memref<1x128xf32, #tpu.memory_space<vmem>>, vector<1x128xf32>
    %4 = vector.shape_cast %3 : vector<1x128xf32> to vector<128xf32>
    %5 = vector.shape_cast %4 : vector<128xf32> to vector<1x1x128xf32>
    %6 = vector.broadcast %5 : vector<1x1x128xf32> to vector<8x8x128xf32>
    %c0_2 = arith.constant 0 : index
    %c0_3 = arith.constant 0 : index
    %7 = vector.load %arg7[%c0_2, %c0_3] : memref<128x640xbf16, #tpu.memory_space<vmem>>, vector<128x640xbf16>
    %c0_4 = arith.constant 0 : index
    %c0_5 = arith.constant 0 : index
    %8 = vector.load %arg8[%c0_4, %c0_5] : memref<128x512xbf16, #tpu.memory_space<vmem>>, vector<128x512xbf16>
    %c0_6 = arith.constant 0 : index
    %c0_7 = arith.constant 0 : index
    %9 = vector.load %arg13[%c0_6, %c0_7] : memref<8x128xf32, #tpu.memory_space<vmem>>, vector<8x128xf32>
    %c0_8 = arith.constant 0 : index
    %c0_9 = arith.constant 0 : index
    %10 = vector.load %arg14[%c0_8, %c0_9] : memref<8x128xf32, #tpu.memory_space<vmem>>, vector<8x128xf32>
    %cst = arith.constant 0.000000e+00 : f32
    %11 = vector.broadcast %cst : f32 to vector<8x8xf32>
    %c0_i32_10 = arith.constant 0 : i32
    %12 = arith.truncf %9 : vector<8x128xf32> to vector<8x128xbf16>
    %cst_11 = arith.constant dense<0.000000e+00> : vector<8x640xf32>
    %13 = tpu.matmul %12, %7, %cst_11 {dimension_numbers = #tpu.dot_dimension_numbers<[1], [0], [0], [1], [0, 0, 1, 1], [], []>} : vector<8x128xbf16>, vector<128x640xbf16>, vector<8x640xf32> -> vector<8x640xf32>
    %14 = vector.extract_strided_slice %13 {offsets = [0, 0], sizes = [8, 128], strides = [1, 1]} : vector<8x640xf32> to vector<8x128xf32>
    %15 = vector.extract_strided_slice %13 {offsets = [0, 128], sizes = [8, 512], strides = [1, 1]} : vector<8x640xf32> to vector<8x512xf32>
    %16 = vector.shape_cast %14 : vector<8x128xf32> to vector<8x1x128xf32>
    %c0_12 = arith.constant 0 : index
    %c0_13 = arith.constant 0 : index
    %c0_14 = arith.constant 0 : index
    %17 = vector.load %arg2[%c0_12, %c0_13, %c0_14] : memref<8x8x128xf32, #tpu.memory_space<vmem>>, vector<8x8x128xf32>
    %18 = vector.broadcast %16 : vector<8x1x128xf32> to vector<8x8x128xf32>
    %19 = arith.addf %18, %17 : vector<8x8x128xf32>
    %20 = math.tanh %19 : vector<8x8x128xf32>
    %21 = arith.mulf %20, %6 : vector<8x8x128xf32>
    %cst_15 = arith.constant dense<0.000000e+00> : vector<8x8xf32>
    %22 = vector.multi_reduction <add>, %21, %cst_15 [2] : vector<8x8x128xf32> to vector<8x8xf32>
    %c0_16 = arith.constant 0 : index
    %c0_17 = arith.constant 0 : index
    %23 = vector.load %arg4[%c0_16, %c0_17] : memref<8x8xf32, #tpu.memory_space<vmem>>, vector<8x8xf32>
    %24 = arith.addf %22, %23 : vector<8x8xf32>
    %cst_18 = arith.constant dense<0xFF800000> : vector<8xf32>
    %25 = vector.multi_reduction <maximumf>, %24, %cst_18 [1] : vector<8x8xf32> to vector<8xf32>
    %26 = vector.shape_cast %25 : vector<8xf32> to vector<8x1xf32>
    %27 = vector.broadcast %26 : vector<8x1xf32> to vector<8x8xf32>
    %28 = arith.subf %24, %27 : vector<8x8xf32>
    %29 = math.exp %28 : vector<8x8xf32>
    %cst_19 = arith.constant dense<0.000000e+00> : vector<8xf32>
    %30 = vector.multi_reduction <add>, %29, %cst_19 [1] : vector<8x8xf32> to vector<8xf32>
    %31 = vector.shape_cast %30 : vector<8xf32> to vector<8x1xf32>
    %32 = tpu.reciprocal %31 {approx = true} : vector<8x1xf32> -> vector<8x1xf32>
    %33 = vector.broadcast %32 : vector<8x1xf32> to vector<8x8xf32>
    %34 = arith.mulf %29, %33 : vector<8x8xf32>
    %35 = vector.shape_cast %34 : vector<8x8xf32> to vector<8x8x1xf32>
    %c0_20 = arith.constant 0 : index
    %c0_21 = arith.constant 0 : index
    %c0_22 = arith.constant 0 : index
    %36 = vector.load %arg3[%c0_20, %c0_21, %c0_22] : memref<8x8x128xf32, #tpu.memory_space<vmem>>, vector<8x8x128xf32>
    %37 = vector.broadcast %35 : vector<8x8x1xf32> to vector<8x8x128xf32>
    %38 = arith.mulf %37, %36 : vector<8x8x128xf32>
    %cst_23 = arith.constant dense<0.000000e+00> : vector<8x128xf32>
    %39 = vector.multi_reduction <add>, %38, %cst_23 [1] : vector<8x8x128xf32> to vector<8x128xf32>
    %40 = arith.truncf %39 : vector<8x128xf32> to vector<8x128xbf16>
    %41 = arith.index_cast %c0_i32_10 : i32 to index
    %c0_24 = arith.constant 0 : index
    %c0_25 = arith.constant 0 : index
    %42 = vector.load %arg1[%41, %c0_24, %c0_25] : memref<4x8x512xf32, #tpu.memory_space<vmem>>, vector<1x8x512xf32>
    %43 = vector.shape_cast %42 : vector<1x8x512xf32> to vector<8x512xf32>
    %44 = arith.addf %43, %15 : vector<8x512xf32>
    %cst_26 = arith.constant dense<0.000000e+00> : vector<8x512xf32>
    %45 = tpu.matmul %40, %8, %cst_26 {dimension_numbers = #tpu.dot_dimension_numbers<[1], [0], [0], [1], [0, 0, 1, 1], [], []>} : vector<8x128xbf16>, vector<128x512xbf16>, vector<8x512xf32> -> vector<8x512xf32>
    %46 = arith.addf %44, %45 : vector<8x512xf32>
    %47 = vector.extract_strided_slice %46 {offsets = [0, 0], sizes = [8, 128], strides = [1, 1]} : vector<8x512xf32> to vector<8x128xf32>
    %48 = arith.negf %47 : vector<8x128xf32>
    %49 = math.exp %48 : vector<8x128xf32>
    %cst_27 = arith.constant 1.000000e+00 : f32
    %50 = vector.broadcast %cst_27 : f32 to vector<8x128xf32>
    %51 = arith.addf %50, %49 : vector<8x128xf32>
    %52 = arith.divf %50, %51 : vector<8x128xf32>
    %53 = vector.extract_strided_slice %46 {offsets = [0, 128], sizes = [8, 128], strides = [1, 1]} : vector<8x512xf32> to vector<8x128xf32>
    %54 = arith.negf %53 : vector<8x128xf32>
    %55 = math.exp %54 : vector<8x128xf32>
    %cst_28 = arith.constant 1.000000e+00 : f32
    %56 = vector.broadcast %cst_28 : f32 to vector<8x128xf32>
    %57 = arith.addf %56, %55 : vector<8x128xf32>
    %58 = arith.divf %56, %57 : vector<8x128xf32>
    %59 = vector.extract_strided_slice %46 {offsets = [0, 256], sizes = [8, 128], strides = [1, 1]} : vector<8x512xf32> to vector<8x128xf32>
    %60 = math.tanh %59 : vector<8x128xf32>
    %61 = vector.extract_strided_slice %46 {offsets = [0, 384], sizes = [8, 128], strides = [1, 1]} : vector<8x512xf32> to vector<8x128xf32>
    %62 = arith.negf %61 : vector<8x128xf32>
    %63 = math.exp %62 : vector<8x128xf32>
    %cst_29 = arith.constant 1.000000e+00 : f32
    %64 = vector.broadcast %cst_29 : f32 to vector<8x128xf32>
    %65 = arith.addf %64, %63 : vector<8x128xf32>
    %66 = arith.divf %64, %65 : vector<8x128xf32>
    %67 = arith.mulf %58, %10 : vector<8x128xf32>
    %68 = arith.mulf %52, %60 : vector<8x128xf32>
    %69 = arith.addf %67, %68 : vector<8x128xf32>
    %70 = math.tanh %69 : vector<8x128xf32>
    %71 = arith.mulf %66, %70 : vector<8x128xf32>
    %72 = arith.truncf %71 : vector<8x128xf32> to vector<8x128xbf16>
    %73 = arith.index_cast %c0_i32_10 : i32 to index
    %c0_30 = arith.constant 0 : index
    %c0_31 = arith.constant 0 : index
    %74 = vector.load %arg10[%73, %c0_30, %c0_31] : memref<4x8x128xbf16, #tpu.memory_space<vmem>>, vector<1x8x128xbf16>
    %75 = vector.shape_cast %74 : vector<1x8x128xbf16> to vector<8x128xbf16>
    %76 = vector.shape_cast %72 : vector<8x128xbf16> to vector<1x8x128xbf16>
    tpu.vector_store %arg10[%73, %c0_30, %c0_31], %76 {strides = array<i32>} : memref<4x8x128xbf16, #tpu.memory_space<vmem>>, vector<1x8x128xbf16>,
    %77 = arith.index_cast %c0_i32_10 : i32 to index
    %c0_32 = arith.constant 0 : index
    %c0_33 = arith.constant 0 : index
    %78 = vector.load %arg11[%77, %c0_32, %c0_33] : memref<4x8x128xbf16, #tpu.memory_space<vmem>>, vector<1x8x128xbf16>
    %79 = vector.shape_cast %78 : vector<1x8x128xbf16> to vector<8x128xbf16>
    %80 = vector.shape_cast %40 : vector<8x128xbf16> to vector<1x8x128xbf16>
    tpu.vector_store %arg11[%77, %c0_32, %c0_33], %80 {strides = array<i32>} : memref<4x8x128xbf16, #tpu.memory_space<vmem>>, vector<1x8x128xbf16>,
    %c4_i32 = arith.constant 4 : i32
    %81 = arith.muli %arg0, %c4_i32 : i32
    %82 = arith.addi %81, %c0_i32_10 : i32
    %c6_i32 = arith.constant 6 : i32
    %83 = arith.cmpi slt, %82, %c6_i32 : i32
    %84 = arith.extui %83 : i1 to i32
    %85 = arith.sitofp %84 : i32 to f32
    %86 = vector.broadcast %85 : f32 to vector<8x8xf32>
    %87 = arith.mulf %34, %86 : vector<8x8xf32>
    %88 = arith.addf %11, %87 : vector<8x8xf32>
    %c1_i32 = arith.constant 1 : i32
    %89 = arith.truncf %71 : vector<8x128xf32> to vector<8x128xbf16>
    %cst_34 = arith.constant dense<0.000000e+00> : vector<8x640xf32>
    %90 = tpu.matmul %89, %7, %cst_34 {dimension_numbers = #tpu.dot_dimension_numbers<[1], [0], [0], [1], [0, 0, 1, 1], [], []>} : vector<8x128xbf16>, vector<128x640xbf16>, vector<8x640xf32> -> vector<8x640xf32>
    %91 = vector.extract_strided_slice %90 {offsets = [0, 0], sizes = [8, 128], strides = [1, 1]} : vector<8x640xf32> to vector<8x128xf32>
    %92 = vector.extract_strided_slice %90 {offsets = [0, 128], sizes = [8, 512], strides = [1, 1]} : vector<8x640xf32> to vector<8x512xf32>
    %93 = vector.shape_cast %91 : vector<8x128xf32> to vector<8x1x128xf32>
    %c0_35 = arith.constant 0 : index
    %c0_36 = arith.constant 0 : index
    %c0_37 = arith.constant 0 : index
    %94 = vector.load %arg2[%c0_35, %c0_36, %c0_37] : memref<8x8x128xf32, #tpu.memory_space<vmem>>, vector<8x8x128xf32>
    %95 = vector.broadcast %93 : vector<8x1x128xf32> to vector<8x8x128xf32>
    %96 = arith.addf %95, %94 : vector<8x8x128xf32>
    %97 = math.tanh %96 : vector<8x8x128xf32>
    %98 = arith.mulf %97, %6 : vector<8x8x128xf32>
    %cst_38 = arith.constant dense<0.000000e+00> : vector<8x8xf32>
    %99 = vector.multi_reduction <add>, %98, %cst_38 [2] : vector<8x8x128xf32> to vector<8x8xf32>
    %c0_39 = arith.constant 0 : index
    %c0_40 = arith.constant 0 : index
    %100 = vector.load %arg4[%c0_39, %c0_40] : memref<8x8xf32, #tpu.memory_space<vmem>>, vector<8x8xf32>
    %101 = arith.addf %99, %100 : vector<8x8xf32>
    %cst_41 = arith.constant dense<0xFF800000> : vector<8xf32>
    %102 = vector.multi_reduction <maximumf>, %101, %cst_41 [1] : vector<8x8xf32> to vector<8xf32>
    %103 = vector.shape_cast %102 : vector<8xf32> to vector<8x1xf32>
    %104 = vector.broadcast %103 : vector<8x1xf32> to vector<8x8xf32>
    %105 = arith.subf %101, %104 : vector<8x8xf32>
    %106 = math.exp %105 : vector<8x8xf32>
    %cst_42 = arith.constant dense<0.000000e+00> : vector<8xf32>
    %107 = vector.multi_reduction <add>, %106, %cst_42 [1] : vector<8x8xf32> to vector<8xf32>
    %108 = vector.shape_cast %107 : vector<8xf32> to vector<8x1xf32>
    %109 = tpu.reciprocal %108 {approx = true} : vector<8x1xf32> -> vector<8x1xf32>
    %110 = vector.broadcast %109 : vector<8x1xf32> to vector<8x8xf32>
    %111 = arith.mulf %106, %110 : vector<8x8xf32>
    %112 = vector.shape_cast %111 : vector<8x8xf32> to vector<8x8x1xf32>
    %c0_43 = arith.constant 0 : index
    %c0_44 = arith.constant 0 : index
    %c0_45 = arith.constant 0 : index
    %113 = vector.load %arg3[%c0_43, %c0_44, %c0_45] : memref<8x8x128xf32, #tpu.memory_space<vmem>>, vector<8x8x128xf32>
    %114 = vector.broadcast %112 : vector<8x8x1xf32> to vector<8x8x128xf32>
    %115 = arith.mulf %114, %113 : vector<8x8x128xf32>
    %cst_46 = arith.constant dense<0.000000e+00> : vector<8x128xf32>
    %116 = vector.multi_reduction <add>, %115, %cst_46 [1] : vector<8x8x128xf32> to vector<8x128xf32>
    %117 = arith.truncf %116 : vector<8x128xf32> to vector<8x128xbf16>
    %118 = arith.index_cast %c1_i32 : i32 to index
    %c0_47 = arith.constant 0 : index
    %c0_48 = arith.constant 0 : index
    %119 = vector.load %arg1[%118, %c0_47, %c0_48] : memref<4x8x512xf32, #tpu.memory_space<vmem>>, vector<1x8x512xf32>
    %120 = vector.shape_cast %119 : vector<1x8x512xf32> to vector<8x512xf32>
    %121 = arith.addf %120, %92 : vector<8x512xf32>
    %cst_49 = arith.constant dense<0.000000e+00> : vector<8x512xf32>
    %122 = tpu.matmul %117, %8, %cst_49 {dimension_numbers = #tpu.dot_dimension_numbers<[1], [0], [0], [1], [0, 0, 1, 1], [], []>} : vector<8x128xbf16>, vector<128x512xbf16>, vector<8x512xf32> -> vector<8x512xf32>
    %123 = arith.addf %121, %122 : vector<8x512xf32>
    %124 = vector.extract_strided_slice %123 {offsets = [0, 0], sizes = [8, 128], strides = [1, 1]} : vector<8x512xf32> to vector<8x128xf32>
    %125 = arith.negf %124 : vector<8x128xf32>
    %126 = math.exp %125 : vector<8x128xf32>
    %cst_50 = arith.constant 1.000000e+00 : f32
    %127 = vector.broadcast %cst_50 : f32 to vector<8x128xf32>
    %128 = arith.addf %127, %126 : vector<8x128xf32>
    %129 = arith.divf %127, %128 : vector<8x128xf32>
    %130 = vector.extract_strided_slice %123 {offsets = [0, 128], sizes = [8, 128], strides = [1, 1]} : vector<8x512xf32> to vector<8x128xf32>
    %131 = arith.negf %130 : vector<8x128xf32>
    %132 = math.exp %131 : vector<8x128xf32>
    %cst_51 = arith.constant 1.000000e+00 : f32
    %133 = vector.broadcast %cst_51 : f32 to vector<8x128xf32>
    %134 = arith.addf %133, %132 : vector<8x128xf32>
    %135 = arith.divf %133, %134 : vector<8x128xf32>
    %136 = vector.extract_strided_slice %123 {offsets = [0, 256], sizes = [8, 128], strides = [1, 1]} : vector<8x512xf32> to vector<8x128xf32>
    %137 = math.tanh %136 : vector<8x128xf32>
    %138 = vector.extract_strided_slice %123 {offsets = [0, 384], sizes = [8, 128], strides = [1, 1]} : vector<8x512xf32> to vector<8x128xf32>
    %139 = arith.negf %138 : vector<8x128xf32>
    %140 = math.exp %139 : vector<8x128xf32>
    %cst_52 = arith.constant 1.000000e+00 : f32
    %141 = vector.broadcast %cst_52 : f32 to vector<8x128xf32>
    %142 = arith.addf %141, %140 : vector<8x128xf32>
    %143 = arith.divf %141, %142 : vector<8x128xf32>
    %144 = arith.mulf %135, %69 : vector<8x128xf32>
    %145 = arith.mulf %129, %137 : vector<8x128xf32>
    %146 = arith.addf %144, %145 : vector<8x128xf32>
    %147 = math.tanh %146 : vector<8x128xf32>
    %148 = arith.mulf %143, %147 : vector<8x128xf32>
    %149 = arith.truncf %148 : vector<8x128xf32> to vector<8x128xbf16>
    %150 = arith.index_cast %c1_i32 : i32 to index
    %c0_53 = arith.constant 0 : index
    %c0_54 = arith.constant 0 : index
    %151 = vector.load %arg10[%150, %c0_53, %c0_54] : memref<4x8x128xbf16, #tpu.memory_space<vmem>>, vector<1x8x128xbf16>
    %152 = vector.shape_cast %151 : vector<1x8x128xbf16> to vector<8x128xbf16>
    %153 = vector.shape_cast %149 : vector<8x128xbf16> to vector<1x8x128xbf16>
    tpu.vector_store %arg10[%150, %c0_53, %c0_54], %153 {strides = array<i32>} : memref<4x8x128xbf16, #tpu.memory_space<vmem>>, vector<1x8x128xbf16>,
    %154 = arith.index_cast %c1_i32 : i32 to index
    %c0_55 = arith.constant 0 : index
    %c0_56 = arith.constant 0 : index
    %155 = vector.load %arg11[%154, %c0_55, %c0_56] : memref<4x8x128xbf16, #tpu.memory_space<vmem>>, vector<1x8x128xbf16>
    %156 = vector.shape_cast %155 : vector<1x8x128xbf16> to vector<8x128xbf16>
    %157 = vector.shape_cast %117 : vector<8x128xbf16> to vector<1x8x128xbf16>
    tpu.vector_store %arg11[%154, %c0_55, %c0_56], %157 {strides = array<i32>} : memref<4x8x128xbf16, #tpu.memory_space<vmem>>, vector<1x8x128xbf16>,
    %c4_i32_57 = arith.constant 4 : i32
    %158 = arith.muli %arg0, %c4_i32_57 : i32
    %159 = arith.addi %158, %c1_i32 : i32
    %c6_i32_58 = arith.constant 6 : i32
    %160 = arith.cmpi slt, %159, %c6_i32_58 : i32
    %161 = arith.extui %160 : i1 to i32
    %162 = arith.sitofp %161 : i32 to f32
    %163 = vector.broadcast %162 : f32 to vector<8x8xf32>
    %164 = arith.mulf %111, %163 : vector<8x8xf32>
    %165 = arith.addf %88, %164 : vector<8x8xf32>
    %c2_i32 = arith.constant 2 : i32
    %166 = arith.truncf %148 : vector<8x128xf32> to vector<8x128xbf16>
    %cst_59 = arith.constant dense<0.000000e+00> : vector<8x640xf32>
    %167 = tpu.matmul %166, %7, %cst_59 {dimension_numbers = #tpu.dot_dimension_numbers<[1], [0], [0], [1], [0, 0, 1, 1], [], []>} : vector<8x128xbf16>, vector<128x640xbf16>, vector<8x640xf32> -> vector<8x640xf32>
    %168 = vector.extract_strided_slice %167 {offsets = [0, 0], sizes = [8, 128], strides = [1, 1]} : vector<8x640xf32> to vector<8x128xf32>
    %169 = vector.extract_strided_slice %167 {offsets = [0, 128], sizes = [8, 512], strides = [1, 1]} : vector<8x640xf32> to vector<8x512xf32>
    %170 = vector.shape_cast %168 : vector<8x128xf32> to vector<8x1x128xf32>
    %c0_60 = arith.constant 0 : index
    %c0_61 = arith.constant 0 : index
    %c0_62 = arith.constant 0 : index
    %171 = vector.load %arg2[%c0_60, %c0_61, %c0_62] : memref<8x8x128xf32, #tpu.memory_space<vmem>>, vector<8x8x128xf32>
    %172 = vector.broadcast %170 : vector<8x1x128xf32> to vector<8x8x128xf32>
    %173 = arith.addf %172, %171 : vector<8x8x128xf32>
    %174 = math.tanh %173 : vector<8x8x128xf32>
    %175 = arith.mulf %174, %6 : vector<8x8x128xf32>
    %cst_63 = arith.constant dense<0.000000e+00> : vector<8x8xf32>
    %176 = vector.multi_reduction <add>, %175, %cst_63 [2] : vector<8x8x128xf32> to vector<8x8xf32>
    %c0_64 = arith.constant 0 : index
    %c0_65 = arith.constant 0 : index
    %177 = vector.load %arg4[%c0_64, %c0_65] : memref<8x8xf32, #tpu.memory_space<vmem>>, vector<8x8xf32>
    %178 = arith.addf %176, %177 : vector<8x8xf32>
    %cst_66 = arith.constant dense<0xFF800000> : vector<8xf32>
    %179 = vector.multi_reduction <maximumf>, %178, %cst_66 [1] : vector<8x8xf32> to vector<8xf32>
    %180 = vector.shape_cast %179 : vector<8xf32> to vector<8x1xf32>
    %181 = vector.broadcast %180 : vector<8x1xf32> to vector<8x8xf32>
    %182 = arith.subf %178, %181 : vector<8x8xf32>
    %183 = math.exp %182 : vector<8x8xf32>
    %cst_67 = arith.constant dense<0.000000e+00> : vector<8xf32>
    %184 = vector.multi_reduction <add>, %183, %cst_67 [1] : vector<8x8xf32> to vector<8xf32>
    %185 = vector.shape_cast %184 : vector<8xf32> to vector<8x1xf32>
    %186 = tpu.reciprocal %185 {approx = true} : vector<8x1xf32> -> vector<8x1xf32>
    %187 = vector.broadcast %186 : vector<8x1xf32> to vector<8x8xf32>
    %188 = arith.mulf %183, %187 : vector<8x8xf32>
    %189 = vector.shape_cast %188 : vector<8x8xf32> to vector<8x8x1xf32>
    %c0_68 = arith.constant 0 : index
    %c0_69 = arith.constant 0 : index
    %c0_70 = arith.constant 0 : index
    %190 = vector.load %arg3[%c0_68, %c0_69, %c0_70] : memref<8x8x128xf32, #tpu.memory_space<vmem>>, vector<8x8x128xf32>
    %191 = vector.broadcast %189 : vector<8x8x1xf32> to vector<8x8x128xf32>
    %192 = arith.mulf %191, %190 : vector<8x8x128xf32>
    %cst_71 = arith.constant dense<0.000000e+00> : vector<8x128xf32>
    %193 = vector.multi_reduction <add>, %192, %cst_71 [1] : vector<8x8x128xf32> to vector<8x128xf32>
    %194 = arith.truncf %193 : vector<8x128xf32> to vector<8x128xbf16>
    %195 = arith.index_cast %c2_i32 : i32 to index
    %c0_72 = arith.constant 0 : index
    %c0_73 = arith.constant 0 : index
    %196 = vector.load %arg1[%195, %c0_72, %c0_73] : memref<4x8x512xf32, #tpu.memory_space<vmem>>, vector<1x8x512xf32>
    %197 = vector.shape_cast %196 : vector<1x8x512xf32> to vector<8x512xf32>
    %198 = arith.addf %197, %169 : vector<8x512xf32>
    %cst_74 = arith.constant dense<0.000000e+00> : vector<8x512xf32>
    %199 = tpu.matmul %194, %8, %cst_74 {dimension_numbers = #tpu.dot_dimension_numbers<[1], [0], [0], [1], [0, 0, 1, 1], [], []>} : vector<8x128xbf16>, vector<128x512xbf16>, vector<8x512xf32> -> vector<8x512xf32>
    %200 = arith.addf %198, %199 : vector<8x512xf32>
    %201 = vector.extract_strided_slice %200 {offsets = [0, 0], sizes = [8, 128], strides = [1, 1]} : vector<8x512xf32> to vector<8x128xf32>
    %202 = arith.negf %201 : vector<8x128xf32>
    %203 = math.exp %202 : vector<8x128xf32>
    %cst_75 = arith.constant 1.000000e+00 : f32
    %204 = vector.broadcast %cst_75 : f32 to vector<8x128xf32>
    %205 = arith.addf %204, %203 : vector<8x128xf32>
    %206 = arith.divf %204, %205 : vector<8x128xf32>
    %207 = vector.extract_strided_slice %200 {offsets = [0, 128], sizes = [8, 128], strides = [1, 1]} : vector<8x512xf32> to vector<8x128xf32>
    %208 = arith.negf %207 : vector<8x128xf32>
    %209 = math.exp %208 : vector<8x128xf32>
    %cst_76 = arith.constant 1.000000e+00 : f32
    %210 = vector.broadcast %cst_76 : f32 to vector<8x128xf32>
    %211 = arith.addf %210, %209 : vector<8x128xf32>
    %212 = arith.divf %210, %211 : vector<8x128xf32>
    %213 = vector.extract_strided_slice %200 {offsets = [0, 256], sizes = [8, 128], strides = [1, 1]} : vector<8x512xf32> to vector<8x128xf32>
    %214 = math.tanh %213 : vector<8x128xf32>
    %215 = vector.extract_strided_slice %200 {offsets = [0, 384], sizes = [8, 128], strides = [1, 1]} : vector<8x512xf32> to vector<8x128xf32>
    %216 = arith.negf %215 : vector<8x128xf32>
    %217 = math.exp %216 : vector<8x128xf32>
    %cst_77 = arith.constant 1.000000e+00 : f32
    %218 = vector.broadcast %cst_77 : f32 to vector<8x128xf32>
    %219 = arith.addf %218, %217 : vector<8x128xf32>
    %220 = arith.divf %218, %219 : vector<8x128xf32>
    %221 = arith.mulf %212, %146 : vector<8x128xf32>
    %222 = arith.mulf %206, %214 : vector<8x128xf32>
    %223 = arith.addf %221, %222 : vector<8x128xf32>
    %224 = math.tanh %223 : vector<8x128xf32>
    %225 = arith.mulf %220, %224 : vector<8x128xf32>
    %226 = arith.truncf %225 : vector<8x128xf32> to vector<8x128xbf16>
    %227 = arith.index_cast %c2_i32 : i32 to index
    %c0_78 = arith.constant 0 : index
    %c0_79 = arith.constant 0 : index
    %228 = vector.load %arg10[%227, %c0_78, %c0_79] : memref<4x8x128xbf16, #tpu.memory_space<vmem>>, vector<1x8x128xbf16>
    %229 = vector.shape_cast %228 : vector<1x8x128xbf16> to vector<8x128xbf16>
    %230 = vector.shape_cast %226 : vector<8x128xbf16> to vector<1x8x128xbf16>
    tpu.vector_store %arg10[%227, %c0_78, %c0_79], %230 {strides = array<i32>} : memref<4x8x128xbf16, #tpu.memory_space<vmem>>, vector<1x8x128xbf16>,
    %231 = arith.index_cast %c2_i32 : i32 to index
    %c0_80 = arith.constant 0 : index
    %c0_81 = arith.constant 0 : index
    %232 = vector.load %arg11[%231, %c0_80, %c0_81] : memref<4x8x128xbf16, #tpu.memory_space<vmem>>, vector<1x8x128xbf16>
    %233 = vector.shape_cast %232 : vector<1x8x128xbf16> to vector<8x128xbf16>
    %234 = vector.shape_cast %194 : vector<8x128xbf16> to vector<1x8x128xbf16>
    tpu.vector_store %arg11[%231, %c0_80, %c0_81], %234 {strides = array<i32>} : memref<4x8x128xbf16, #tpu.memory_space<vmem>>, vector<1x8x128xbf16>,
    %c4_i32_82 = arith.constant 4 : i32
    %235 = arith.muli %arg0, %c4_i32_82 : i32
    %236 = arith.addi %235, %c2_i32 : i32
    %c6_i32_83 = arith.constant 6 : i32
    %237 = arith.cmpi slt, %236, %c6_i32_83 : i32
    %238 = arith.extui %237 : i1 to i32
    %239 = arith.sitofp %238 : i32 to f32
    %240 = vector.broadcast %239 : f32 to vector<8x8xf32>
    %241 = arith.mulf %188, %240 : vector<8x8xf32>
    %242 = arith.addf %165, %241 : vector<8x8xf32>
    %c3_i32 = arith.constant 3 : i32
    %243 = arith.truncf %225 : vector<8x128xf32> to vector<8x128xbf16>
    %cst_84 = arith.constant dense<0.000000e+00> : vector<8x640xf32>
    %244 = tpu.matmul %243, %7, %cst_84 {dimension_numbers = #tpu.dot_dimension_numbers<[1], [0], [0], [1], [0, 0, 1, 1], [], []>} : vector<8x128xbf16>, vector<128x640xbf16>, vector<8x640xf32> -> vector<8x640xf32>
    %245 = vector.extract_strided_slice %244 {offsets = [0, 0], sizes = [8, 128], strides = [1, 1]} : vector<8x640xf32> to vector<8x128xf32>
    %246 = vector.extract_strided_slice %244 {offsets = [0, 128], sizes = [8, 512], strides = [1, 1]} : vector<8x640xf32> to vector<8x512xf32>
    %247 = vector.shape_cast %245 : vector<8x128xf32> to vector<8x1x128xf32>
    %c0_85 = arith.constant 0 : index
    %c0_86 = arith.constant 0 : index
    %c0_87 = arith.constant 0 : index
    %248 = vector.load %arg2[%c0_85, %c0_86, %c0_87] : memref<8x8x128xf32, #tpu.memory_space<vmem>>, vector<8x8x128xf32>
    %249 = vector.broadcast %247 : vector<8x1x128xf32> to vector<8x8x128xf32>
    %250 = arith.addf %249, %248 : vector<8x8x128xf32>
    %251 = math.tanh %250 : vector<8x8x128xf32>
    %252 = arith.mulf %251, %6 : vector<8x8x128xf32>
    %cst_88 = arith.constant dense<0.000000e+00> : vector<8x8xf32>
    %253 = vector.multi_reduction <add>, %252, %cst_88 [2] : vector<8x8x128xf32> to vector<8x8xf32>
    %c0_89 = arith.constant 0 : index
    %c0_90 = arith.constant 0 : index
    %254 = vector.load %arg4[%c0_89, %c0_90] : memref<8x8xf32, #tpu.memory_space<vmem>>, vector<8x8xf32>
    %255 = arith.addf %253, %254 : vector<8x8xf32>
    %cst_91 = arith.constant dense<0xFF800000> : vector<8xf32>
    %256 = vector.multi_reduction <maximumf>, %255, %cst_91 [1] : vector<8x8xf32> to vector<8xf32>
    %257 = vector.shape_cast %256 : vector<8xf32> to vector<8x1xf32>
    %258 = vector.broadcast %257 : vector<8x1xf32> to vector<8x8xf32>
    %259 = arith.subf %255, %258 : vector<8x8xf32>
    %260 = math.exp %259 : vector<8x8xf32>
    %cst_92 = arith.constant dense<0.000000e+00> : vector<8xf32>
    %261 = vector.multi_reduction <add>, %260, %cst_92 [1] : vector<8x8xf32> to vector<8xf32>
    %262 = vector.shape_cast %261 : vector<8xf32> to vector<8x1xf32>
    %263 = tpu.reciprocal %262 {approx = true} : vector<8x1xf32> -> vector<8x1xf32>
    %264 = vector.broadcast %263 : vector<8x1xf32> to vector<8x8xf32>
    %265 = arith.mulf %260, %264 : vector<8x8xf32>
    %266 = vector.shape_cast %265 : vector<8x8xf32> to vector<8x8x1xf32>
    %c0_93 = arith.constant 0 : index
    %c0_94 = arith.constant 0 : index
    %c0_95 = arith.constant 0 : index
    %267 = vector.load %arg3[%c0_93, %c0_94, %c0_95] : memref<8x8x128xf32, #tpu.memory_space<vmem>>, vector<8x8x128xf32>
    %268 = vector.broadcast %266 : vector<8x8x1xf32> to vector<8x8x128xf32>
    %269 = arith.mulf %268, %267 : vector<8x8x128xf32>
    %cst_96 = arith.constant dense<0.000000e+00> : vector<8x128xf32>
    %270 = vector.multi_reduction <add>, %269, %cst_96 [1] : vector<8x8x128xf32> to vector<8x128xf32>
    %271 = arith.truncf %270 : vector<8x128xf32> to vector<8x128xbf16>
    %272 = arith.index_cast %c3_i32 : i32 to index
    %c0_97 = arith.constant 0 : index
    %c0_98 = arith.constant 0 : index
    %273 = vector.load %arg1[%272, %c0_97, %c0_98] : memref<4x8x512xf32, #tpu.memory_space<vmem>>, vector<1x8x512xf32>
    %274 = vector.shape_cast %273 : vector<1x8x512xf32> to vector<8x512xf32>
    %275 = arith.addf %274, %246 : vector<8x512xf32>
    %cst_99 = arith.constant dense<0.000000e+00> : vector<8x512xf32>
    %276 = tpu.matmul %271, %8, %cst_99 {dimension_numbers = #tpu.dot_dimension_numbers<[1], [0], [0], [1], [0, 0, 1, 1], [], []>} : vector<8x128xbf16>, vector<128x512xbf16>, vector<8x512xf32> -> vector<8x512xf32>
    %277 = arith.addf %275, %276 : vector<8x512xf32>
    %278 = vector.extract_strided_slice %277 {offsets = [0, 0], sizes = [8, 128], strides = [1, 1]} : vector<8x512xf32> to vector<8x128xf32>
    %279 = arith.negf %278 : vector<8x128xf32>
    %280 = math.exp %279 : vector<8x128xf32>
    %cst_100 = arith.constant 1.000000e+00 : f32
    %281 = vector.broadcast %cst_100 : f32 to vector<8x128xf32>
    %282 = arith.addf %281, %280 : vector<8x128xf32>
    %283 = arith.divf %281, %282 : vector<8x128xf32>
    %284 = vector.extract_strided_slice %277 {offsets = [0, 128], sizes = [8, 128], strides = [1, 1]} : vector<8x512xf32> to vector<8x128xf32>
    %285 = arith.negf %284 : vector<8x128xf32>
    %286 = math.exp %285 : vector<8x128xf32>
    %cst_101 = arith.constant 1.000000e+00 : f32
    %287 = vector.broadcast %cst_101 : f32 to vector<8x128xf32>
    %288 = arith.addf %287, %286 : vector<8x128xf32>
    %289 = arith.divf %287, %288 : vector<8x128xf32>
    %290 = vector.extract_strided_slice %277 {offsets = [0, 256], sizes = [8, 128], strides = [1, 1]} : vector<8x512xf32> to vector<8x128xf32>
    %291 = math.tanh %290 : vector<8x128xf32>
    %292 = vector.extract_strided_slice %277 {offsets = [0, 384], sizes = [8, 128], strides = [1, 1]} : vector<8x512xf32> to vector<8x128xf32>
    %293 = arith.negf %292 : vector<8x128xf32>
    %294 = math.exp %293 : vector<8x128xf32>
    %cst_102 = arith.constant 1.000000e+00 : f32
    %295 = vector.broadcast %cst_102 : f32 to vector<8x128xf32>
    %296 = arith.addf %295, %294 : vector<8x128xf32>
    %297 = arith.divf %295, %296 : vector<8x128xf32>
    %298 = arith.mulf %289, %223 : vector<8x128xf32>
    %299 = arith.mulf %283, %291 : vector<8x128xf32>
    %300 = arith.addf %298, %299 : vector<8x128xf32>
    %301 = math.tanh %300 : vector<8x128xf32>
    %302 = arith.mulf %297, %301 : vector<8x128xf32>
    %303 = arith.truncf %302 : vector<8x128xf32> to vector<8x128xbf16>
    %304 = arith.index_cast %c3_i32 : i32 to index
    %c0_103 = arith.constant 0 : index
    %c0_104 = arith.constant 0 : index
    %305 = vector.load %arg10[%304, %c0_103, %c0_104] : memref<4x8x128xbf16, #tpu.memory_space<vmem>>, vector<1x8x128xbf16>
    %306 = vector.shape_cast %305 : vector<1x8x128xbf16> to vector<8x128xbf16>
    %307 = vector.shape_cast %303 : vector<8x128xbf16> to vector<1x8x128xbf16>
    tpu.vector_store %arg10[%304, %c0_103, %c0_104], %307 {strides = array<i32>} : memref<4x8x128xbf16, #tpu.memory_space<vmem>>, vector<1x8x128xbf16>,
    %308 = arith.index_cast %c3_i32 : i32 to index
    %c0_105 = arith.constant 0 : index
    %c0_106 = arith.constant 0 : index
    %309 = vector.load %arg11[%308, %c0_105, %c0_106] : memref<4x8x128xbf16, #tpu.memory_space<vmem>>, vector<1x8x128xbf16>
    %310 = vector.shape_cast %309 : vector<1x8x128xbf16> to vector<8x128xbf16>
    %311 = vector.shape_cast %271 : vector<8x128xbf16> to vector<1x8x128xbf16>
    tpu.vector_store %arg11[%308, %c0_105, %c0_106], %311 {strides = array<i32>} : memref<4x8x128xbf16, #tpu.memory_space<vmem>>, vector<1x8x128xbf16>,
    %c4_i32_107 = arith.constant 4 : i32
    %312 = arith.muli %arg0, %c4_i32_107 : i32
    %313 = arith.addi %312, %c3_i32 : i32
    %c6_i32_108 = arith.constant 6 : i32
    %314 = arith.cmpi slt, %313, %c6_i32_108 : i32
    %315 = arith.extui %314 : i1 to i32
    %316 = arith.sitofp %315 : i32 to f32
    %317 = vector.broadcast %316 : f32 to vector<8x8xf32>
    %318 = arith.mulf %265, %317 : vector<8x8xf32>
    %319 = arith.addf %242, %318 : vector<8x8xf32>
    %c4_i32_109 = arith.constant 4 : i32
    %c0_110 = arith.constant 0 : index
    %c0_111 = arith.constant 0 : index
    %320 = vector.load %arg13[%c0_110, %c0_111] : memref<8x128xf32, #tpu.memory_space<vmem>>, vector<8x128xf32>
    tpu.vector_store %arg13[%c0_110, %c0_111], %302 {strides = array<i32>} : memref<8x128xf32, #tpu.memory_space<vmem>>, vector<8x128xf32>,
    %c0_112 = arith.constant 0 : index
    %c0_113 = arith.constant 0 : index
    %321 = vector.load %arg14[%c0_112, %c0_113] : memref<8x128xf32, #tpu.memory_space<vmem>>, vector<8x128xf32>
    tpu.vector_store %arg14[%c0_112, %c0_113], %300 {strides = array<i32>} : memref<8x128xf32, #tpu.memory_space<vmem>>, vector<8x128xf32>,
    %c0_114 = arith.constant 0 : index
    %c0_115 = arith.constant 0 : index
    %322 = vector.load %arg12[%c0_114, %c0_115] : memref<8x8xf32, #tpu.memory_space<vmem>>, vector<8x8xf32>
    %323 = arith.addf %322, %319 : vector<8x8xf32>
    %c0_116 = arith.constant 0 : index
    %c0_117 = arith.constant 0 : index
    %324 = vector.load %arg12[%c0_116, %c0_117] : memref<8x8xf32, #tpu.memory_space<vmem>>, vector<8x8xf32>
    tpu.vector_store %arg12[%c0_116, %c0_117], %323 {strides = array<i32>} : memref<8x8xf32, #tpu.memory_space<vmem>>, vector<8x8xf32>,
    return
  }
  func.func @transform_0(%arg0: i32) -> (i32, i32, i32) {
    %c0_i32 = arith.constant 0 : i32
    %c0_i32_0 = arith.constant 0 : i32
    %c0_i32_1 = arith.constant 0 : i32
    return %arg0, %c0_i32, %c0_i32_0 : i32, i32, i32
  }
  func.func @transform_1(%arg0: i32) -> (i32, i32, i32) {
    %c0_i32 = arith.constant 0 : i32
    %c0_i32_0 = arith.constant 0 : i32
    %c0_i32_1 = arith.constant 0 : i32
    %c0_i32_2 = arith.constant 0 : i32
    return %c0_i32, %c0_i32_0, %c0_i32_1 : i32, i32, i32
  }
  func.func @transform_2(%arg0: i32) -> (i32, i32, i32) {
    %c0_i32 = arith.constant 0 : i32
    %c0_i32_0 = arith.constant 0 : i32
    %c0_i32_1 = arith.constant 0 : i32
    %c0_i32_2 = arith.constant 0 : i32
    return %c0_i32, %c0_i32_0, %c0_i32_1 : i32, i32, i32
  }
  func.func @transform_3(%arg0: i32) -> (i32, i32) {
    %c0_i32 = arith.constant 0 : i32
    %c0_i32_0 = arith.constant 0 : i32
    %c0_i32_1 = arith.constant 0 : i32
    return %c0_i32, %c0_i32_0 : i32, i32
  }
  func.func @transform_4(%arg0: i32) -> (i32, i32) {
    %c0_i32 = arith.constant 0 : i32
    %c0_i32_0 = arith.constant 0 : i32
    %c0_i32_1 = arith.constant 0 : i32
    return %c0_i32, %c0_i32_0 : i32, i32
  }
  func.func @transform_5(%arg0: i32) -> (i32, i32) {
    %c0_i32 = arith.constant 0 : i32
    %c0_i32_0 = arith.constant 0 : i32
    %c0_i32_1 = arith.constant 0 : i32
    return %c0_i32, %c0_i32_0 : i32, i32
  }
  func.func @transform_6(%arg0: i32) -> (i32, i32) {
    %c0_i32 = arith.constant 0 : i32
    %c0_i32_0 = arith.constant 0 : i32
    %c0_i32_1 = arith.constant 0 : i32
    return %c0_i32, %c0_i32_0 : i32, i32
  }
  func.func @transform_7(%arg0: i32) -> (i32, i32) {
    %c0_i32 = arith.constant 0 : i32
    %c0_i32_0 = arith.constant 0 : i32
    %c0_i32_1 = arith.constant 0 : i32
    return %c0_i32, %c0_i32_0 : i32, i32
  }
  func.func @transform_8(%arg0: i32) -> (i32, i32) {
    %c0_i32 = arith.constant 0 : i32
    %c0_i32_0 = arith.constant 0 : i32
    %c0_i32_1 = arith.constant 0 : i32
    return %c0_i32, %c0_i32_0 : i32, i32
  }
  func.func @transform_9(%arg0: i32) -> (i32, i32, i32) {
    %c0_i32 = arith.constant 0 : i32
    %c0_i32_0 = arith.constant 0 : i32
    %c0_i32_1 = arith.constant 0 : i32
    return %arg0, %c0_i32, %c0_i32_0 : i32, i32, i32
  }
  func.func @transform_10(%arg0: i32) -> (i32, i32, i32) {
    %c0_i32 = arith.constant 0 : i32
    %c0_i32_0 = arith.constant 0 : i32
    %c0_i32_1 = arith.constant 0 : i32
    return %arg0, %c0_i32, %c0_i32_0 : i32, i32, i32
  }
  func.func @transform_11(%arg0: i32) -> (i32, i32) {
    %c0_i32 = arith.constant 0 : i32
    %c0_i32_0 = arith.constant 0 : i32
    %c0_i32_1 = arith.constant 0 : i32
    return %c0_i32, %c0_i32_0 : i32, i32
  }
}

</mosaic_0001>

<bundles_post_ra>
// kernel: tpu_custom_call.1
= control target key start
LH: loop header
LB: loop body
LE: loop exit
PB: predicated region body
PF: predicated region fallthrough
CT: control target
= control target key end

     0   :  { %s7851_s0 = inlined_call_operand.hbm [shape: f32[8,8,512], index: 0, kind: input, shape index: {}]   ;;  %s7852_s1 = inlined_call_operand.hbm [shape: f32[8,8,128], index: 1, kind: input, shape index: {}]   ;;  %s7853_s2 = inlined_call_operand.hbm [shape: f32[8,8,128], index: 2, kind: input, shape index: {}]   ;;  %s7854_s3 = inlined_call_operand.vmem [shape: f32[8,8], index: 3, kind: input, shape index: {}]   ;;  %s7855_s4 = inlined_call_operand.hbm [shape: f32[8,128], index: 4, kind: input, shape index: {}]   ;;  %s7856_s5 = inlined_call_operand.vmem [shape: f32[8,128], index: 5, kind: input, shape index: {}]   ;;  %s7857_s6 = inlined_call_operand.hbm [shape: bf16[128,640], index: 6, kind: input, shape index: {}]   ;;  %s7858_s7 = inlined_call_operand.hbm [shape: bf16[128,512], index: 7, kind: input, shape index: {}]   ;;  %s7859_s8 = inlined_call_operand.vmem [shape: f32[1,128], index: 8, kind: input, shape index: {}]   ;;  %s7860_s9 = inlined_call_operand.hbm [shape: bf16[8,8,128], index: 9, kind: output, shape index: {0}]   ;;  %s7861_s10 = inlined_call_operand.hbm [shape: bf16[8,8,128], index: 10, kind: output, shape index: {1}]   ;;  %s7862_s11 = inlined_call_operand.hbm [shape: f32[8,8], index: 11, kind: output, shape index: {2}]  }
   0x1   :  { %7997 = sst [smem:[#allocation99_spill]] %s7851_s0 }
   0x2   :  { %7998 = sst [smem:[#allocation100_spill]] %s7852_s1 }
   0x3   :  { %7999 = sst [smem:[#allocation101_spill]] %s7853_s2 }
   0x4   :  { %8000 = sst [smem:[#allocation102_spill]] %s7854_s3 }
   0x5   :  { %8001 = sst [smem:[#allocation103_spill]] %s7860_s9 }
   0x6   :  { %8002 = sst [smem:[#allocation104_spill]] %s7861_s10 }
   0x7   :  { %8003 = sst [smem:[#allocation105_spill]] %s7862_s11 }
   0x8   :  { %17 = vsyncpa [#allocation5], 0 }
   0x9   :  { %19 = vsyncpa [#allocation5 + $0x1], 0 }
   0xa   :  { %20 = vsyncpa [#allocation8], 0 }
   0xb   :  { %21 = vsyncpa [#allocation11], 0 }
   0xc   :  { %22 = vsyncpa [#allocation14], 0 }
   0xd   :  { %23 = vsyncpa [#allocation6], 0 }
   0xe   :  { %25 = vsyncpa [#allocation6 + $0x1], 0 }
   0xf   :  { %26 = vsyncpa [#allocation17], 0 }
  0x10   :  { %28 = vsyncpa [#allocation17 + $0x1], 0  ;;  %s6119_s17 = smov 0   ;;  %s6121_s18 = smov 0  }
  0x11   :  { %s6123_s19 = smov 0   ;;  %s6125_s20 = smov 0  }
  0x12 LB: > { %s6035_s21 = smov [#allocation7]   ;;  %s6140_s23 = sadd.s32 4294967295, %s6033_s20   ;;  %s6033_s20 = sphi %s6125_s20, %s8276_s20   ;;  %s6029_s19 = sphi %s6123_s19, %s8275_s19   ;;  %s6025_s18 = sphi %s6121_s18, %s8274_s18   ;;  %s6021_s17 = sphi %s6119_s17, %s8273_s17  }
  0x13   : > { %s318_s22 = sshll.u32 %s6035_s21, 4  ;;  %p4875_p0 = scmp.ge.s32.totalorder %s6033_s20, 1  ;;  %s6146_s22 = int_to_ptr.vmem [resolvable:$true] %s318_s22 }
  0x14   : > { %p7866_p1 = scmp.eq.s32.totalorder %s6140_s23, 0  ;;  %p306_p2 = scmp.lt.s32.totalorder %s6033_s20, 3 }
  0x15   : > { %s6036_s25 = smov [#allocation10]   ;;  %s6037_s28 = smov [#allocation9]  }
  0x16   : > { %p6148_p4 = pnand %p4875_p0, %p306_p2  ;;  %s348_s26 = sshll.u32 %s6036_s25, 4  ;;  %s6161_s26 = int_to_ptr.vmem [resolvable:$true] %s348_s26 }
  0x17   : > { %s331_s29 = sshll.u32 %s6037_s28, 4  ;;  %s8006_s1 = sld [smem:[#allocation100_spill]]  ;;  %s6163_s29 = int_to_ptr.vmem [resolvable:$true] %s331_s29 }
  0x18   : > { %s8004_s24 = scalar_select %p6148_p4, 1, 0 }
  0x19   : > { %p5224_p6 = pneg %p6148_p4 }
  0x1b   : > { %p6157_p7 = pnand %p5224_p6, %p7866_p1 }
  0x1d   : > { %s5723_s13 = scalar_lea.hbm %s8006_s1, 1024  ;;  %p6173_p9 = pneg %p6157_p7 }
  0x1e   : > { %p5724_p8 = scmp.ne.s32.totalorder %s8006_s1, %s5723_s13  ;;  %p5730_p12 = scmp.lt.u32.totalorder %s5723_s13, %s8006_s1 }
  0x20   : > { %p5726_p10 = pnand %p6173_p9, %p5724_p8 }
  0x22   : > { %p5727_p11 = pneg %p5726_p10 }
  0x24   : > { %p5732_p13 = pnand %p5730_p12, %p5727_p11 }
  0x26   : > { %5735 = shalt.err (!%p5732_p13)
}
  0x27   : > { %s5736_s28 = scalar_lea.vmem %s6146_s22, 1024  ;;  %p5744_p5 = scmp.lt.s32.totalorder %s6146_s22, %s6146_s22 }
  0x28   : > { %p5737_p0 = scmp.ne.s32.totalorder %s6146_s22, %s5736_s28  ;;  %p5745_p3 = scmp.lt.s32.totalorder %s5736_s28, %s5736_s28 }
  0x2a   : > { %p5739_p2 = pnand %p5737_p0, %p6173_p9  ;;  %p5746_p8 = por %p5745_p3, %p5744_p5 }
  0x2c   : > { %p5740_p6 = pneg %p5739_p2 }
  0x2e   : > { %p5747_p10 = pnand %p5746_p8, %p5740_p6 }
  0x30   : > { %5750 = shalt.err (!%p5747_p10)
}
  0x31   : > { %s6038_s30 = smov 128   ;;  %s6039_s12 = smov 8  }
  0x32   : > { %5227 = dma.hbm_to_vmem [thread:$0]  (!%p6157_p7), %s8006_s1, 1024, %s6146_s22, [#allocation8], %s6038_s30, %s6038_s30, %s6039_s12  }
  0x33   : > { %s5751_s25 = scalar_lea.hbm %s7855_s4, 128 }
  0x34   : > { %p5752_p3 = scmp.ne.s32.totalorder %s7855_s4, %s5751_s25  ;;  %p5758_p12 = scmp.lt.u32.totalorder %s5751_s25, %s7855_s4 }
  0x36   : > { %p5754_p5 = pnand %p5752_p3, %p6173_p9 }
  0x38   : > { %p5755_p11 = pneg %p5754_p5 }
  0x3a   : > { %p5760_p13 = pnand %p5758_p12, %p5755_p11 }
  0x3c   : > { %5763 = shalt.err (!%p5760_p13)
}
  0x3d   : > { %s5764_s22 = scalar_lea.vmem %s6161_s26, 128  ;;  %p5772_p8 = scmp.lt.s32.totalorder %s6161_s26, %s6161_s26 }
  0x3e   : > { %p5765_p0 = scmp.ne.s32.totalorder %s6161_s26, %s5764_s22  ;;  %p5773_p10 = scmp.lt.s32.totalorder %s5764_s22, %s5764_s22 }
  0x40   : > { %p5767_p2 = pnand %p5765_p0, %p6173_p9  ;;  %p5774_p3 = por %p5773_p10, %p5772_p8 }
  0x42   : > { %p5768_p6 = pneg %p5767_p2 }
  0x44   : > { %p5775_p5 = pnand %p5774_p3, %p5768_p6 }
  0x46   : > { %5778 = shalt.err (!%p5775_p5)
}
  0x47   : > { %5233 = dma.hbm_to_vmem [thread:$0]  (!%p6157_p7), %s7855_s4, 128, %s6161_s26, [#allocation11]  }
  0x48   : > { %s8008_s2 = sld [smem:[#allocation101_spill]] }
  0x4e   : > { %s5779_s14 = scalar_lea.hbm %s8008_s2, 1024 }
  0x4f   : > { %p5780_p11 = scmp.ne.s32.totalorder %s8008_s2, %s5779_s14  ;;  %p5786_p0 = scmp.lt.u32.totalorder %s5779_s14, %s8008_s2 }
  0x51   : > { %p5782_p12 = pnand %p5780_p11, %p6173_p9 }
  0x53   : > { %p5783_p13 = pneg %p5782_p12 }
  0x55   : > { %p5788_p2 = pnand %p5786_p0, %p5783_p13 }
  0x57   : > { %5791 = shalt.err (!%p5788_p2)
}
  0x58   : > { %s5792_s26 = scalar_lea.vmem %s6163_s29, 1024  ;;  %p5800_p3 = scmp.lt.s32.totalorder %s6163_s29, %s6163_s29 }
  0x59   : > { %p5793_p6 = scmp.ne.s32.totalorder %s6163_s29, %s5792_s26  ;;  %p5801_p5 = scmp.lt.s32.totalorder %s5792_s26, %s5792_s26 }
  0x5b   : > { %p5795_p8 = pnand %p5793_p6, %p6173_p9  ;;  %p5802_p11 = por %p5801_p5, %p5800_p3 }
  0x5d   : > { %p5796_p10 = pneg %p5795_p8 }
  0x5f   : > { %p5803_p12 = pnand %p5802_p11, %p5796_p10 }
  0x61   : > { %5806 = shalt.err (!%p5803_p12)
}
  0x62   : > { %5230 = dma.hbm_to_vmem [thread:$0]  (!%p6157_p7), %s8008_s2, 1024, %s6163_s29, [#allocation8], %s6038_s30, %s6038_s30, %s6039_s12  }
  0x63   : > { %s6040_s10 = smov [#allocation12]   ;;  %s5807_s15 = scalar_lea.hbm %s7857_s6, 5120 }
  0x64   : > { %s361_s11 = sshll.u32 %s6040_s10, 4  ;;  %p5808_p13 = scmp.ne.s32.totalorder %s7857_s6, %s5807_s15  ;;  %s362_s11 = int_to_ptr.vmem [resolvable:$true] %s361_s11 }
  0x65   : > { %p5814_p6 = scmp.lt.u32.totalorder %s5807_s15, %s7857_s6 }
  0x66   : > { %p5810_p0 = pnand %p5808_p13, %p6173_p9 }
  0x68   : > { %p5811_p2 = pneg %p5810_p0 }
  0x6a   : > { %p5816_p8 = pnand %p5814_p6, %p5811_p2 }
  0x6c   : > { %5819 = shalt.err (!%p5816_p8)
}
  0x6d   : > { %s5820_s29 = scalar_lea.vmem %s362_s11, 5120  ;;  %p5828_p11 = scmp.lt.s32.totalorder %s362_s11, %s362_s11 }
  0x6e   : > { %p5821_p10 = scmp.ne.s32.totalorder %s362_s11, %s5820_s29  ;;  %p5829_p12 = scmp.lt.s32.totalorder %s5820_s29, %s5820_s29 }
  0x70   : > { %p5823_p3 = pnand %p5821_p10, %p6173_p9  ;;  %p5830_p1 = por %p5829_p12, %p5828_p11 }
  0x72   : > { %p5824_p5 = pneg %p5823_p3 }
  0x74   : > { %p5831_p4 = pnand %p5830_p1, %p5824_p5 }
  0x76   : > { %5834 = shalt.err (!%p5831_p4)
}
  0x77   : > { %s6041_s30 = smov 320   ;;  %s6042_s12 = smov 20  }
  0x78   : > { %5236 = dma.hbm_to_vmem [thread:$0]  (!%p6157_p7), %s7857_s6, 5120, %s362_s11, [#allocation11], %s6041_s30, %s6041_s30, %s6042_s12  }
  0x79   : > { %s6043_s10 = smov [#allocation13]   ;;  %s5835_s21 = scalar_lea.hbm %s7858_s7, 4096 }
  0x7a   : > { %s374_s13 = sshll.u32 %s6043_s10, 4  ;;  %p5836_p1 = scmp.ne.s32.totalorder %s7858_s7, %s5835_s21  ;;  %s375_s13 = int_to_ptr.vmem [resolvable:$true] %s374_s13 }
  0x7b   : > { %p5842_p0 = scmp.lt.u32.totalorder %s5835_s21, %s7858_s7 }
  0x7c   : > { %p5838_p4 = pnand %p5836_p1, %p6173_p9 }
  0x7e   : > { %p5839_p13 = pneg %p5838_p4 }
  0x80   : > { %p5844_p2 = pnand %p5842_p0, %p5839_p13 }
  0x82   : > { %5847 = shalt.err (!%p5844_p2)
}
  0x83   : > { %s5848_s11 = scalar_lea.vmem %s375_s13, 4096  ;;  %p5856_p3 = scmp.lt.s32.totalorder %s375_s13, %s375_s13 }
  0x84   : > { %p5849_p6 = scmp.ne.s32.totalorder %s375_s13, %s5848_s11  ;;  %p5857_p5 = scmp.lt.s32.totalorder %s5848_s11, %s5848_s11 }
  0x86   : > { %p5851_p8 = pnand %p5849_p6, %p6173_p9  ;;  %p5858_p11 = por %p5857_p5, %p5856_p3 }
  0x88   : > { %p5852_p10 = pneg %p5851_p8 }
  0x8a   : > { %p5859_p12 = pnand %p5858_p11, %p5852_p10 }
  0x8c   : > { %5862 = shalt.err (!%p5859_p12)
}
  0x8d   : > { %s6044_s30 = smov 256   ;;  %s6045_s16 = smov 16  }
  0x8e   : > { %5239 = dma.hbm_to_vmem [thread:$0]  (!%p6157_p7), %s7858_s7, 4096, %s375_s13, [#allocation14], %s6044_s30, %s6044_s30, %s6045_s16  }
  0x8f   : > { %s7868_s9 = sadd.s32 4294967294, %s6033_s20   ;;  %s6284_s10 = sadd.s32 1, %s6033_s20  }
  0x90   : > { %s41_s14 = sadd.s32 1, %s6029_s19  ;;  %s38_s15 = ssub.s32 %s6033_s20, %s6284_s10 }
  0x91   : > { %p48_p9 = scmp.ne.s32.totalorder %s6029_s19, %s6025_s18  ;;  %p39_p1 = scmp.eq.s32.totalorder %s38_s15, 0 }
  0x92   : > { %p49_p4 = scmp.eq.s32.totalorder %s6033_s20, 0  ;;  %p54_p13 = scmp.ne.s32.totalorder %s6025_s18, %s6021_s17 }
  0x93   : > { %p7869_p0 = scmp.eq.s32.totalorder %s6140_s23, 1  ;;  %p8009_p6 = scmp.eq.s32.totalorder %s6140_s23, 0 }
  0x94   : > { %s6296_s21 = scalar_select %p39_p1, %s6029_s19, %s41_s14  }
  0x95   : > { %p50_p2 = por %p49_p4, %p48_p9  ;;  %p6300_p8 = por %p8009_p6, %p54_p13 }
  0x96   : > { %p6306_p7 = por %p7869_p0, %p48_p9  ;;  %p252_p10 = scmp.eq.s32.totalorder %s7868_s9, 1 }
  0x97   : > { %p5256_p3 = scmp.lt.s32.totalorder %s6033_s20, 2  ;;  %s391_s25 = sand.u32 1, %s6029_s19  }
  0x98   : > { %s8011_s13 = scalar_select %p6306_p7, 1, 0 }
  0x99   : > { %p6314_p5 = por %p252_p10, %p54_p13  ;;  %s4882_s26 = sshll.u32 %s391_s25, 7 }
  0x9a   : > { %s5043_s29 = sshll.u32 %s6033_s20, 11  ;;  %s8013_s0 = sld [smem:[#allocation99_spill]] }
  0x9b   : > { %s8012_s28 = scalar_select %p6314_p5, 1, 0 }
  0x9c   : > { %s395_s12 = scalar_lea.vmem [#allocation4], %s4882_s26  ;;  %p6324_p11 = pnand %p5256_p3, %p50_p2 }
  0x9d   : > { %s403_s22 = sshll.u32 %s395_s12, 4  ;;  %s6330_s15 = scalar_lea.sflag [#allocation5], %s391_s25  ;;  %s6328_s22 = int_to_ptr.vmem [resolvable:$true] %s403_s22 }
  0x9e   : > { %p5865_p9 = pneg %p6324_p11 }
  0xa0   : > { %s6322_s16 = scalar_lea.hbm %s8013_s0, %s5043_s29  ;;  %s5868_s11 = scalar_lea.hbm %s8013_s0, 4096 }
  0xa1   : > { %s5863_s9 = scalar_lea.hbm %s6322_s16, 2048  ;;  %p5869_p13 = scmp.lt.u32.totalorder %s6322_s16, %s8013_s0 }
  0xa2   : > { %p5864_p12 = scmp.ne.s32.totalorder %s6322_s16, %s5863_s9  ;;  %p5870_p2 = scmp.lt.u32.totalorder %s5868_s11, %s5863_s9 }
  0xa3   : > { %p5872_p10 = scmp.lt.u32.totalorder %s5863_s9, %s6322_s16 }
  0xa4   : > { %p5866_p1 = pnand %p5865_p9, %p5864_p12  ;;  %p5871_p6 = por %p5870_p2, %p5869_p13 }
  0xa6   : > { %p5867_p4 = pneg %p5866_p1  ;;  %p5873_p3 = por %p5872_p10, %p5871_p6 }
  0xa8   : > { %p5874_p0 = pnand %p5873_p3, %p5867_p4 }
  0xaa   : > { %5877 = shalt.err (!%p5874_p0)
}
  0xab   : > { %s5878_s25 = scalar_lea.vmem %s6328_s22, 2048  ;;  %s6046_s26 = smov [#allocation4]  }
  0xac   : > { %p5879_p12 = scmp.ne.s32.totalorder %s6328_s22, %s5878_s25  ;;  %s5883_s29 = sshll.u32 %s6046_s26, 4  ;;  %s5884_s29 = int_to_ptr.vmem [resolvable:$false] %s5883_s29 }
  0xad   : > { %s5885_s30 = scalar_lea.vmem %s5884_s29, 4096  ;;  %p5886_p7 = scmp.lt.s32.totalorder %s6328_s22, %s5884_s29 }
  0xae   : > { %p5881_p1 = pnand %p5879_p12, %p5865_p9  ;;  %p5887_p13 = scmp.lt.s32.totalorder %s5885_s30, %s5878_s25 }
  0xb0   : > { %p5882_p5 = pneg %p5881_p1  ;;  %p5888_p2 = por %p5887_p13, %p5886_p7 }
  0xb2   : > { %p5889_p6 = pnand %p5888_p2, %p5882_p5 }
  0xb4   : > { %5892 = shalt.err (!%p5889_p6)
}
  0xb5   : > { %s6047_s9 = smov 512   ;;  %s6048_s11 = smov 32  }
  0xb6   : > { %5243 = dma.hbm_to_vmem [thread:$0]  (!%p6324_p11), %s6322_s16, 2048, %s6328_s22, %s6330_s15, %s6047_s9, %s6047_s9, %s6048_s11  }
  0xb7   : > { %p8015_p0 = scmp.ne.s32.totalorder %s8004_s24, 0 }
  0xb9   : > { %415 = sbr.rel (%p8015_p0) target bundleno = 6013 (0x177d), region = 56 }
  0xc0   : > { %s6361_s12 = sand.u32 1, %s6025_s18  }
  0xc1   : > { %s4887_s25 = sshll.u32 %s6361_s12, 7  ;;  %s418_s26 = scalar_lea.sflag [#allocation5], %s6361_s12 }
  0xc2   : > { %s6365_s29 = scalar_lea.vmem [#allocation4], %s4887_s25 }
  0xc3   : > { %5992 = dma.done.wait (%p6300_p8), %s418_s26, 2048  }
  0xc4   : > { %5994 = vsyncadd (%p6300_p8), %s418_s26, 4294965248  ;;  %p8016_p7 = scmp.eq.s32.totalorder %s6140_s23, 0 }
  0xc6   : > { %5996 = dma.done.wait (%p8016_p7), [#allocation8], 2048   ;;  %p8017_p5 = pmov %p8016_p7 }
  0xc8   : > { %5998 = vsyncadd (%p8017_p5), [#allocation8], 4294965248  ;;  %p8018_p11 = pmov %p8017_p5 }
  0xc9   : > { %p8019_p9 = pmov %p8017_p5 }
  0xca   : > { %6000 = dma.done.wait (%p8018_p11), [#allocation11], 5248  }
  0xcb   : > { %6002 = vsyncadd (%p8019_p9), [#allocation11], 4294962048  ;;  %p8020_p4 = pmov %p8017_p5 }
  0xcd   : > { %6004 = dma.done.wait (%p8020_p4), [#allocation14], 4096   ;;  %p8021_p10 = pmov %p8020_p4 }
  0xce   : > { %s4893_s24 = sshll.u32 %s6361_s12, 4  ;;  %p8022_p8 = scmp.ne.s32.totalorder %s6140_s23, 0 }
  0xcf   : > { %6006 = vsyncadd (%p8021_p10), [#allocation14], 4294963200  ;;  %s6384_s27 = scalar_lea.vmem [#allocation15], %s4893_s24  ;;  %s6386_s16 = scalar_lea.vmem [#allocation16], %s4893_s24  ;;  %v493_v0 = vld [vmem:[#allocation10] sm:$0xff] (!%p8022_p8)  ;;  %v495_v1 = vld [vmem:[%s7856_s5] sm:$0xff] (!%p8022_p8) }
  0xd0   : > { %492 = sbr.rel (%p8022_p8) target bundleno = 215 (0xd7), region = 84  ;;  %vm497_vm0 = vcmask (!%p8022_p8), 64512   ;;  %494 = vst [vmem:[#allocation2] sm:$0xff] (!%p8022_p8), %v493_v0  ;;  %496 = vst [vmem:[#allocation3] sm:$0xff] (!%p8022_p8), %v495_v1  ;;  %v6049_v2 = vmov (!%p8022_p8), 0.0  }
  0xd1   : > { %498 = vst.msk [vmem:[#allocation18] sm:$0xff] (!%p8022_p8), %vm497_vm0, %v6049_v2 }
  0xd7 PF: > { %v5320_v3 = vld [vmem:[#allocation12 + $0x4] ss:$20 sps:$4 sm:$0xff]   ;;  %v924_v4 = vlaneseq  ;;  %v5322_v5 = vld [vmem:[#allocation12] ss:$20 sps:$4 sm:$0xff]   ;;  %v7873_v6 = vmov 0   ;;  %s8024_s3 = sld [smem:[#allocation102_spill]] }
  0xd8   : > { %829 = vmatprep.mubr.bf16.mxu0 %v7873_v6  ;;  %5318 = vset.pattern.permute.xlu0 %v7873_v6  ;;  %v5323_v7 = vld [vmem:[#allocation12 + $0x2c] ss:$20 sps:$4 sm:$0xff]   ;;  %v5325_v8 = vld [vmem:[#allocation12 + $0x28] ss:$20 sps:$4 sm:$0xff]   ;;  %v5328_v11 = vld [vmem:[#allocation12 + $0x50] ss:$20 sps:$4 sm:$0xff]  }
  0xd9   : > { %797 = vmatprep.subr.bf16.mxu0 %v5320_v3  ;;  %5319 = vset.pattern.permute.xlu1 %v7873_v6  ;;  %v5326_v9 = vld [vmem:[#allocation12 + $0x54] ss:$20 sps:$4 sm:$0xff]   ;;  %v6398_v10 = vshrl.u32 %v924_v4, 7  ;;  %v5329_v12 = vld [vmem:[#allocation12 + $0x7c] ss:$20 sps:$4 sm:$0xff]   ;;  %v970_v58 = vld [vmem:[#allocation7 + $0x8] sm:$0xff] }
  0xda   : > { %798 = vmatpush1.bf16.msra.mxu0 %v5322_v5  ;;  %870 = vmatprep.mubr.bf16.mxu1 %v7873_v6  ;;  %v5331_v15 = vld [vmem:[#allocation12 + $0x78] ss:$20 sps:$4 sm:$0xff]   ;;  %v5334_v22 = vld [vmem:[#allocation12 + $0xa0] ss:$20 sps:$4 sm:$0xff]   ;;  %v5337_v27 = vld [vmem:[#allocation12 + $0xc8] ss:$20 sps:$4 sm:$0xff]  }
  0xdb   : > { %799 = vmatprep.subr.bf16.mxu0 %v5323_v7  ;;  %v6401_v13 = vsub.s32 1, %v6398_v10  ;;  %v6404_v14 = vsub.s32 0, %v6398_v10  ;;  %v5332_v16 = vld [vmem:[#allocation12 + $0xa4] ss:$20 sps:$4 sm:$0xff]   ;;  %v6407_v17 = vsub.s32 2, %v6398_v10  ;;  %v6410_v18 = vsub.s32 4, %v6398_v10 }
  0xdc   : > { %v6422_v23 = vsub.s32 3, %v6398_v10  ;;  %v5335_v24 = vld [vmem:[#allocation12 + $0xcc] ss:$20 sps:$4 sm:$0xff]   ;;  %v6429_v28 = vsub.s32 5, %v6398_v10  ;;  %v5338_v29 = vld [vmem:[#allocation12 + $0xf4] ss:$20 sps:$4 sm:$0xff]  }
  0xdd   : > { %8023 = vst [vmem:[#allocation26_spill] sm:$0xff] %v6410_v18  ;;  %v6415_v19 = vld [vmem:[%s8024_s3] sm:$0xff]  ;;  %v5340_v31 = vld [vmem:[#allocation12 + $0xf0] ss:$20 sps:$4 sm:$0xff]   ;;  %v6051_v37 = vmov 1966171168  }
  0xde   : > { %800 = vmatpush1.bf16.msra.mxu0 %v5325_v8  ;;  %v1069_v20 = vrot.slane %v6415_v19, %v6401_v13  ;;  %v1062_v21 = vrot.slane %v6415_v19, %v6404_v14  ;;  %v1076_v25 = vrot.slane %v6415_v19, %v6407_v17  ;;  %v1090_v26 = vrot.slane %v6415_v19, %v6410_v18  ;;  %v5341_v32 = vld [vmem:[#allocation12 + $0x11c] ss:$20 sps:$4 sm:$0xff]   ;;  %v5343_v34 = vld [vmem:[#allocation12 + $0x118] ss:$20 sps:$4 sm:$0xff]   ;;  %s7025_s14 = sshll.u32 %s6140_s23, 2  ;;  %p8262_p6 = scmp.ne.s32.totalorder %s8011_s13, 0 }
  0xdf   : > { %801 = vmatprep.subr.bf16.mxu0 %v5326_v9  ;;  %v1083_v30 = vrot.slane %v6415_v19, %v6422_v23  ;;  %v1097_v33 = vrot.slane %v6415_v19, %v6429_v28  ;;  %v586_v35 = vld [vmem:[#allocation2] sm:$0xff]  ;;  %v922_v38 = vunpack.c.l.s4 %v6051_v37  ;;  %v969_v54 = vld [vmem:[#allocation7] sm:$0xff]  ;;  %v972_v62 = vld [vmem:[#allocation7 + $0x18] sm:$0xff]  ;;  %vm1197_vm1 = vcmask 1041409   ;;  %p1850_p3 = scmp.lt.s32.totalorder %s7025_s14, 6  ;;  %s2755_s15 = sadd.s32 1, %s7025_s14 }
  0xe0   : > { %1071 = vbcast.lane.b32.xlu1 %v1069_v20, 256  ;;  %1064 = vbcast.lane.b32.xlu0 %v1062_v21, 256  ;;  %v6435_v36 = vpack.c.bf16 %v586_v35, %v586_v35  ;;  %v971_v59 = vld [vmem:[#allocation7 + $0x10] sm:$0xff]  ;;  %v973_v2 = vld [vmem:[#allocation7 + $0x20] sm:$0xff]  ;;  %vm1199_vm2 = vcmask 1042434   ;;  %vm1201_vm3 = vcmask 1043459  }
  0xe1   : > { %v923_v39 = vunpack.c.0.s8 %v922_v38  ;;  %v975_v20 = vld [vmem:[#allocation7 + $0x30] sm:$0xff]  ;;  %vm1203_vm4 = vcmask 1044484   ;;  %vm1205_vm5 = vcmask 1045509   ;;  %vm1207_vm6 = vcmask 1046534   ;;  %s1851_s30 = scalar_select %p1850_p3, 1, 0 }
  0xe2   : > { %802 = vmatpush1.bf16.msra.mxu0 %v5328_v11  ;;  %vm1209_vm7 = vcmask 1047559   ;;  %vm1212_vm8 = vcmask 64512   ;;  %vm6053_vm9 = vmmov 0   ;;  %p2756_p12 = scmp.lt.s32.totalorder %s2755_s15, 6  ;;  %s3661_s22 = sadd.s32 2, %s7025_s14 }
  0xe3   : > { %803 = vmatprep.subr.bf16.mxu0 %v5329_v12  ;;  %v6439_v40 = vsub.s32 %v923_v39, %v6398_v10  ;;  %v974_v12 = vld [vmem:[#allocation7 + $0x28] sm:$0xff]  ;;  %s1852_s9 = scvt.s32.f32 %s1851_s30  ;;  %p3662_p1 = scmp.lt.s32.totalorder %s3661_s22, 6 }
  0xe4   : > { %1078 = vbcast.lane.b32.xlu1 %v1076_v25, 256  ;;  %1092 = vbcast.lane.b32.xlu0 %v1090_v26, 256  ;;  %v976_v25 = vld [vmem:[#allocation7 + $0x38] sm:$0xff]  ;;  %v4896_v26 = vld [vmem:[%s7859_s8] ss:$0 sm:$0xff]  ;;  %s4567_s24 = sadd.s32 3, %s7025_s14 }
  0xe5   : > { %8025 = vst [vmem:[#allocation27_spill] sm:$0xff] %v6439_v40  ;;  %s2757_s11 = scalar_select %p2756_p12, 1, 0 }
  0xe6   : > { %804 = vmatpush1.bf16.msra.mxu0 %v5331_v15  ;;  %s3663_s15 = scalar_select %p3662_p1, 1, 0 }
  0xe7   : > { %805 = vmatprep.subr.bf16.mxu0 %v5332_v16  ;;  %s2758_s25 = scvt.s32.f32 %s2757_s11  ;;  %p4568_p13 = scmp.lt.s32.totalorder %s4567_s24, 6 }
  0xe8   : > { %1085 = vbcast.lane.b32.xlu1 %v1083_v30, 256  ;;  %s3664_s30 = scvt.s32.f32 %s3663_s15  ;;  %s4670_s14 = sand.u32 1, %s6140_s23  }
  0xe9   : > { %s4569_s22 = scalar_select %p4568_p13, 1, 0 }
  0xea   : > { %806 = vmatpush1.bf16.msra.mxu0 %v5334_v22  ;;  %s4700_s24 = sshll.u32 %s6386_s16, 4  ;;  %s6054_s0 = smov [#allocation16]   ;;  %s7733_s24 = int_to_ptr.vmem [resolvable:$true] %s4700_s24 }
  0xeb   : > { %807 = vmatprep.subr.bf16.mxu0 %v5335_v24  ;;  %s4570_s15 = scvt.s32.f32 %s4569_s22  ;;  %s7735_s22 = scalar_lea.sflag [#allocation17], %s4670_s14 }
  0xec   : > { %1099 = vbcast.lane.b32.xlu1 %v1097_v33, 256  ;;  %s5897_s1 = sshll.u32 %s6054_s0, 4  ;;  %s5898_s1 = int_to_ptr.vmem [resolvable:$false] %s5897_s1 }
  0xed   : > { %s5899_s2 = scalar_lea.vmem %s5898_s1, 512  ;;  %p5900_p5 = scmp.lt.s32.totalorder %s7733_s24, %s5898_s1 }
  0xee   : > { %808 = vmatpush1.bf16.msra.mxu0 %v5337_v27 }
  0xef   : > { %809 = vmatprep.subr.bf16.mxu0 %v5338_v29 }
  0xf2   : > { %810 = vmatpush1.bf16.msra.mxu0 %v5340_v31 }
  0xf3   : > { %811 = vmatprep.subr.bf16.mxu0 %v5341_v32 }
  0xf6   : > { %812 = vmatpush1.bf16.msra.mxu0 %v5343_v34 }
  0xf9   : > { %830 = vmatmul.mubr.bf16.vlgmr.msra.gmra.mrb[0].mxu0 %v6435_v36 }
 0x1cc   : > { %v831_v41 = vpop.f32.mrb[0].mxu0 }
 0x1cd   : > { %v920_v42 = vcombine.high %v831_v41, %v831_v41  ;;  %v927_v43 = vrot.slane %v831_v41, %v6439_v40  ;;  %v6442_v44 = vpop.f32.mrb[1].mxu0 }
 0x1ce   : > { %v835_v45 = vpop.f32.mrb[2].mxu0 }
 0x1cf   : > { %v934_v46 = vrot.slane %v920_v42, %v6439_v40  ;;  %v935_v47 = vcombine.high %v927_v43, %v927_v43  ;;  %v943_v48 = vrot.slane %v927_v43, %v6439_v40  ;;  %v836_v49 = vpop.f32.mrb[3].mxu0 }
 0x1d0   : > { %v6464_v49 = vsub.s32 6, %v6398_v10 }
 0x1d1   : > { %v936_v50 = vcombine.high %v934_v46, %v934_v46  ;;  %v950_v51 = vrot.slane %v934_v46, %v6439_v40  ;;  %v957_v52 = vrot.slane %v935_v47, %v6439_v40  ;;  %v965_v53 = vcombine.high %v943_v48, %v943_v48 }
 0x1d2   : > { %v980_v55 = vrot.slane %v943_v48, %v6404_v14  ;;  %v6461_v48 = vsub.s32 7, %v6398_v10  ;;  %8027 = vst [vmem:[#allocation29_spill] sm:$0xff] %v6464_v49 }
 0x1d3   : > { %v964_v56 = vrot.slane %v936_v50, %v6439_v40  ;;  %v967_v57 = vcombine.high %v957_v52, %v957_v52  ;;  %v984_v60 = vrot.slane %v957_v52, %v6404_v14  ;;  %v966_v61 = vcombine.high %v950_v51, %v950_v51  ;;  %v1072_v52 = vpop.permute.xlu1 %1071  ;;  %v6784_v40 = vld [vmem:[#allocation12 + $0x4] ss:$20 sps:$4 sm:$0xff]  }
 0x1d4   : > { %v988_v63 = vrot.slane %v965_v53, %v6404_v14  ;;  %v996_v0 = vrot.slane %v950_v51, %v6404_v14  ;;  %v1017_v1 = vadd.f32 %v980_v55, %v969_v54  ;;  %8026 = vst [vmem:[#allocation28_spill] sm:$0xff] %v6461_v48  ;;  %v1111_v50 = vrot.slane %v6415_v19, %v6461_v48  ;;  %v1065_v54 = vpop.permute.xlu0 %1064 }
 0x1d5   : > { %v992_v3 = vrot.slane %v967_v57, %v6404_v14  ;;  %v1018_v5 = vadd.f32 %v984_v60, %v970_v58  ;;  %v968_v8 = vcombine.high %v964_v56, %v964_v56  ;;  %v1000_v9 = vrot.slane %v964_v56, %v6404_v14  ;;  %8070 = vst [vmem:[#allocation72_spill] sm:$0xff] %v6784_v40 }
 0x1d6   : > { %v1019_v7 = vadd.f32 %v988_v63, %v971_v59  ;;  %5424 = vtanh.f32 %v1017_v1  ;;  %v1004_v15 = vrot.slane %v966_v61, %v6404_v14  ;;  %v1021_v16 = vadd.f32 %v996_v0, %v973_v2 }
 0x1d7   : > { %v1020_v11 = vadd.f32 %v992_v3, %v972_v62  ;;  %5426 = vtanh.f32 %v1018_v5  ;;  %v1008_v21 = vrot.slane %v968_v8, %v6404_v14  ;;  %v1022_v22 = vadd.f32 %v1000_v9, %v974_v12  ;;  %v1079_v53 = vpop.permute.xlu1 %1078 }
 0x1d8   : > { %5428 = vtanh.f32 %v1019_v7  ;;  %v1023_v24 = vadd.f32 %v1004_v15, %v975_v20  ;;  %v1104_v51 = vrot.slane %v6415_v19, %v6464_v49  ;;  %v1093_v56 = vpop.permute.xlu0 %1092 }
 0x1d9   : > { %5430 = vtanh.f32 %v1020_v11  ;;  %v1024_v27 = vadd.f32 %v1008_v21, %v976_v25 }
 0x1da   : > { %5432 = vtanh.f32 %v1021_v16  ;;  %v1164_v16 = vand.u32 127, %v924_v4 }
 0x1db   : > { %5434 = vtanh.f32 %v1022_v22  ;;  %v1086_v55 = vpop.permute.xlu1 %1085 }
 0x1dc   : > { %5436 = vtanh.f32 %v1023_v24  ;;  %v6490_v21 = vsub.s32 %v1164_v16, %v6398_v10 }
 0x1dd   : > { %5438 = vtanh.f32 %v1024_v27 }
 0x1de   : > { %8028 = vst [vmem:[#allocation30_spill] sm:$0xff] %v6490_v21 }
 0x1df   : > { %v1100_v57 = vpop.permute.xlu1 %1099 }
 0x1e0   : > { %v5425_v29 = vpop.eup %5424 }
 0x1e1   : > { %v1033_v30 = vmul.f32 %v5425_v29, %v4896_v26  ;;  %v5427_v31 = vpop.eup %5426 }
 0x1e2   : > { %v5429_v32 = vpop.eup %5428  ;;  %v1034_v35 = vmul.f32 %v5427_v31, %v4896_v26 }
 0x1e3   : > { %1041 = vadd.xlane.f32.xlu0 %v1033_v30  ;;  %v1035_v33 = vmul.f32 %v5429_v32, %v4896_v26  ;;  %v5431_v34 = vpop.eup %5430 }
 0x1e4   : > { %v5433_v37 = vpop.eup %5432  ;;  %v1036_v38 = vmul.f32 %v5431_v34, %v4896_v26 }
 0x1e5   : > { %1045 = vadd.xlane.f32.xlu1 %v1035_v33  ;;  %v5435_v39 = vpop.eup %5434  ;;  %v1037_v41 = vmul.f32 %v5433_v37, %v4896_v26 }
 0x1e6   : > { %v5437_v42 = vpop.eup %5436  ;;  %v1038_v43 = vmul.f32 %v5435_v39, %v4896_v26 }
 0x1e7   : > { %1043 = vadd.xlane.f32.xlu0 %v1034_v35  ;;  %v5439_v45 = vpop.eup %5438  ;;  %v1039_v46 = vmul.f32 %v5437_v42, %v4896_v26 }
 0x1e8   : > { %v1040_v47 = vmul.f32 %v5439_v45, %v4896_v26 }
 0x1e9   : > { %1047 = vadd.xlane.f32.xlu1 %v1036_v38 }
 0x1eb   : > { %1049 = vadd.xlane.f32.xlu0 %v1037_v41 }
 0x1ed   : > { %1051 = vadd.xlane.f32.xlu1 %v1038_v43 }
 0x1ef   : > { %1053 = vadd.xlane.f32.xlu0 %v1039_v46 }
 0x1f1   : > { %1055 = vadd.xlane.f32.xlu1 %v1040_v47 }
 0x202   : > { %1113 = vbcast.lane.b32.xlu1 %v1111_v50, 256 }
 0x205   : > { %1106 = vbcast.lane.b32.xlu0 %v1104_v51, 256 }
 0x270   : > { %v1042_v58 = vpop.xlane.xlu0 %1041 }
 0x271   : > { %v6470_v59 = vadd.f32 %v1065_v54, %v1042_v58 }
 0x272   : > { %v1046_v60 = vpop.xlane.xlu1 %1045 }
 0x273   : > { %1140 = vperm.xlu0 %5318, %v6470_v59   ;;  %v1125_v1 = vadd.f32 %v1079_v53, %v1046_v60 }
 0x274   : > { %v1044_v61 = vpop.xlane.xlu0 %1043 }
 0x275   : > { %v1124_v62 = vadd.f32 %v1072_v52, %v1044_v61 }
 0x276   : > { %v1048_v63 = vpop.xlane.xlu1 %1047 }
 0x277   : > { %1143 = vperm.xlu1 %5319, %v1124_v62   ;;  %v6473_v0 = vadd.f32 %v1086_v55, %v1048_v63 }
 0x278   : > { %v1050_v19 = vpop.xlane.xlu0 %1049 }
 0x279   : > { %1149 = vperm.xlu0 %5318, %v6473_v0   ;;  %v6478_v7 = vadd.f32 %v1093_v56, %v1050_v19 }
 0x27a   : > { %v1052_v2 = vpop.xlane.xlu1 %1051 }
 0x27b   : > { %1146 = vperm.xlu1 %5319, %v1125_v1   ;;  %v6476_v3 = vadd.f32 %v1100_v57, %v1052_v2 }
 0x27c   : > { %v1054_v5 = vpop.xlane.xlu0 %1053 }
 0x27d   : > { %1155 = vperm.xlu0 %5318, %v6476_v3  }
 0x27e   : > { %v1056_v8 = vpop.xlane.xlu1 %1055 }
 0x27f   : > { %1152 = vperm.xlu1 %5319, %v6478_v7  }
 0x280   : > { %v1107_v9 = vpop.permute.xlu0 %1106 }
 0x281   : > { %v6482_v11 = vadd.f32 %v1107_v9, %v1054_v5 }
 0x282   : > { %v1114_v12 = vpop.permute.xlu1 %1113 }
 0x283   : > { %1158 = vperm.xlu1 %5319, %v6482_v11   ;;  %v6485_v15 = vadd.f32 %v1114_v12, %v1056_v8 }
 0x285   : > { %1161 = vperm.xlu0 %5318, %v6485_v15  }
 0x2f2   : > { %v1141_v20 = vpop.permute.xlu0 %1140 }
 0x2f3   : > { %v1168_v26 = vrot.slane %v1141_v20, %v6490_v21 }
 0x2f6   : > { %v1144_v22 = vpop.permute.xlu1 %1143 }
 0x2f7   : > { %v1172_v24 = vrot.slane %v1144_v22, %v6490_v21 }
 0x2f8   : > { %v1150_v25 = vpop.permute.xlu0 %1149 }
 0x2f9   : > { %v1198_v30 = vsel %vm1197_vm1, %v1172_v24, %v1168_v26  ;;  %v1180_v4 = vrot.slane %v1150_v25, %v6490_v21 }
 0x2fa   : > { %v1147_v27 = vpop.permute.xlu1 %1146 }
 0x2fb   : > { %v1176_v29 = vrot.slane %v1147_v27, %v6490_v21 }
 0x2fc   : > { %v1156_v32 = vpop.permute.xlu0 %1155 }
 0x2fd   : > { %v1200_v31 = vsel %vm1199_vm2, %v1176_v29, %v1198_v30  ;;  %v1188_v37 = vrot.slane %v1156_v32, %v6490_v21 }
 0x2fe   : > { %v1153_v10 = vpop.permute.xlu1 %1152  ;;  %v1202_v34 = vsel %vm1201_vm3, %v1180_v4, %v1200_v31 }
 0x2ff   : > { %v1184_v33 = vrot.slane %v1153_v10, %v6490_v21 }
 0x301   : > { %v1204_v35 = vsel %vm1203_vm4, %v1184_v33, %v1202_v34 }
 0x302   : > { %v1159_v38 = vpop.permute.xlu1 %1158  ;;  %v1206_v41 = vsel %vm1205_vm5, %v1188_v37, %v1204_v35 }
 0x303   : > { %v1192_v39 = vrot.slane %v1159_v38, %v6490_v21 }
 0x304   : > { %v1162_v42 = vpop.permute.xlu0 %1161 }
 0x305   : > { %v1208_v43 = vsel %vm1207_vm6, %v1192_v39, %v1206_v41  ;;  %v1196_v45 = vrot.slane %v1162_v42, %v6490_v21 }
 0x307   : > { %v1210_v46 = vsel %vm1209_vm7, %v1196_v45, %v1208_v43 }
 0x308   : > { %v1213_v47 = vsel %vm1212_vm8, %v1210_v46, -inf }
 0x309   : > { %1214 = vmax.xlane.f32.xlu1 %v1213_v47 }
 0x396   : > { %v1215_v50 = vpop.xlane.xlu1 %1214 }
 0x397   : > { %v1220_v51 = vrot.slane %v1215_v50, %v6404_v14  ;;  %v1224_v52 = vrot.slane %v1215_v50, %v6401_v13  ;;  %v1228_v53 = vrot.slane %v1215_v50, %v6407_v17  ;;  %v1232_v57 = vrot.slane %v1215_v50, %v6422_v23 }
 0x398   : > { %v1236_v61 = vrot.slane %v1215_v50, %v6410_v18  ;;  %v1240_v2 = vrot.slane %v1215_v50, %v6429_v28 }
 0x399   : > { %v1257_v54 = vsub.f32 %v6470_v59, %v1220_v51  ;;  %v1258_v55 = vsub.f32 %v1124_v62, %v1224_v52  ;;  %v1259_v60 = vsub.f32 %v1125_v1, %v1228_v53  ;;  %v1260_v19 = vsub.f32 %v6473_v0, %v1232_v57  ;;  %v6564_v57 = vld [vmem:[#allocation12 + $0x8] ss:$20 sps:$4 sm:$0xff]  }
 0x39a   : > { %v1261_v8 = vsub.f32 %v6478_v7, %v1236_v61  ;;  %v1244_v62 = vrot.slane %v1215_v50, %v6464_v49  ;;  %v1262_v9 = vsub.f32 %v6476_v3, %v1240_v2  ;;  %v1248_v0 = vrot.slane %v1215_v50, %v6461_v48  ;;  %v6569_v61 = vld [vmem:[#allocation12 + $0x34] ss:$20 sps:$4 sm:$0xff]   ;;  %v6580_v2 = vld [vmem:[#allocation12 + $0x5c] ss:$20 sps:$4 sm:$0xff]  }
 0x39b   : > { %v1265_v56 = vmul.f32 1.442695, %v1257_v54  ;;  %v1267_v58 = vmul.f32 1.442695, %v1258_v55  ;;  %v1269_v63 = vmul.f32 1.442695, %v1259_v60 }
 0x39c   : > { %v1271_v5 = vmul.f32 1.442695, %v1260_v19  ;;  %v1273_v1 = vmul.f32 1.442695, %v1261_v8  ;;  %v1275_v16 = vmul.f32 1.442695, %v1262_v9  ;;  %v1263_v7 = vsub.f32 %v6482_v11, %v1244_v62 }
 0x39d   : > { %5440 = vpow2.f32 %v1265_v56  ;;  %v1264_v24 = vsub.f32 %v6485_v15, %v1248_v0  ;;  %v6562_v56 = vld [vmem:[#allocation12 + $0xc] ss:$20 sps:$4 sm:$0xff]   ;;  %v6567_v60 = vld [vmem:[#allocation12 + $0x10] ss:$20 sps:$4 sm:$0xff]   ;;  %v6596_v9 = vld [vmem:[#allocation12 + $0x88] ss:$20 sps:$4 sm:$0xff]  }
 0x39e   : > { %5442 = vpow2.f32 %v1267_v58  ;;  %v1277_v22 = vmul.f32 1.442695, %v1263_v7  ;;  %8029 = vst [vmem:[#allocation31_spill] sm:$0xff] %v6562_v56  ;;  %v7871_v58 = vmov 0.0   ;;  %838 = vmatprep.subr.bf16.mxu1 %v6562_v56  ;;  %v6576_v19 = vld [vmem:[#allocation12 + $0x38] ss:$20 sps:$4 sm:$0xff]  }
 0x39f   : > { %5444 = vpow2.f32 %v1269_v63  ;;  %v1279_v3 = vmul.f32 1.442695, %v1264_v24  ;;  %5114 = vmatprep.subr.bf16.mxu0 %v7871_v58  ;;  %839 = vmatpush1.bf16.msra.mxu1 %v6564_v57  ;;  %v6574_v63 = vld [vmem:[#allocation12 + $0x30] ss:$20 sps:$4 sm:$0xff]   ;;  %v6586_v8 = vld [vmem:[#allocation12 + $0x60] ss:$20 sps:$4 sm:$0xff]  }
 0x3a0   : > { %5446 = vpow2.f32 %v1271_v5  ;;  %5115 = vmatpush3.bf16.msra.mxu0 %v6567_v60  ;;  %840 = vmatprep.subr.bf16.mxu1 %v6569_v61  ;;  %v6584_v5 = vld [vmem:[#allocation12 + $0x58] ss:$20 sps:$4 sm:$0xff]   ;;  %8030 = vst [vmem:[#allocation32_spill] sm:$0xff] %v6596_v9  ;;  %v6606_v7 = vld [vmem:[#allocation12 + $0xb0] ss:$20 sps:$4 sm:$0xff]  }
 0x3a1   : > { %5448 = vpow2.f32 %v1273_v1  ;;  %5116 = vmatprep.subr.bf16.mxu0 %v7871_v58  ;;  %v6590_v62 = vld [vmem:[#allocation12 + $0x84] ss:$20 sps:$4 sm:$0xff]   ;;  %v6594_v1 = vld [vmem:[#allocation12 + $0x80] ss:$20 sps:$4 sm:$0xff]   ;;  %8031 = vst [vmem:[#allocation33_spill] sm:$0xff] %v6606_v7  ;;  %5130 = vmatprep.mubr.msk.bf16.mxu0 %vm6053_vm9, %v7871_v58 }
 0x3a2   : > { %5450 = vpow2.f32 %v1275_v16  ;;  %v6600_v0 = vld [vmem:[#allocation12 + $0xac] ss:$20 sps:$4 sm:$0xff]   ;;  %v6604_v16 = vld [vmem:[#allocation12 + $0xa8] ss:$20 sps:$4 sm:$0xff]  }
 0x3a3   : > { %5452 = vpow2.f32 %v1277_v22  ;;  %841 = vmatpush1.bf16.msra.mxu1 %v6574_v63  ;;  %v6610_v22 = vld [vmem:[#allocation12 + $0xd4] ss:$20 sps:$4 sm:$0xff]  }
 0x3a4   : > { %5454 = vpow2.f32 %v1279_v3  ;;  %5117 = vmatpush3.bf16.msra.mxu0 %v6576_v19  ;;  %842 = vmatprep.subr.bf16.mxu1 %v6580_v2 }
 0x3a5   : > { %5118 = vmatprep.subr.bf16.mxu0 %v7871_v58 }
 0x3a7   : > { %v6517_v59 = vpop.eup %5440  ;;  %843 = vmatpush1.bf16.msra.mxu1 %v6584_v5 }
 0x3a8   : > { %1290 = vperm.xlu0 %5318, %v6517_v59   ;;  %v6522_v12 = vpop.eup %5442  ;;  %5119 = vmatpush3.bf16.msra.mxu0 %v6586_v8 }
 0x3a9   : > { %v6527_v20 = vpop.eup %5444  ;;  %844 = vmatprep.subr.bf16.mxu1 %v6590_v62  ;;  %5120 = vmatprep.subr.bf16.mxu0 %v7871_v58 }
 0x3aa   : > { %v6531_v25 = vpop.eup %5446 }
 0x3ab   : > { %v6534_v26 = vpop.eup %5448  ;;  %845 = vmatpush1.bf16.msra.mxu1 %v6594_v1 }
 0x3ac   : > { %1293 = vperm.xlu0 %5318, %v6522_v12   ;;  %v6537_v11 = vpop.eup %5450  ;;  %5121 = vmatpush3.bf16.msra.mxu0 %v6596_v9 }
 0x3ad   : > { %v6540_v27 = vpop.eup %5452  ;;  %846 = vmatprep.subr.bf16.mxu1 %v6600_v0  ;;  %5122 = vmatprep.subr.bf16.mxu0 %v7871_v58 }
 0x3ae   : > { %v6543_v15 = vpop.eup %5454 }
 0x3af   : > { %847 = vmatpush1.bf16.msra.mxu1 %v6604_v16 }
 0x3b0   : > { %1296 = vperm.xlu0 %5318, %v6527_v20   ;;  %5123 = vmatpush3.bf16.msra.mxu0 %v6606_v7 }
 0x3b1   : > { %848 = vmatprep.subr.bf16.mxu1 %v6610_v22  ;;  %5124 = vmatprep.subr.bf16.mxu0 %v7871_v58 }
 0x3b4   : > { %1299 = vperm.xlu0 %5318, %v6531_v25  }
 0x3b8   : > { %1302 = vperm.xlu0 %5318, %v6534_v26  }
 0x3bc   : > { %1305 = vperm.xlu0 %5318, %v6537_v11  }
 0x3c0   : > { %1308 = vperm.xlu0 %5318, %v6540_v27  }
 0x3c4   : > { %1311 = vperm.xlu0 %5318, %v6543_v15  }
 0x427   : > { %v1291_v29 = vpop.permute.xlu0 %1290 }
 0x428   : > { %v1316_v35 = vrot.slane %v1291_v29, %v6490_v21 }
 0x42b   : > { %v1294_v30 = vpop.permute.xlu0 %1293 }
 0x42c   : > { %v1320_v33 = vrot.slane %v1294_v30, %v6490_v21 }
 0x42e   : > { %v1345_v41 = vsel %vm1197_vm1, %v1320_v33, %v1316_v35  ;;  %v6639_v35 = vld [vmem:[#allocation12 + $0xd8] ss:$20 sps:$4 sm:$0xff]  }
 0x42f   : > { %v1297_v31 = vpop.permute.xlu0 %1296  ;;  %8036 = vst [vmem:[#allocation38_spill] sm:$0xff] %v6639_v35  ;;  %5125 = vmatpush3.bf16.msra.mxu0 %v6639_v35  ;;  %v1411_v35 = vld [vmem:[#allocation9 + $0x28] sm:$0xff] }
 0x430   : > { %v1324_v34 = vrot.slane %v1297_v31, %v6490_v21  ;;  %5126 = vmatprep.subr.bf16.mxu0 %v7871_v58 }
 0x432   : > { %v1346_v43 = vsel %vm1199_vm2, %v1324_v34, %v1345_v41  ;;  %v6632_v34 = vld [vmem:[#allocation12 + $0xd0] ss:$20 sps:$4 sm:$0xff]  }
 0x433   : > { %v1300_v4 = vpop.permute.xlu0 %1299  ;;  %849 = vmatpush1.bf16.msra.mxu1 %v6632_v34  ;;  %v6657_v41 = vld [vmem:[#allocation12 + $0x124] ss:$20 sps:$4 sm:$0xff]  }
 0x434   : > { %v1328_v37 = vrot.slane %v1300_v4, %v6490_v21 }
 0x436   : > { %v1347_v46 = vsel %vm1201_vm3, %v1328_v37, %v1346_v43  ;;  %v6642_v37 = vld [vmem:[#allocation12 + $0xfc] ss:$20 sps:$4 sm:$0xff]  }
 0x437   : > { %v1303_v10 = vpop.permute.xlu0 %1302  ;;  %850 = vmatprep.subr.bf16.mxu1 %v6642_v37 }
 0x438   : > { %v1332_v38 = vrot.slane %v1303_v10, %v6490_v21 }
 0x43a   : > { %v1348_v47 = vsel %vm1203_vm4, %v1332_v38, %v1347_v46 }
 0x43b   : > { %v1306_v32 = vpop.permute.xlu0 %1305 }
 0x43c   : > { %v1336_v42 = vrot.slane %v1306_v32, %v6490_v21 }
 0x43e   : > { %v1349_v52 = vsel %vm1205_vm5, %v1336_v42, %v1348_v47  ;;  %v6660_v42 = vld [vmem:[#allocation12 + $0x120] ss:$20 sps:$4 sm:$0xff]  }
 0x43f   : > { %v1309_v39 = vpop.permute.xlu0 %1308  ;;  %v6678_v47 = vld [vmem:[#allocation13 + $0x4] ss:$16 sps:$4 sm:$0xff]  }
 0x440   : > { %v1340_v45 = vrot.slane %v1309_v39, %v6490_v21  ;;  %v6654_v39 = vld [vmem:[#allocation12 + $0x100] ss:$20 sps:$4 sm:$0xff]  }
 0x441   : > { %8038 = vst [vmem:[#allocation40_spill] sm:$0xff] %v6654_v39  ;;  %5127 = vmatpush3.bf16.msra.mxu0 %v6654_v39 }
 0x442   : > { %v1350_v53 = vsel %vm1207_vm6, %v1340_v45, %v1349_v52  ;;  %5128 = vmatprep.subr.bf16.mxu0 %v7871_v58  ;;  %v6669_v45 = vld [vmem:[#allocation12 + $0x128] ss:$20 sps:$4 sm:$0xff]  }
 0x443   : > { %v1312_v50 = vpop.permute.xlu0 %1311  ;;  %8040 = vst [vmem:[#allocation42_spill] sm:$0xff] %v6669_v45  ;;  %v6684_v52 = vld [vmem:[#allocation13 + $0x8] ss:$16 sps:$4 sm:$0xff]  }
 0x444   : > { %v1344_v51 = vrot.slane %v1312_v50, %v6490_v21  ;;  %v6680_v50 = vld [vmem:[#allocation13 + $0xc] ss:$16 sps:$4 sm:$0xff]   ;;  %8043 = vst [vmem:[#allocation45_spill] sm:$0xff] %v6684_v52  ;;  %v6742_v58 = vld [vmem:[#allocation13 + $0x88] ss:$16 sps:$4 sm:$0xff]  }
 0x445   : > { %5129 = vmatpush3.bf16.msra.mxu0 %v6669_v45  ;;  %8042 = vst [vmem:[#allocation44_spill] sm:$0xff] %v6680_v50  ;;  %8057 = vst [vmem:[#allocation59_spill] sm:$0xff] %v6742_v58  ;;  %v6772_v21 = vld [vmem:[#allocation13 + $0xec] ss:$16 sps:$4 sm:$0xff]  }
 0x446   : > { %v1351_v54 = vsel %vm1209_vm7, %v1344_v51, %v1350_v53  ;;  %v6682_v51 = vld [vmem:[#allocation13] ss:$16 sps:$4 sm:$0xff]   ;;  %1752 = vmatprep.subr.bf16.mxu0 %v6680_v50  ;;  %v6697_v53 = vld [vmem:[#allocation13 + $0x24] ss:$16 sps:$4 sm:$0xff]   ;;  %8067 = vst [vmem:[#allocation69_spill] sm:$0xff] %v6772_v21 }
 0x447   : > { %v1353_v55 = vsel %vm1212_vm8, %v1351_v54, 0.0  ;;  %v6699_v54 = vld [vmem:[#allocation13 + $0x2c] ss:$16 sps:$4 sm:$0xff]  }
 0x448   : > { %1354 = vadd.xlane.f32.xlu0 %v1353_v55  ;;  %5131 = vmatmul.mubr.bf16.vlgmr.msra.gmra.mrb[4].mxu0 %v6435_v36  ;;  %8045 = vst [vmem:[#allocation47_spill] sm:$0xff] %v6699_v54  ;;  %v6702_v55 = vld [vmem:[#allocation13 + $0x20] ss:$16 sps:$4 sm:$0xff]  }
 0x449   : > { %1753 = vmatpush1.bf16.msra.mxu0 %v6684_v52  ;;  %1784 = vmatprep.mubr.bf16.mxu0 %v7873_v6 }
 0x44a   : > { %1754 = vmatprep.subr.bf16.mxu0 %v6699_v54 }
 0x4d5   : > { %v1355_v24 = vpop.xlane.xlu0 %1354 }
 0x4d6   : > { %5456 = vrcp.f32 %v1355_v24  ;;  %v6704_v24 = vld [vmem:[#allocation13 + $0x28] ss:$16 sps:$4 sm:$0xff]  }
 0x4d7   : > { %8046 = vst [vmem:[#allocation48_spill] sm:$0xff] %v6704_v24  ;;  %1755 = vmatpush1.bf16.msra.mxu0 %v6704_v24 }
 0x4e0   : > { %v5457_v3 = vpop.eup %5456 }
 0x4e1   : > { %v1377_v29 = vrot.slane %v5457_v3, %v6410_v18  ;;  %v1361_v30 = vrot.slane %v5457_v3, %v6404_v14  ;;  %v1365_v10 = vrot.slane %v5457_v3, %v6401_v13  ;;  %v1369_v33 = vrot.slane %v5457_v3, %v6407_v17 }
 0x4e2   : > { %v1385_v43 = vrot.slane %v5457_v3, %v6464_v49  ;;  %v6779_v49 = vld [vmem:[#allocation13 + $0xe8] ss:$16 sps:$4 sm:$0xff]  }
 0x4e3   : > { %v6619_v31 = vmul.f32 %v6534_v26, %v1377_v29  ;;  %v6622_v4 = vmul.f32 %v6517_v59, %v1361_v30  ;;  %v6628_v32 = vmul.f32 %v6522_v12, %v1365_v10  ;;  %v6635_v26 = vmul.f32 %v6527_v20, %v1369_v33  ;;  %v6645_v12 = vld [vmem:[#allocation12 + $0xf8] ss:$20 sps:$4 sm:$0xff]   ;;  %v6723_v30 = vld [vmem:[#allocation13 + $0x64] ss:$16 sps:$4 sm:$0xff]   ;;  %v6728_v33 = vld [vmem:[#allocation13 + $0x60] ss:$16 sps:$4 sm:$0xff]  }
 0x4e4   : > { %v1373_v59 = vrot.slane %v5457_v3, %v6422_v23  ;;  %v1381_v20 = vrot.slane %v5457_v3, %v6429_v28  ;;  %851 = vmatpush1.bf16.msra.mxu1 %v6645_v12  ;;  %v6674_v46 = vmul.f32 %v6540_v27, %v1385_v43  ;;  %v6718_v29 = vld [vmem:[#allocation13 + $0x48] ss:$16 sps:$4 sm:$0xff]   ;;  %8050 = vst [vmem:[#allocation52_spill] sm:$0xff] %v6723_v30  ;;  %v6725_v10 = vld [vmem:[#allocation13 + $0x6c] ss:$16 sps:$4 sm:$0xff]   ;;  %8052 = vst [vmem:[#allocation54_spill] sm:$0xff] %v6728_v33 }
 0x4e5   : > { %8032 = vst [vmem:[#allocation34_spill] sm:$0xff] %v6619_v31  ;;  %8033 = vst [vmem:[#allocation35_spill] sm:$0xff] %v6622_v4  ;;  %1436 = vperm.xlu0 %5318, %v6619_v31   ;;  %1416 = vperm.xlu1 %5319, %v6622_v4   ;;  %v6737_v43 = vld [vmem:[#allocation13 + $0x8c] ss:$16 sps:$4 sm:$0xff]   ;;  %v6767_v4 = vld [vmem:[#allocation13 + $0xc8] ss:$16 sps:$4 sm:$0xff]  }
 0x4e6   : > { %8034 = vst [vmem:[#allocation36_spill] sm:$0xff] %v6628_v32  ;;  %8035 = vst [vmem:[#allocation37_spill] sm:$0xff] %v6635_v26  ;;  %v6648_v38 = vmul.f32 %v6531_v25, %v1373_v59  ;;  %v6663_v25 = vmul.f32 %v6537_v11, %v1381_v20  ;;  %852 = vmatprep.subr.bf16.mxu1 %v6657_v41  ;;  %v1389_v11 = vrot.slane %v5457_v3, %v6461_v48  ;;  %v6716_v3 = vld [vmem:[#allocation13 + $0x40] ss:$16 sps:$4 sm:$0xff]   ;;  %v6730_v59 = vld [vmem:[#allocation13 + $0x68] ss:$16 sps:$4 sm:$0xff]  }
 0x4e7   : > { %8041 = vst [vmem:[#allocation43_spill] sm:$0xff] %v6674_v46  ;;  %8048 = vst [vmem:[#allocation50_spill] sm:$0xff] %v6716_v3  ;;  %v6735_v20 = vld [vmem:[#allocation13 + $0x84] ss:$16 sps:$4 sm:$0xff]   ;;  %v6775_v48 = vld [vmem:[#allocation13 + $0xe0] ss:$16 sps:$4 sm:$0xff]  }
 0x4e8   : > { %8037 = vst [vmem:[#allocation39_spill] sm:$0xff] %v6648_v38  ;;  %8039 = vst [vmem:[#allocation41_spill] sm:$0xff] %v6663_v25  ;;  %853 = vmatpush1.bf16.msra.mxu1 %v6660_v42  ;;  %v6693_v27 = vmul.f32 %v6543_v15, %v1389_v11  ;;  %v6713_v15 = vld [vmem:[#allocation13 + $0x4c] ss:$16 sps:$4 sm:$0xff]   ;;  %v6740_v11 = vld [vmem:[#allocation13 + $0x80] ss:$16 sps:$4 sm:$0xff]  }
 0x4e9   : > { %1421 = vperm.xlu1 %5319, %v6628_v32   ;;  %1711 = vmatprep.subr.bf16.mxu1 %v6678_v47  ;;  %8047 = vst [vmem:[#allocation49_spill] sm:$0xff] %v6713_v15  ;;  %8049 = vst [vmem:[#allocation51_spill] sm:$0xff] %v6718_v29  ;;  %v6763_v32 = vld [vmem:[#allocation13 + $0xc0] ss:$16 sps:$4 sm:$0xff]   ;;  %v6769_v31 = vld [vmem:[#allocation13 + $0xe4] ss:$16 sps:$4 sm:$0xff]  }
 0x4ea   : > { %8044 = vst [vmem:[#allocation46_spill] sm:$0xff] %v6693_v27  ;;  %1756 = vmatprep.subr.bf16.mxu0 %v6713_v15  ;;  %8051 = vst [vmem:[#allocation53_spill] sm:$0xff] %v6725_v10  ;;  %v1408_v15 = vld [vmem:[#allocation9 + $0x10] sm:$0xff] }
 0x4eb   : > { %871 = vmatmul.mubr.bf16.vlgmr.msra.gmra.mrb[0].mxu1 %v6435_v36  ;;  %v6711_v36 = vld [vmem:[#allocation13 + $0x44] ss:$16 sps:$4 sm:$0xff]   ;;  %1757 = vmatpush1.bf16.msra.mxu0 %v6718_v29  ;;  %8053 = vst [vmem:[#allocation55_spill] sm:$0xff] %v6730_v59  ;;  %8054 = vst [vmem:[#allocation56_spill] sm:$0xff] %v6735_v20 }
 0x4ec   : > { %1743 = vmatprep.mubr.bf16.mxu1 %v7873_v6  ;;  %1712 = vmatpush1.bf16.msra.mxu1 %v6682_v51  ;;  %8055 = vst [vmem:[#allocation57_spill] sm:$0xff] %v6737_v43  ;;  %8056 = vst [vmem:[#allocation58_spill] sm:$0xff] %v6740_v11  ;;  %v6747_v6 = vld [vmem:[#allocation13 + $0xa4] ss:$16 sps:$4 sm:$0xff]  }
 0x4ed   : > { %1426 = vperm.xlu1 %5319, %v6635_v26   ;;  %1713 = vmatprep.subr.bf16.mxu1 %v6697_v53  ;;  %8058 = vst [vmem:[#allocation60_spill] sm:$0xff] %v6747_v6  ;;  %v6760_v26 = vld [vmem:[#allocation13 + $0xcc] ss:$16 sps:$4 sm:$0xff]   ;;  %8064 = vst [vmem:[#allocation66_spill] sm:$0xff] %v6763_v32 }
 0x4ee   : > { %1758 = vmatprep.subr.bf16.mxu0 %v6725_v10  ;;  %8063 = vst [vmem:[#allocation65_spill] sm:$0xff] %v6760_v26  ;;  %8065 = vst [vmem:[#allocation67_spill] sm:$0xff] %v6767_v4 }
 0x4ef   : > { %1759 = vmatpush1.bf16.msra.mxu0 %v6730_v59  ;;  %8066 = vst [vmem:[#allocation68_spill] sm:$0xff] %v6769_v31  ;;  %8068 = vst [vmem:[#allocation70_spill] sm:$0xff] %v6775_v48 }
 0x4f0   : > { %1714 = vmatpush1.bf16.msra.mxu1 %v6702_v55  ;;  %1760 = vmatprep.subr.bf16.mxu0 %v6737_v43  ;;  %8069 = vst [vmem:[#allocation71_spill] sm:$0xff] %v6779_v49 }
 0x4f1   : > { %1431 = vperm.xlu1 %5319, %v6648_v38   ;;  %1715 = vmatprep.subr.bf16.mxu1 %v6711_v36  ;;  %v6758_v38 = vld [vmem:[#allocation13 + $0xc4] ss:$16 sps:$4 sm:$0xff]  }
 0x4f2   : > { %8062 = vst [vmem:[#allocation64_spill] sm:$0xff] %v6758_v38 }
 0x4f3   : > { %1761 = vmatpush1.bf16.msra.mxu0 %v6742_v58  ;;  %v1410_v58 = vld [vmem:[#allocation9 + $0x20] sm:$0xff] }
 0x4f4   : > { %1716 = vmatpush1.bf16.msra.mxu1 %v6716_v3 }
 0x4f5   : > { %1441 = vperm.xlu1 %5319, %v6663_v25   ;;  %1717 = vmatprep.subr.bf16.mxu1 %v6723_v30  ;;  %v6754_v25 = vld [vmem:[#allocation13 + $0xa8] ss:$16 sps:$4 sm:$0xff]  }
 0x4f6   : > { %8061 = vst [vmem:[#allocation63_spill] sm:$0xff] %v6754_v25 }
 0x4f8   : > { %1718 = vmatpush1.bf16.msra.mxu1 %v6728_v33 }
 0x4f9   : > { %1446 = vperm.xlu1 %5319, %v6674_v46   ;;  %1719 = vmatprep.subr.bf16.mxu1 %v6735_v20  ;;  %v6752_v46 = vld [vmem:[#allocation13 + $0xa0] ss:$16 sps:$4 sm:$0xff]  }
 0x4fa   : > { %8060 = vst [vmem:[#allocation62_spill] sm:$0xff] %v6752_v46 }
 0x4fc   : > { %1720 = vmatpush1.bf16.msra.mxu1 %v6740_v11 }
 0x4fd   : > { %1451 = vperm.xlu1 %5319, %v6693_v27   ;;  %v6749_v27 = vld [vmem:[#allocation13 + $0xac] ss:$16 sps:$4 sm:$0xff]   ;;  %1721 = vmatprep.subr.bf16.mxu1 %v6747_v6 }
 0x4fe   : > { %8059 = vst [vmem:[#allocation61_spill] sm:$0xff] %v6749_v27  ;;  %1762 = vmatprep.subr.bf16.mxu0 %v6749_v27 }
 0x4ff   : > { %1763 = vmatpush1.bf16.msra.mxu0 %v6754_v25 }
 0x500   : > { %1722 = vmatpush1.bf16.msra.mxu1 %v6752_v46  ;;  %1764 = vmatprep.subr.bf16.mxu0 %v6760_v26  ;;  %v1406_v26 = vld [vmem:[#allocation9] sm:$0xff] }
 0x501   : > { %1723 = vmatprep.subr.bf16.mxu1 %v6758_v38 }
 0x503   : > { %1765 = vmatpush1.bf16.msra.mxu0 %v6767_v4  ;;  %v1407_v4 = vld [vmem:[#allocation9 + $0x8] sm:$0xff] }
 0x504   : > { %1724 = vmatpush1.bf16.msra.mxu1 %v6763_v32  ;;  %1766 = vmatprep.subr.bf16.mxu0 %v6772_v21 }
 0x505   : > { %1725 = vmatprep.subr.bf16.mxu1 %v6769_v31 }
 0x507   : > { %1767 = vmatpush1.bf16.msra.mxu0 %v6779_v49 }
 0x508   : > { %1726 = vmatpush1.bf16.msra.mxu1 %v6775_v48  ;;  %1911 = vmatprep.subr.bf16.mxu0 %v6562_v56  ;;  %v1409_v56 = vld [vmem:[#allocation9 + $0x18] sm:$0xff] }
 0x509   : > { %1870 = vmatprep.subr.bf16.mxu1 %v6784_v40 }
 0x564   : > { %v1417_v25 = vpop.permute.xlu1 %1416  ;;  %v1437_v43 = vpop.permute.xlu0 %1436 }
 0x565   : > { %v1454_v27 = vmul.f32 %v1417_v25, %v1406_v26  ;;  %v1458_v21 = vmul.f32 %v1437_v43, %v1410_v58 }
 0x567   : > { %v1462_v59 = vrot.slane %v1454_v27, 4  ;;  %v1486_v50 = vrot.slane %v1458_v21, 4 }
 0x568   : > { %v1422_v10 = vpop.permute.xlu1 %1421 }
 0x569   : > { %v1455_v29 = vmul.f32 %v1422_v10, %v1407_v4  ;;  %v1463_v54 = vadd.f32 %v1462_v59, %v1454_v27  ;;  %v1487_v25 = vadd.f32 %v1486_v50, %v1458_v21 }
 0x56b   : > { %v1468_v24 = vrot.slane %v1455_v29, 4  ;;  %v1464_v31 = vrot.slane %v1463_v54, 2  ;;  %v1488_v27 = vrot.slane %v1487_v25, 2 }
 0x56c   : > { %v1427_v49 = vpop.permute.xlu1 %1426 }
 0x56d   : > { %v1469_v52 = vadd.f32 %v1468_v24, %v1455_v29  ;;  %v1456_v48 = vmul.f32 %v1427_v49, %v1408_v15  ;;  %v1465_v4 = vadd.f32 %v1464_v31, %v1463_v54  ;;  %v1412_v49 = vld [vmem:[#allocation9 + $0x30] sm:$0xff]  ;;  %v1489_v21 = vadd.f32 %v1488_v27, %v1487_v25 }
 0x56f   : > { %v1470_v40 = vrot.slane %v1469_v52, 2  ;;  %v1474_v45 = vrot.slane %v1456_v48, 4  ;;  %v1466_v29 = vrot.slane %v1465_v4, 1 }
 0x570   : > { %v1432_v32 = vpop.permute.xlu1 %1431 }
 0x571   : > { %v1475_v26 = vadd.f32 %v1474_v45, %v1456_v48  ;;  %v1457_v39 = vmul.f32 %v1432_v32, %v1409_v56  ;;  %v1471_v38 = vadd.f32 %v1470_v40, %v1469_v52  ;;  %v1413_v32 = vld [vmem:[#allocation9 + $0x38] sm:$0xff]  ;;  %v1467_v50 = vadd.f32 %v1466_v29, %v1465_v4 }
 0x573   : > { %v1476_v46 = vrot.slane %v1475_v26, 2  ;;  %v1480_v58 = vrot.slane %v1457_v39, 4  ;;  %v1472_v15 = vrot.slane %v1471_v38, 1 }
 0x574   : > { %v1442_v10 = vpop.permute.xlu1 %1441 }
 0x575   : > { %v1477_v43 = vadd.f32 %v1476_v46, %v1475_v26  ;;  %v1481_v59 = vadd.f32 %v1480_v58, %v1457_v39  ;;  %v1459_v24 = vmul.f32 %v1442_v10, %v1411_v35  ;;  %v1473_v45 = vadd.f32 %v1472_v15, %v1471_v38 }
 0x576   : > { %v1490_v58 = vrot.slane %v1489_v21, 1 }
 0x577   : > { %v1478_v6 = vrot.slane %v1477_v43, 1  ;;  %v1482_v11 = vrot.slane %v1481_v59, 2  ;;  %v1492_v7 = vrot.slane %v1459_v24, 4  ;;  %v1511_v9 = vpack.c.bf16 %v1473_v45, %v1473_v45 }
 0x578   : > { %v1447_v20 = vpop.permute.xlu1 %1446 }
 0x579   : > { %v1460_v48 = vmul.f32 %v1447_v20, %v1412_v49  ;;  %v1483_v56 = vadd.f32 %v1482_v11, %v1481_v59  ;;  %v1493_v40 = vadd.f32 %v1492_v7, %v1459_v24  ;;  %v1479_v52 = vadd.f32 %v1478_v6, %v1477_v43 }
 0x57a   : > { %v1510_v20 = vpack.c.bf16 %v1467_v50, %v1467_v50  ;;  %v1491_v59 = vadd.f32 %v1490_v58, %v1489_v21  ;;  %v1535_v6 = vunpack.c.l.b16 %v1511_v9 }
 0x57b   : > { %v1498_v31 = vrot.slane %v1460_v48, 4  ;;  %v1484_v46 = vrot.slane %v1483_v56, 1  ;;  %v1494_v54 = vrot.slane %v1493_v40, 2  ;;  %v1512_v25 = vpack.c.bf16 %v1479_v52, %v1479_v52 }
 0x57c   : > { %v1452_v39 = vpop.permute.xlu1 %1451  ;;  %v1534_v49 = vunpack.c.l.b16 %v1510_v20  ;;  %v5625_v20 = vld [vmem:[#allocation12] ss:$20 sps:$4 sm:$0xff]  }
 0x57d   : > { %v1499_v35 = vadd.f32 %v1498_v31, %v1460_v48  ;;  %v1461_v26 = vmul.f32 %v1452_v39, %v1413_v32  ;;  %v1485_v10 = vadd.f32 %v1484_v46, %v1483_v56  ;;  %v1495_v33 = vadd.f32 %v1494_v54, %v1493_v40 }
 0x57e   : > { %v1536_v15 = vunpack.c.l.b16 %v1512_v25  ;;  %v1514_v32 = vpack.c.bf16 %v1491_v59, %v1491_v59  ;;  %v1542_v45 = vsel %vm1197_vm1, %v1535_v6, %v1534_v49  ;;  %v5626_v25 = vld [vmem:[#allocation12 + $0x2c] ss:$20 sps:$4 sm:$0xff]   ;;  %v5632_v59 = vld [vmem:[#allocation12 + $0xa4] ss:$20 sps:$4 sm:$0xff]  }
 0x57f   : > { %v1500_v30 = vrot.slane %v1499_v35, 2  ;;  %v1504_v3 = vrot.slane %v1461_v26, 4  ;;  %v1496_v11 = vrot.slane %v1495_v33, 1  ;;  %v1513_v7 = vpack.c.bf16 %v1485_v10, %v1485_v10 }
 0x580   : > { %v1538_v21 = vunpack.c.l.b16 %v1514_v32  ;;  %v1520_v32 = vld [vmem:[%s6365_s29 + $0x10] sm:$0xff] }
 0x581   : > { %v1501_v27 = vadd.f32 %v1500_v30, %v1499_v35  ;;  %v1505_v38 = vadd.f32 %v1504_v3, %v1461_v26  ;;  %v1497_v4 = vadd.f32 %v1496_v11, %v1495_v33  ;;  %v1537_v29 = vunpack.c.l.b16 %v1513_v7  ;;  %v5627_v7 = vld [vmem:[#allocation12 + $0x28] ss:$20 sps:$4 sm:$0xff]  }
 0x582   : > { %v1543_v30 = vsel %vm1199_vm2, %v1536_v15, %v1542_v45  ;;  %v8071_v11 = vmov 0   ;;  %v1519_v45 = vld [vmem:[%s6365_s29 + $0x8] sm:$0xff] }
 0x583   : > { %v1502_v43 = vrot.slane %v1501_v27, 1  ;;  %v1506_v24 = vrot.slane %v1505_v38, 2  ;;  %v1515_v48 = vpack.c.bf16 %v1497_v4, %v1497_v4  ;;  %v1544_v3 = vsel %vm1201_vm3, %v1537_v29, %v1543_v30 }
 0x584   : > { %v1545_v54 = vsel %vm1203_vm4, %v1538_v21, %v1544_v3 }
 0x585   : > { %v1503_v56 = vadd.f32 %v1502_v43, %v1501_v27  ;;  %v1507_v40 = vadd.f32 %v1506_v24, %v1505_v38  ;;  %v1539_v33 = vunpack.c.l.b16 %v1515_v48  ;;  %v5628_v27 = vld [vmem:[#allocation12 + $0x54] ss:$20 sps:$4 sm:$0xff]   ;;  %v5629_v38 = vld [vmem:[#allocation12 + $0x50] ss:$20 sps:$4 sm:$0xff]   ;;  %v913_v43 = vpop.f32.mrb[4].mxu0 }
 0x586   : > { %v5132_v24 = vpop.f32.mrb[5].mxu0 }
 0x587   : > { %v1516_v31 = vpack.c.bf16 %v1503_v56, %v1503_v56  ;;  %v1508_v50 = vrot.slane %v1507_v40, 1  ;;  %v1546_v35 = vsel %vm1205_vm5, %v1539_v33, %v1545_v54 }
 0x589   : > { %v1509_v9 = vadd.f32 %v1508_v50, %v1507_v40  ;;  %v1540_v52 = vunpack.c.l.b16 %v1516_v31  ;;  %v1518_v40 = vld [vmem:[%s6365_s29] sm:$0xff]  ;;  %v1521_v31 = vld [vmem:[%s6365_s29 + $0x18] sm:$0xff] }
 0x58a   : > { %v1522_v50 = vadd.f32 %v1518_v40, %v6442_v44  ;;  %v1525_v33 = vadd.f32 %v1521_v31, %v913_v43  ;;  %v8082_v40 = vld [vmem:[#allocation62_spill] sm:$0xff] }
 0x58b   : > { %v1517_v46 = vpack.c.bf16 %v1509_v9, %v1509_v9  ;;  %v1547_v26 = vsel %vm1207_vm6, %v1540_v52, %v1546_v35  ;;  %v8085_v31 = vld [vmem:[#allocation66_spill] sm:$0xff] }
 0x58d   : > { %v1541_v39 = vunpack.c.l.b16 %v1517_v46 }
 0x58f   : > { %v1548_v58 = vsel %vm1209_vm7, %v1541_v39, %v1547_v26 }
 0x590   : > { %v1549_v10 = vpack.c.b16 %v1548_v58, %v1548_v58 }
 0x592   : > { %1744 = vmatmul.mubr.bf16.vlgmr.msra.gmra.mrb[4].mxu1 %v1549_v10  ;;  %1848 = vst [vmem:[%s6386_s16] sm:$0xf] %v1549_v10  ;;  %1785 = vmatmul.mubr.bf16.vlgmr.msra.gmra.mrb[8].mxu0 %v1549_v10 }
 0x593   : > { %1871 = vmatpush1.bf16.msra.mxu1 %v5625_v20  ;;  %1912 = vmatpush1.bf16.msra.mxu0 %v6564_v57  ;;  %v5630_v57 = vld [vmem:[#allocation12 + $0x7c] ss:$20 sps:$4 sm:$0xff]  }
 0x594   : > { %1872 = vmatprep.subr.bf16.mxu1 %v5626_v25  ;;  %1913 = vmatprep.subr.bf16.mxu0 %v6569_v61  ;;  %v5631_v61 = vld [vmem:[#allocation12 + $0x78] ss:$20 sps:$4 sm:$0xff]  }
 0x595   : > { %1902 = vmatprep.mubr.bf16.mxu1 %v8071_v11  ;;  %1943 = vmatprep.mubr.bf16.mxu0 %v8071_v11 }
 0x597   : > { %1873 = vmatpush1.bf16.msra.mxu1 %v5627_v7  ;;  %1914 = vmatpush1.bf16.msra.mxu0 %v6574_v63  ;;  %v5633_v63 = vld [vmem:[#allocation12 + $0xa0] ss:$20 sps:$4 sm:$0xff]  }
 0x598   : > { %1874 = vmatprep.subr.bf16.mxu1 %v5628_v27  ;;  %1915 = vmatprep.subr.bf16.mxu0 %v6580_v2  ;;  %v5634_v2 = vld [vmem:[#allocation12 + $0xcc] ss:$20 sps:$4 sm:$0xff]  }
 0x59b   : > { %1875 = vmatpush1.bf16.msra.mxu1 %v5629_v38  ;;  %1916 = vmatpush1.bf16.msra.mxu0 %v6584_v5  ;;  %v5635_v5 = vld [vmem:[#allocation12 + $0xc8] ss:$20 sps:$4 sm:$0xff]  }
 0x59c   : > { %1876 = vmatprep.subr.bf16.mxu1 %v5630_v57  ;;  %1917 = vmatprep.subr.bf16.mxu0 %v6590_v62  ;;  %v5636_v62 = vld [vmem:[#allocation12 + $0xf4] ss:$20 sps:$4 sm:$0xff]  }
 0x59f   : > { %1877 = vmatpush1.bf16.msra.mxu1 %v5631_v61  ;;  %1918 = vmatpush1.bf16.msra.mxu0 %v6594_v1  ;;  %v5637_v1 = vld [vmem:[#allocation12 + $0xf0] ss:$20 sps:$4 sm:$0xff]  }
 0x5a0   : > { %1878 = vmatprep.subr.bf16.mxu1 %v5632_v59  ;;  %1919 = vmatprep.subr.bf16.mxu0 %v6600_v0  ;;  %v5638_v0 = vld [vmem:[#allocation12 + $0x11c] ss:$20 sps:$4 sm:$0xff]  }
 0x5a3   : > { %1879 = vmatpush1.bf16.msra.mxu1 %v5633_v63  ;;  %1920 = vmatpush1.bf16.msra.mxu0 %v6604_v16  ;;  %v5639_v16 = vld [vmem:[#allocation12 + $0x118] ss:$20 sps:$4 sm:$0xff]  }
 0x5a4   : > { %1880 = vmatprep.subr.bf16.mxu1 %v5634_v2  ;;  %1921 = vmatprep.subr.bf16.mxu0 %v6610_v22  ;;  %v8072_v22 = vmov 0.0  }
 0x5a7   : > { %1881 = vmatpush1.bf16.msra.mxu1 %v5635_v5  ;;  %1922 = vmatpush1.bf16.msra.mxu0 %v6632_v34  ;;  %v587_v5 = vld [vmem:[#allocation3] sm:$0xff] }
 0x5a8   : > { %1882 = vmatprep.subr.bf16.mxu1 %v5636_v62  ;;  %1923 = vmatprep.subr.bf16.mxu0 %v6642_v37 }
 0x5ab   : > { %1883 = vmatpush1.bf16.msra.mxu1 %v5637_v1  ;;  %1924 = vmatpush1.bf16.msra.mxu0 %v6645_v12  ;;  %v916_v12 = vpop.f32.mrb[6].mxu0 }
 0x5ac   : > { %1884 = vmatprep.subr.bf16.mxu1 %v5638_v0  ;;  %1925 = vmatprep.subr.bf16.mxu0 %v6657_v41  ;;  %v5133_v49 = vpop.f32.mrb[7].mxu0  ;;  %v6818_v41 = vld [vmem:[%s8024_s3] sm:$0xff]  ;;  %v8074_v12 = vld [vmem:[#allocation52_spill] sm:$0xff] }
 0x5ad   : > { %v6831_v15 = vrot.slane %v6818_v41, %v6407_v17  ;;  %v6836_v29 = vrot.slane %v6818_v41, %v6429_v28  ;;  %v6841_v48 = vrot.slane %v6818_v41, %v6422_v23  ;;  %v6847_v56 = vrot.slane %v6818_v41, %v6410_v18  ;;  %v8078_v49 = vld [vmem:[#allocation33_spill] sm:$0xff] }
 0x5af   : > { %1885 = vmatpush1.bf16.msra.mxu1 %v5639_v16  ;;  %1926 = vmatpush1.bf16.msra.mxu0 %v6660_v42  ;;  %v6822_v42 = vrot.slane %v6818_v41, %v6404_v14 }
 0x5b0   : > { %5134 = vmatprep.subr.bf16.mxu1 %v8072_v22  ;;  %2615 = vmatprep.subr.bf16.mxu0 %v6678_v47  ;;  %v6826_v47 = vrot.slane %v6818_v41, %v6401_v13 }
 0x5b1   : > { %2137 = vbcast.lane.b32.xlu1 %v6822_v42, 256 }
 0x5b2   : > { %2144 = vbcast.lane.b32.xlu0 %v6826_v47, 256 }
 0x5b5   : > { %2151 = vbcast.lane.b32.xlu1 %v6831_v15, 256 }
 0x5b6   : > { %2172 = vbcast.lane.b32.xlu0 %v6836_v29, 256 }
 0x5b9   : > { %2158 = vbcast.lane.b32.xlu1 %v6841_v48, 256 }
 0x5bd   : > { %2165 = vbcast.lane.b32.xlu1 %v6847_v56, 256 }
 0x5be   : > { %v872_v34 = vpop.f32.mrb[0].mxu1 }
 0x5bf   : > { %v874_v4 = vpop.f32.mrb[1].mxu1  ;;  %v1523_v3 = vadd.f32 %v1519_v45, %v872_v34  ;;  %v8084_v45 = vld [vmem:[#allocation40_spill] sm:$0xff] }
 0x5c0   : > { %v876_v6 = vpop.f32.mrb[2].mxu1  ;;  %v1524_v30 = vadd.f32 %v1520_v32, %v874_v4  ;;  %v8083_v32 = vld [vmem:[#allocation64_spill] sm:$0xff] }
 0x5c1   : > { %v877_v37 = vpop.f32.mrb[3].mxu1 }
 0x665   : > { %v1745_v9 = vpop.f32.mrb[4].mxu1  ;;  %v1786_v21 = vpop.f32.mrb[8].mxu0 }
 0x666   : > { %v1793_v52 = vadd.f32 %v1745_v9, %v1522_v50  ;;  %v1795_v46 = vadd.f32 %v1786_v21, %v1524_v30  ;;  %v1747_v54 = vpop.f32.mrb[5].mxu1  ;;  %v1788_v39 = vpop.f32.mrb[9].mxu0  ;;  %v8086_v50 = vld [vmem:[#allocation68_spill] sm:$0xff]  ;;  %v8087_v30 = vld [vmem:[#allocation42_spill] sm:$0xff]  ;;  %v8091_v21 = vld [vmem:[#allocation45_spill] sm:$0xff] }
 0x667   : > { %v1794_v35 = vadd.f32 %v1747_v54, %v1523_v3  ;;  %v1796_v26 = vadd.f32 %v1788_v39, %v1525_v33  ;;  %v1749_v58 = vpop.f32.mrb[6].mxu1  ;;  %v1790_v10 = vpop.f32.mrb[10].mxu0  ;;  %v8088_v3 = vld [vmem:[#allocation44_spill] sm:$0xff]  ;;  %v8089_v33 = vld [vmem:[#allocation70_spill] sm:$0xff]  ;;  %v8094_v54 = vld [vmem:[#allocation49_spill] sm:$0xff] }
 0x668   : > { %v4969_v20 = vmul.f32 -1.442695, %v1793_v52  ;;  %v1750_v25 = vpop.f32.mrb[7].mxu1  ;;  %v1791_v7 = vpop.f32.mrb[11].mxu0  ;;  %v8090_v9 = vld [vmem:[#allocation72_spill] sm:$0xff]  ;;  %v8092_v52 = vld [vmem:[#allocation47_spill] sm:$0xff] }
 0x669   : > { %v4970_v27 = vmul.f32 -1.442695, %v1794_v35  ;;  %v4971_v44 = vmul.f32 -1.442695, %v1796_v26  ;;  %v8095_v39 = vld [vmem:[#allocation51_spill] sm:$0xff]  ;;  %v8096_v35 = vld [vmem:[#allocation53_spill] sm:$0xff] }
 0x66a   : > { %5458 = vpow2.f32 %v4969_v20  ;;  %v8097_v26 = vld [vmem:[#allocation55_spill] sm:$0xff]  ;;  %v8098_v58 = vld [vmem:[#allocation57_spill] sm:$0xff] }
 0x66b   : > { %5460 = vpow2.f32 %v4970_v27  ;;  %v8099_v10 = vld [vmem:[#allocation59_spill] sm:$0xff]  ;;  %v8100_v20 = vld [vmem:[#allocation61_spill] sm:$0xff] }
 0x66c   : > { %5462 = vpow2.f32 %v4971_v44  ;;  %v8101_v25 = vld [vmem:[#allocation63_spill] sm:$0xff]  ;;  %v8102_v7 = vld [vmem:[#allocation65_spill] sm:$0xff] }
 0x66d   : > { %5464 = vtanh.f32 %v1795_v46  ;;  %v8093_v46 = vld [vmem:[#allocation48_spill] sm:$0xff]  ;;  %v8103_v27 = vld [vmem:[#allocation67_spill] sm:$0xff]  ;;  %v8104_v44 = vld [vmem:[#allocation69_spill] sm:$0xff] }
 0x674   : > { %v5459_v38 = vpop.eup %5458 }
 0x675   : > { %v5461_v57 = vpop.eup %5460  ;;  %v1800_v61 = vadd.f32 1.0, %v5459_v38  ;;  %v8105_v38 = vld [vmem:[#allocation71_spill] sm:$0xff] }
 0x676   : > { %v1806_v59 = vadd.f32 1.0, %v5461_v57  ;;  %v5463_v63 = vpop.eup %5462  ;;  %v8106_v57 = vld [vmem:[#allocation31_spill] sm:$0xff] }
 0x677   : > { %5466 = vrcp.f32 %v1800_v61  ;;  %v5465_v2 = vpop.eup %5464  ;;  %v1813_v16 = vadd.f32 1.0, %v5463_v63 }
 0x678   : > { %5468 = vrcp.f32 %v1806_v59 }
 0x679   : > { %5470 = vrcp.f32 %v1813_v16 }
 0x681   : > { %v5467_v62 = vpop.eup %5466 }
 0x682   : > { %v5469_v1 = vpop.eup %5468  ;;  %v1817_v0 = vmul.f32 %v5467_v62, %v5465_v2  ;;  %v8107_v2 = vld [vmem:[#allocation27_spill] sm:$0xff] }
 0x683   : > { %v1816_v34 = vmul.f32 %v5469_v1, %v587_v5  ;;  %v5471_v6 = vpop.eup %5470 }
 0x685   : > { %v6855_v4 = vadd.f32 %v1817_v0, %v1816_v34 }
 0x687   : > { %5472 = vtanh.f32 %v6855_v4 }
 0x691   : > { %v5473_v37 = vpop.eup %5472 }
 0x692   : > { %v1820_v43 = vmul.f32 %v5473_v37, %v5471_v6 }
 0x694   : > { %v1821_v24 = vpack.c.bf16 %v1820_v43, %v1820_v43 }
 0x696   : > { %1822 = vst [vmem:[%s6384_s27] sm:$0xf] %v1821_v24  ;;  %1903 = vmatmul.mubr.bf16.vlgmr.msra.gmra.mrb[8].mxu1 %v1821_v24  ;;  %1944 = vmatmul.mubr.bf16.vlgmr.msra.gmra.mrb[12].mxu0 %v1821_v24 }
 0x697   : > { %5135 = vmatpush3.bf16.msra.mxu1 %v6567_v60  ;;  %5150 = vmatprep.mubr.msk.bf16.mxu1 %vm6053_vm9, %v8072_v22  ;;  %v8073_v60 = vld [vmem:[#allocation50_spill] sm:$0xff] }
 0x698   : > { %5136 = vmatprep.subr.bf16.mxu1 %v8072_v22  ;;  %2616 = vmatpush1.bf16.msra.mxu0 %v6682_v51  ;;  %v8075_v51 = vld [vmem:[#allocation32_spill] sm:$0xff] }
 0x699   : > { %2617 = vmatprep.subr.bf16.mxu0 %v6697_v53  ;;  %2647 = vmatprep.mubr.bf16.mxu0 %v8071_v11  ;;  %v8076_v53 = vld [vmem:[#allocation54_spill] sm:$0xff] }
 0x69b   : > { %5137 = vmatpush3.bf16.msra.mxu1 %v6576_v19  ;;  %v8077_v19 = vld [vmem:[#allocation56_spill] sm:$0xff] }
 0x69c   : > { %5138 = vmatprep.subr.bf16.mxu1 %v8072_v22  ;;  %2618 = vmatpush1.bf16.msra.mxu0 %v6702_v55  ;;  %v8079_v55 = vld [vmem:[#allocation58_spill] sm:$0xff] }
 0x69d   : > { %2619 = vmatprep.subr.bf16.mxu0 %v6711_v36  ;;  %v8081_v36 = vld [vmem:[#allocation38_spill] sm:$0xff] }
 0x69f   : > { %5139 = vmatpush3.bf16.msra.mxu1 %v6586_v8  ;;  %v8080_v8 = vld [vmem:[#allocation60_spill] sm:$0xff] }
 0x6a0   : > { %5140 = vmatprep.subr.bf16.mxu1 %v8072_v22  ;;  %2620 = vmatpush1.bf16.msra.mxu0 %v8073_v60 }
 0x6a1   : > { %2621 = vmatprep.subr.bf16.mxu0 %v8074_v12 }
 0x6a3   : > { %5141 = vmatpush3.bf16.msra.mxu1 %v8075_v51 }
 0x6a4   : > { %5142 = vmatprep.subr.bf16.mxu1 %v8072_v22  ;;  %2622 = vmatpush1.bf16.msra.mxu0 %v8076_v53 }
 0x6a5   : > { %2623 = vmatprep.subr.bf16.mxu0 %v8077_v19  ;;  %v2042_v19 = vld [vmem:[#allocation7] sm:$0xff] }
 0x6a7   : > { %5143 = vmatpush3.bf16.msra.mxu1 %v8078_v49 }
 0x6a8   : > { %5144 = vmatprep.subr.bf16.mxu1 %v8072_v22  ;;  %2624 = vmatpush1.bf16.msra.mxu0 %v8079_v55 }
 0x6a9   : > { %2625 = vmatprep.subr.bf16.mxu0 %v8080_v8 }
 0x6ab   : > { %5145 = vmatpush3.bf16.msra.mxu1 %v8081_v36  ;;  %v2043_v36 = vld [vmem:[#allocation7 + $0x8] sm:$0xff] }
 0x6ac   : > { %5146 = vmatprep.subr.bf16.mxu1 %v8072_v22  ;;  %2626 = vmatpush1.bf16.msra.mxu0 %v8082_v40  ;;  %v2044_v40 = vld [vmem:[#allocation7 + $0x10] sm:$0xff] }
 0x6ad   : > { %2627 = vmatprep.subr.bf16.mxu0 %v8083_v32 }
 0x6af   : > { %5147 = vmatpush3.bf16.msra.mxu1 %v8084_v45 }
 0x6b0   : > { %5148 = vmatprep.subr.bf16.mxu1 %v8072_v22  ;;  %2628 = vmatpush1.bf16.msra.mxu0 %v8085_v31  ;;  %v2045_v31 = vld [vmem:[#allocation7 + $0x18] sm:$0xff] }
 0x6b1   : > { %2629 = vmatprep.subr.bf16.mxu0 %v8086_v50 }
 0x6b3   : > { %5149 = vmatpush3.bf16.msra.mxu1 %v8087_v30 }
 0x6b4   : > { %2656 = vmatprep.subr.bf16.mxu1 %v8088_v3  ;;  %2630 = vmatpush1.bf16.msra.mxu0 %v8089_v33 }
 0x6b5   : > { %2776 = vmatprep.subr.bf16.mxu0 %v8090_v9  ;;  %v2046_v9 = vld [vmem:[#allocation7 + $0x20] sm:$0xff] }
 0x6b6   : > { %5151 = vmatmul.mubr.bf16.vlgmr.msra.gmra.mrb[12].mxu1 %v1821_v24 }
 0x6b7   : > { %2657 = vmatpush1.bf16.msra.mxu1 %v8091_v21  ;;  %2688 = vmatprep.mubr.bf16.mxu1 %v8071_v11 }
 0x6b8   : > { %2658 = vmatprep.subr.bf16.mxu1 %v8092_v52 }
 0x6bb   : > { %2659 = vmatpush1.bf16.msra.mxu1 %v8093_v46 }
 0x6bc   : > { %2660 = vmatprep.subr.bf16.mxu1 %v8094_v54 }
 0x6bf   : > { %2661 = vmatpush1.bf16.msra.mxu1 %v8095_v39  ;;  %v2047_v39 = vld [vmem:[#allocation7 + $0x28] sm:$0xff] }
 0x6c0   : > { %2662 = vmatprep.subr.bf16.mxu1 %v8096_v35 }
 0x6c3   : > { %2663 = vmatpush1.bf16.msra.mxu1 %v8097_v26 }
 0x6c4   : > { %2664 = vmatprep.subr.bf16.mxu1 %v8098_v58 }
 0x6c7   : > { %2665 = vmatpush1.bf16.msra.mxu1 %v8099_v10  ;;  %v2048_v10 = vld [vmem:[#allocation7 + $0x30] sm:$0xff] }
 0x6c8   : > { %2666 = vmatprep.subr.bf16.mxu1 %v8100_v20 }
 0x6cb   : > { %2667 = vmatpush1.bf16.msra.mxu1 %v8101_v25 }
 0x6cc   : > { %2668 = vmatprep.subr.bf16.mxu1 %v8102_v7  ;;  %v2049_v7 = vld [vmem:[#allocation7 + $0x38] sm:$0xff] }
 0x6cf   : > { %2669 = vmatpush1.bf16.msra.mxu1 %v8103_v27 }
 0x6d0   : > { %2670 = vmatprep.subr.bf16.mxu1 %v8104_v44 }
 0x6d3   : > { %2671 = vmatpush1.bf16.msra.mxu1 %v8105_v38 }
 0x6d4   : > { %2817 = vmatprep.subr.bf16.mxu1 %v8106_v57  ;;  %v6934_v57 = vld [vmem:[%s7859_s8] ss:$0 sm:$0xff] }
 0x769   : > { %v1904_v61 = vpop.f32.mrb[8].mxu1  ;;  %v6911_v59 = vpop.f32.mrb[12].mxu0 }
 0x76a   : > { %v1993_v63 = vcombine.high %v1904_v61, %v1904_v61  ;;  %v2000_v5 = vrot.slane %v1904_v61, %v8107_v2  ;;  %v6914_v62 = vpop.f32.mrb[9].mxu1  ;;  %v6916_v1 = vpop.f32.mrb[13].mxu0 }
 0x76b   : > { %v1908_v0 = vpop.f32.mrb[10].mxu1  ;;  %v1949_v16 = vpop.f32.mrb[14].mxu0 }
 0x76c   : > { %v2007_v34 = vrot.slane %v1993_v63, %v8107_v2  ;;  %v2008_v6 = vcombine.high %v2000_v5, %v2000_v5  ;;  %v2016_v37 = vrot.slane %v2000_v5, %v8107_v2  ;;  %v1909_v43 = vpop.f32.mrb[11].mxu1  ;;  %v1950_v24 = vpop.f32.mrb[15].mxu0 }
 0x76e   : > { %v2009_v60 = vcombine.high %v2007_v34, %v2007_v34  ;;  %v2023_v12 = vrot.slane %v2007_v34, %v8107_v2  ;;  %v2030_v51 = vrot.slane %v2008_v6, %v8107_v2  ;;  %v2038_v53 = vcombine.high %v2016_v37, %v2016_v37 }
 0x76f   : > { %v2053_v49 = vrot.slane %v2016_v37, %v6404_v14 }
 0x770   : > { %v2037_v55 = vrot.slane %v2009_v60, %v8107_v2  ;;  %v2040_v8 = vcombine.high %v2030_v51, %v2030_v51  ;;  %v2057_v32 = vrot.slane %v2030_v51, %v6404_v14  ;;  %v2039_v45 = vcombine.high %v2023_v12, %v2023_v12 }
 0x771   : > { %v2061_v50 = vrot.slane %v2038_v53, %v6404_v14  ;;  %v2069_v30 = vrot.slane %v2023_v12, %v6404_v14  ;;  %v2090_v3 = vadd.f32 %v2053_v49, %v2042_v19 }
 0x772   : > { %v2041_v33 = vcombine.high %v2037_v55, %v2037_v55  ;;  %v2065_v21 = vrot.slane %v2040_v8, %v6404_v14  ;;  %v2073_v52 = vrot.slane %v2037_v55, %v6404_v14  ;;  %v2091_v46 = vadd.f32 %v2057_v32, %v2043_v36 }
 0x773   : > { %v2092_v54 = vadd.f32 %v2061_v50, %v2044_v40  ;;  %5474 = vtanh.f32 %v2090_v3  ;;  %v2077_v26 = vrot.slane %v2039_v45, %v6404_v14  ;;  %v2094_v58 = vadd.f32 %v2069_v30, %v2046_v9  ;;  %v8108_v40 = vld [vmem:[#allocation29_spill] sm:$0xff]  ;;  %v8109_v45 = vld [vmem:[#allocation28_spill] sm:$0xff]  ;;  %v2138_v50 = vpop.permute.xlu1 %2137 }
 0x774   : > { %v2093_v35 = vadd.f32 %v2065_v21, %v2045_v31  ;;  %5476 = vtanh.f32 %v2091_v46  ;;  %v2081_v20 = vrot.slane %v2041_v33, %v6404_v14  ;;  %v2095_v25 = vadd.f32 %v2073_v52, %v2047_v39  ;;  %v2145_v33 = vpop.permute.xlu0 %2144 }
 0x775   : > { %5478 = vtanh.f32 %v2092_v54  ;;  %v2096_v27 = vadd.f32 %v2077_v26, %v2048_v10  ;;  %v6948_v32 = vrot.slane %v6818_v41, %v8108_v40  ;;  %v6953_v31 = vrot.slane %v6818_v41, %v8109_v45 }
 0x776   : > { %5480 = vtanh.f32 %v2093_v35  ;;  %v2097_v44 = vadd.f32 %v2081_v20, %v2049_v7 }
 0x777   : > { %5482 = vtanh.f32 %v2094_v58  ;;  %v2152_v30 = vpop.permute.xlu1 %2151 }
 0x778   : > { %5484 = vtanh.f32 %v2095_v25  ;;  %v2173_v21 = vpop.permute.xlu0 %2172 }
 0x779   : > { %5486 = vtanh.f32 %v2096_v27 }
 0x77a   : > { %5488 = vtanh.f32 %v2097_v44 }
 0x77b   : > { %v2159_v3 = vpop.permute.xlu1 %2158 }
 0x77d   : > { %v5475_v38 = vpop.eup %5474 }
 0x77e   : > { %v2106_v61 = vmul.f32 %v6934_v57, %v5475_v38  ;;  %v5477_v63 = vpop.eup %5476 }
 0x77f   : > { %v5479_v5 = vpop.eup %5478  ;;  %v2107_v0 = vmul.f32 %v6934_v57, %v5477_v63  ;;  %v2166_v9 = vpop.permute.xlu1 %2165 }
 0x780   : > { %2114 = vadd.xlane.f32.xlu1 %v2106_v61  ;;  %v5481_v16 = vpop.eup %5480  ;;  %v2108_v34 = vmul.f32 %v6934_v57, %v5479_v5 }
 0x781   : > { %2116 = vadd.xlane.f32.xlu0 %v2107_v0  ;;  %v5483_v6 = vpop.eup %5482  ;;  %v2109_v37 = vmul.f32 %v6934_v57, %v5481_v16 }
 0x782   : > { %v5485_v43 = vpop.eup %5484  ;;  %v2110_v24 = vmul.f32 %v6934_v57, %v5483_v6 }
 0x783   : > { %v5487_v60 = vpop.eup %5486  ;;  %v2111_v12 = vmul.f32 %v6934_v57, %v5485_v43 }
 0x784   : > { %2118 = vadd.xlane.f32.xlu1 %v2108_v34  ;;  %v5489_v51 = vpop.eup %5488  ;;  %v2112_v49 = vmul.f32 %v6934_v57, %v5487_v60  ;;  %v8110_v34 = vld [vmem:[#allocation30_spill] sm:$0xff] }
 0x785   : > { %2120 = vadd.xlane.f32.xlu0 %v2109_v37  ;;  %v2113_v36 = vmul.f32 %v6934_v57, %v5489_v51 }
 0x788   : > { %2122 = vadd.xlane.f32.xlu1 %v2110_v24 }
 0x789   : > { %v6942_v53 = vpop.f32.mrb[12].mxu1  ;;  %2124 = vadd.xlane.f32.xlu0 %v2111_v12 }
 0x78a   : > { %v5152_v19 = vpop.f32.mrb[13].mxu1 }
 0x78b   : > { %v1989_v55 = vpop.f32.mrb[14].mxu1 }
 0x78c   : > { %2126 = vadd.xlane.f32.xlu1 %v2112_v49  ;;  %v5153_v8 = vpop.f32.mrb[15].mxu1 }
 0x78d   : > { %2128 = vadd.xlane.f32.xlu0 %v2113_v36 }
 0x79d   : > { %2179 = vbcast.lane.b32.xlu1 %v6948_v32, 256 }
 0x7a3   : > { %2186 = vbcast.lane.b32.xlu0 %v6953_v31, 256 }
 0x80d   : > { %v2115_v52 = vpop.xlane.xlu1 %2114 }
 0x80e   : > { %v2196_v46 = vadd.f32 %v2138_v50, %v2115_v52  ;;  %v2117_v54 = vpop.xlane.xlu0 %2116 }
 0x80f   : > { %v2197_v39 = vadd.f32 %v2145_v33, %v2117_v54 }
 0x810   : > { %2213 = vperm.xlu1 %5319, %v2196_v46  }
 0x811   : > { %v2119_v35 = vpop.xlane.xlu1 %2118  ;;  %2216 = vperm.xlu0 %5318, %v2197_v39  }
 0x812   : > { %v2198_v26 = vadd.f32 %v2152_v30, %v2119_v35  ;;  %v2121_v58 = vpop.xlane.xlu0 %2120 }
 0x813   : > { %v2199_v10 = vadd.f32 %v2159_v3, %v2121_v58 }
 0x814   : > { %2219 = vperm.xlu1 %5319, %v2198_v26  }
 0x815   : > { %v2123_v41 = vpop.xlane.xlu1 %2122  ;;  %2222 = vperm.xlu0 %5318, %v2199_v10  }
 0x816   : > { %v2200_v20 = vadd.f32 %v2166_v9, %v2123_v41  ;;  %v2125_v25 = vpop.xlane.xlu0 %2124 }
 0x817   : > { %v2201_v7 = vadd.f32 %v2173_v21, %v2125_v25 }
 0x818   : > { %2225 = vperm.xlu1 %5319, %v2200_v20  }
 0x819   : > { %v2127_v27 = vpop.xlane.xlu1 %2126  ;;  %2228 = vperm.xlu0 %5318, %v2201_v7  }
 0x81a   : > { %v2129_v44 = vpop.xlane.xlu0 %2128 }
 0x81d   : > { %v2180_v38 = vpop.permute.xlu1 %2179 }
 0x81e   : > { %v2202_v61 = vadd.f32 %v2180_v38, %v2127_v27  ;;  %v2187_v63 = vpop.permute.xlu0 %2186 }
 0x81f   : > { %v6956_v5 = vadd.f32 %v2187_v63, %v2129_v44 }
 0x820   : > { %2231 = vperm.xlu1 %5319, %v2202_v61  }
 0x821   : > { %2234 = vperm.xlu0 %5318, %v6956_v5  }
 0x88f   : > { %v2214_v0 = vpop.permute.xlu1 %2213 }
 0x890   : > { %v2217_v16 = vpop.permute.xlu0 %2216  ;;  %v2239_v37 = vrot.slane %v2214_v0, %v8110_v34 }
 0x891   : > { %v2243_v6 = vrot.slane %v2217_v16, %v8110_v34 }
 0x893   : > { %v2220_v43 = vpop.permute.xlu1 %2219  ;;  %v2268_v60 = vsel %vm1197_vm1, %v2243_v6, %v2239_v37 }
 0x894   : > { %v2247_v24 = vrot.slane %v2220_v43, %v8110_v34  ;;  %v2223_v12 = vpop.permute.xlu0 %2222 }
 0x895   : > { %v2251_v51 = vrot.slane %v2223_v12, %v8110_v34 }
 0x896   : > { %v2269_v49 = vsel %vm1199_vm2, %v2247_v24, %v2268_v60 }
 0x897   : > { %v2226_v19 = vpop.permute.xlu1 %2225  ;;  %v2270_v36 = vsel %vm1201_vm3, %v2251_v51, %v2269_v49 }
 0x898   : > { %v2255_v55 = vrot.slane %v2226_v19, %v8110_v34  ;;  %v2229_v8 = vpop.permute.xlu0 %2228 }
 0x899   : > { %v2259_v50 = vrot.slane %v2229_v8, %v8110_v34 }
 0x89a   : > { %v2271_v30 = vsel %vm1203_vm4, %v2255_v55, %v2270_v36 }
 0x89b   : > { %v2272_v21 = vsel %vm1205_vm5, %v2259_v50, %v2271_v30 }
 0x89f   : > { %v2232_v3 = vpop.permute.xlu1 %2231 }
 0x8a0   : > { %v2263_v33 = vrot.slane %v2232_v3, %v8110_v34  ;;  %v2235_v9 = vpop.permute.xlu0 %2234 }
 0x8a1   : > { %v2267_v52 = vrot.slane %v2235_v9, %v8110_v34 }
 0x8a2   : > { %v2273_v54 = vsel %vm1207_vm6, %v2263_v33, %v2272_v21 }
 0x8a3   : > { %v2274_v35 = vsel %vm1209_vm7, %v2267_v52, %v2273_v54 }
 0x8a4   : > { %v2276_v58 = vsel %vm1212_vm8, %v2274_v35, -inf }
 0x8a5   : > { %2277 = vmax.xlane.f32.xlu1 %v2276_v58 }
 0x932   : > { %v2278_v41 = vpop.xlane.xlu1 %2277 }
 0x933   : > { %v2283_v25 = vrot.slane %v2278_v41, %v6404_v14  ;;  %v2287_v27 = vrot.slane %v2278_v41, %v6401_v13  ;;  %v2291_v44 = vrot.slane %v2278_v41, %v6407_v17  ;;  %v2295_v16 = vrot.slane %v2278_v41, %v6422_v23 }
 0x934   : > { %v2299_v43 = vrot.slane %v2278_v41, %v6410_v18  ;;  %v2303_v12 = vrot.slane %v2278_v41, %v6429_v28 }
 0x935   : > { %v2320_v38 = vsub.f32 %v2196_v46, %v2283_v25  ;;  %v2321_v63 = vsub.f32 %v2197_v39, %v2287_v27  ;;  %v2322_v37 = vsub.f32 %v2198_v26, %v2291_v44  ;;  %v2323_v60 = vsub.f32 %v2199_v10, %v2295_v16 }
 0x936   : > { %v2324_v19 = vsub.f32 %v2200_v20, %v2299_v43  ;;  %v2307_v46 = vrot.slane %v2278_v41, %v8108_v40  ;;  %v2325_v55 = vsub.f32 %v2201_v7, %v2303_v12  ;;  %v2311_v10 = vrot.slane %v2278_v41, %v8109_v45 }
 0x937   : > { %v2328_v0 = vmul.f32 1.442695, %v2320_v38  ;;  %v2330_v6 = vmul.f32 1.442695, %v2321_v63  ;;  %v2332_v24 = vmul.f32 1.442695, %v2322_v37 }
 0x938   : > { %v2334_v51 = vmul.f32 1.442695, %v2323_v60  ;;  %v2336_v39 = vmul.f32 1.442695, %v2324_v19  ;;  %v2338_v8 = vmul.f32 1.442695, %v2325_v55  ;;  %v2326_v36 = vsub.f32 %v2202_v61, %v2307_v46 }
 0x939   : > { %5490 = vpow2.f32 %v2328_v0  ;;  %v2327_v30 = vsub.f32 %v6956_v5, %v2311_v10 }
 0x93a   : > { %5492 = vpow2.f32 %v2330_v6  ;;  %v2340_v20 = vmul.f32 1.442695, %v2326_v36  ;;  %v8111_v36 = vld [vmem:[#allocation34_spill] sm:$0xff] }
 0x93b   : > { %5494 = vpow2.f32 %v2332_v24  ;;  %v2342_v7 = vmul.f32 1.442695, %v2327_v30  ;;  %v8112_v30 = vld [vmem:[#allocation35_spill] sm:$0xff] }
 0x93c   : > { %5496 = vpow2.f32 %v2334_v51 }
 0x93d   : > { %5498 = vpow2.f32 %v2336_v39 }
 0x93e   : > { %5500 = vpow2.f32 %v2338_v8  ;;  %v1853_v8 = vstv %s1852_s9 }
 0x93f   : > { %5502 = vpow2.f32 %v2340_v20  ;;  %v1858_v20 = vmul.f32 %v1853_v8, %v8111_v36 }
 0x940   : > { %5504 = vpow2.f32 %v2342_v7  ;;  %v1854_v7 = vmul.f32 %v1853_v8, %v8112_v30 }
 0x943   : > { %v6981_v49 = vpop.eup %5490 }
 0x944   : > { %2353 = vperm.xlu0 %5318, %v6981_v49   ;;  %v6985_v26 = vpop.eup %5492 }
 0x945   : > { %v6989_v50 = vpop.eup %5494 }
 0x946   : > { %v6993_v3 = vpop.eup %5496 }
 0x947   : > { %v6996_v33 = vpop.eup %5498 }
 0x948   : > { %2356 = vperm.xlu0 %5318, %v6985_v26   ;;  %v6999_v61 = vpop.eup %5500 }
 0x949   : > { %v7002_v9 = vpop.eup %5502 }
 0x94a   : > { %v7005_v5 = vpop.eup %5504 }
 0x94c   : > { %2359 = vperm.xlu0 %5318, %v6989_v50  }
 0x950   : > { %2362 = vperm.xlu0 %5318, %v6993_v3  }
 0x954   : > { %2365 = vperm.xlu0 %5318, %v6996_v33  }
 0x958   : > { %2368 = vperm.xlu0 %5318, %v6999_v61  }
 0x95c   : > { %2371 = vperm.xlu0 %5318, %v7002_v9  }
 0x960   : > { %2374 = vperm.xlu0 %5318, %v7005_v5  }
 0x9c3   : > { %v2354_v21 = vpop.permute.xlu0 %2353 }
 0x9c4   : > { %v2379_v44 = vrot.slane %v2354_v21, %v8110_v34  ;;  %v8113_v21 = vld [vmem:[#allocation36_spill] sm:$0xff] }
 0x9c7   : > { %v2357_v52 = vpop.permute.xlu0 %2356 }
 0x9c8   : > { %v2383_v25 = vrot.slane %v2357_v52, %v8110_v34  ;;  %v1855_v52 = vmul.f32 %v1853_v8, %v8113_v21 }
 0x9ca   : > { %v2408_v16 = vsel %vm1197_vm1, %v2383_v25, %v2379_v44 }
 0x9cb   : > { %v2360_v54 = vpop.permute.xlu0 %2359 }
 0x9cc   : > { %v2387_v27 = vrot.slane %v2360_v54, %v8110_v34  ;;  %v8114_v54 = vld [vmem:[#allocation37_spill] sm:$0xff] }
 0x9ce   : > { %v2409_v37 = vsel %vm1199_vm2, %v2387_v27, %v2408_v16  ;;  %v8116_v27 = vld [vmem:[#allocation41_spill] sm:$0xff] }
 0x9cf   : > { %v2363_v35 = vpop.permute.xlu0 %2362  ;;  %v1859_v44 = vmul.f32 %v1853_v8, %v8116_v27 }
 0x9d0   : > { %v2391_v38 = vrot.slane %v2363_v35, %v8110_v34  ;;  %v1856_v35 = vmul.f32 %v1853_v8, %v8114_v54 }
 0x9d2   : > { %v2410_v24 = vsel %vm1201_vm3, %v2391_v38, %v2409_v37  ;;  %v8117_v38 = vld [vmem:[#allocation43_spill] sm:$0xff] }
 0x9d3   : > { %v2366_v58 = vpop.permute.xlu0 %2365 }
 0x9d4   : > { %v2395_v63 = vrot.slane %v2366_v58, %v8110_v34  ;;  %v8115_v58 = vld [vmem:[#allocation39_spill] sm:$0xff] }
 0x9d6   : > { %v2411_v60 = vsel %vm1203_vm4, %v2395_v63, %v2410_v24  ;;  %v1860_v63 = vmul.f32 %v1853_v8, %v8117_v38 }
 0x9d7   : > { %v2369_v41 = vpop.permute.xlu0 %2368 }
 0x9d8   : > { %v2399_v6 = vrot.slane %v2369_v41, %v8110_v34  ;;  %v1857_v41 = vmul.f32 %v1853_v8, %v8115_v58 }
 0x9da   : > { %v2412_v19 = vsel %vm1205_vm5, %v2399_v6, %v2411_v60  ;;  %v2759_v6 = vstv %s2758_s25  ;;  %s8261_s25 = sld [smem:[#allocation104_spill]] }
 0x9db   : > { %v2372_v0 = vpop.permute.xlu0 %2371 }
 0x9dc   : > { %v2403_v43 = vrot.slane %v2372_v0, %v8110_v34  ;;  %v8118_v0 = vld [vmem:[#allocation46_spill] sm:$0xff] }
 0x9dd   : > { %v1861_v16 = vmul.f32 %v1853_v8, %v8118_v0 }
 0x9de   : > { %v2413_v46 = vsel %vm1207_vm6, %v2403_v43, %v2412_v19 }
 0x9df   : > { %v2375_v12 = vpop.permute.xlu0 %2374 }
 0x9e0   : > { %v2407_v51 = vrot.slane %v2375_v12, %v8110_v34 }
 0x9e2   : > { %v2414_v39 = vsel %vm1209_vm7, %v2407_v51, %v2413_v46 }
 0x9e3   : > { %v2416_v55 = vsel %vm1212_vm8, %v2414_v39, 0.0 }
 0x9e4   : > { %2417 = vadd.xlane.f32.xlu0 %v2416_v55 }
 0xa71   : > { %v2418_v10 = vpop.xlane.xlu0 %2417 }
 0xa72   : > { %5506 = vrcp.f32 %v2418_v10 }
 0xa7c   : > { %v5507_v25 = vpop.eup %5506 }
 0xa7d   : > { %v2440_v37 = vrot.slane %v5507_v25, %v6410_v18  ;;  %v2424_v43 = vrot.slane %v5507_v25, %v6404_v14  ;;  %v2428_v24 = vrot.slane %v5507_v25, %v6401_v13  ;;  %v2432_v60 = vrot.slane %v5507_v25, %v6407_v17 }
 0xa7e   : > { %v2436_v12 = vrot.slane %v5507_v25, %v6422_v23  ;;  %v2444_v51 = vrot.slane %v5507_v25, %v6429_v28  ;;  %v2448_v19 = vrot.slane %v5507_v25, %v8108_v40  ;;  %v2452_v46 = vrot.slane %v5507_v25, %v8109_v45 }
 0xa7f   : > { %v2465_v39 = vmul.f32 %v6996_v33, %v2440_v37  ;;  %v2461_v55 = vmul.f32 %v6981_v49, %v2424_v43  ;;  %v2462_v10 = vmul.f32 %v6985_v26, %v2428_v24  ;;  %v2463_v8 = vmul.f32 %v6989_v50, %v2432_v60 }
 0xa80   : > { %v2464_v36 = vmul.f32 %v6993_v3, %v2436_v12  ;;  %v2466_v30 = vmul.f32 %v6999_v61, %v2444_v51  ;;  %v2467_v21 = vmul.f32 %v7002_v9, %v2448_v19  ;;  %v2468_v54 = vmul.f32 %v7005_v5, %v2452_v46  ;;  %v7087_v46 = vld [vmem:[#allocation9 + $0x18] sm:$0xff] }
 0xa81   : > { %2499 = vperm.xlu0 %5318, %v2465_v39   ;;  %v2764_v58 = vmul.f32 %v2759_v6, %v2465_v39  ;;  %2479 = vperm.xlu1 %5319, %v2461_v55   ;;  %v2760_v25 = vmul.f32 %v2759_v6, %v2461_v55  ;;  %v2761_v27 = vmul.f32 %v2759_v6, %v2462_v10 }
 0xa82   : > { %v2762_v33 = vmul.f32 %v2759_v6, %v2463_v8  ;;  %v2763_v38 = vmul.f32 %v2759_v6, %v2464_v36  ;;  %v2765_v49 = vmul.f32 %v2759_v6, %v2466_v30  ;;  %v2766_v0 = vmul.f32 %v2759_v6, %v2467_v21  ;;  %8119 = vst [vmem:[#allocation50_spill] sm:$0xff] %v7087_v46 }
 0xa83   : > { %v7053_v26 = vadd.f32 %v2764_v58, %v1858_v20  ;;  %v7055_v50 = vadd.f32 %v2760_v25, %v1854_v7  ;;  %v7057_v3 = vadd.f32 %v2761_v27, %v1855_v52  ;;  %v2767_v61 = vmul.f32 %v2759_v6, %v2468_v54  ;;  %v7075_v20 = vld [vmem:[#allocation9] sm:$0xff]  ;;  %v7078_v52 = vld [vmem:[#allocation9 + $0x8] sm:$0xff] }
 0xa84   : > { %v7059_v37 = vadd.f32 %v2762_v33, %v1856_v35  ;;  %v7061_v9 = vadd.f32 %v2763_v38, %v1857_v41  ;;  %v7063_v5 = vadd.f32 %v2765_v49, %v1859_v44  ;;  %v7065_v43 = vadd.f32 %v2766_v0, %v1860_v63  ;;  %v7084_v63 = vld [vmem:[#allocation9 + $0x10] sm:$0xff] }
 0xa85   : > { %2484 = vperm.xlu1 %5319, %v2462_v10   ;;  %v7067_v24 = vadd.f32 %v2767_v61, %v1861_v16  ;;  %3050 = vbcast.lane.b32.xlu0 %v6826_v47, 256  ;;  %v7093_v61 = vld [vmem:[#allocation9 + $0x30] sm:$0xff] }
 0xa89   : > { %2489 = vperm.xlu1 %5319, %v2463_v8   ;;  %3078 = vbcast.lane.b32.xlu0 %v6836_v29, 256  ;;  %v7080_v29 = vld [vmem:[#allocation9 + $0x20] sm:$0xff] }
 0xa8d   : > { %2494 = vperm.xlu1 %5319, %v2464_v36  }
 0xa91   : > { %2504 = vperm.xlu1 %5319, %v2466_v30  }
 0xa95   : > { %2509 = vperm.xlu1 %5319, %v2467_v21  }
 0xa99   : > { %2514 = vperm.xlu1 %5319, %v2468_v54   ;;  %v7090_v54 = vld [vmem:[#allocation9 + $0x28] sm:$0xff] }
 0xa9a   : > { %8120 = vst [vmem:[#allocation52_spill] sm:$0xff] %v7090_v54 }
 0xa9d   : > { %3043 = vbcast.lane.b32.xlu1 %v6822_v42, 256 }
 0xaa1   : > { %3057 = vbcast.lane.b32.xlu1 %v6831_v15, 256 }
 0xaa5   : > { %3064 = vbcast.lane.b32.xlu1 %v6841_v48, 256 }
 0xaa9   : > { %3071 = vbcast.lane.b32.xlu1 %v6847_v56, 256 }
 0xb00   : > { %v2480_v7 = vpop.permute.xlu1 %2479  ;;  %v2500_v35 = vpop.permute.xlu0 %2499 }
 0xb01   : > { %v2517_v47 = vmul.f32 %v2480_v7, %v7075_v20  ;;  %v2521_v15 = vmul.f32 %v2500_v35, %v7080_v29 }
 0xb03   : > { %v2525_v41 = vrot.slane %v2517_v47, 4  ;;  %v2549_v12 = vrot.slane %v2521_v15, 4 }
 0xb04   : > { %v2485_v44 = vpop.permute.xlu1 %2484 }
 0xb05   : > { %v2518_v42 = vmul.f32 %v2485_v44, %v7078_v52  ;;  %v2526_v56 = vadd.f32 %v2525_v41, %v2517_v47  ;;  %v2550_v8 = vadd.f32 %v2549_v12, %v2521_v15 }
 0xb07   : > { %v2531_v48 = vrot.slane %v2518_v42, 4  ;;  %v2527_v39 = vrot.slane %v2526_v56, 2  ;;  %v2551_v38 = vrot.slane %v2550_v8, 2 }
 0xb08   : > { %v2490_v16 = vpop.permute.xlu1 %2489 }
 0xb09   : > { %v2532_v6 = vadd.f32 %v2531_v48, %v2518_v42  ;;  %v2519_v60 = vmul.f32 %v2490_v16, %v7084_v63  ;;  %v2528_v58 = vadd.f32 %v2527_v39, %v2526_v56  ;;  %v2552_v48 = vadd.f32 %v2551_v38, %v2550_v8 }
 0xb0b   : > { %v2533_v51 = vrot.slane %v2532_v6, 2  ;;  %v2537_v19 = vrot.slane %v2519_v60, 4  ;;  %v2529_v47 = vrot.slane %v2528_v58, 1 }
 0xb0c   : > { %v2495_v55 = vpop.permute.xlu1 %2494 }
 0xb0d   : > { %v2538_v10 = vadd.f32 %v2537_v19, %v2519_v60  ;;  %v2520_v36 = vmul.f32 %v2495_v55, %v7087_v46  ;;  %v2534_v30 = vadd.f32 %v2533_v51, %v2532_v6  ;;  %v7096_v6 = vld [vmem:[#allocation9 + $0x38] sm:$0xff]  ;;  %v2530_v51 = vadd.f32 %v2529_v47, %v2528_v58 }
 0xb0e   : > { %8121 = vst [vmem:[#allocation32_spill] sm:$0xff] %v7096_v6 }
 0xb0f   : > { %v2539_v21 = vrot.slane %v2538_v10, 2  ;;  %v2543_v25 = vrot.slane %v2520_v36, 4  ;;  %v2535_v7 = vrot.slane %v2534_v30, 1  ;;  %v2573_v38 = vpack.c.bf16 %v2530_v51, %v2530_v51 }
 0xb10   : > { %v2505_v27 = vpop.permute.xlu1 %2504 }
 0xb11   : > { %v2540_v33 = vadd.f32 %v2539_v21, %v2538_v10  ;;  %v2544_v49 = vadd.f32 %v2543_v25, %v2520_v36  ;;  %v2522_v0 = vmul.f32 %v2505_v27, %v7090_v54  ;;  %v2536_v60 = vadd.f32 %v2535_v7, %v2534_v30 }
 0xb12   : > { %v2553_v25 = vrot.slane %v2552_v48, 1 }
 0xb13   : > { %v2541_v35 = vrot.slane %v2540_v33, 1  ;;  %v2545_v41 = vrot.slane %v2544_v49, 2  ;;  %v2555_v44 = vrot.slane %v2522_v0, 4  ;;  %v2574_v46 = vpack.c.bf16 %v2536_v60, %v2536_v60 }
 0xb14   : > { %v2510_v42 = vpop.permute.xlu1 %2509  ;;  %v2554_v58 = vadd.f32 %v2553_v25, %v2552_v48 }
 0xb15   : > { %v2523_v15 = vmul.f32 %v2510_v42, %v7093_v61  ;;  %v2546_v16 = vadd.f32 %v2545_v41, %v2544_v49  ;;  %v2556_v56 = vadd.f32 %v2555_v44, %v2522_v0  ;;  %v2542_v19 = vadd.f32 %v2541_v35, %v2540_v33 }
 0xb16   : > { %v2599_v47 = vunpack.c.l.b16 %v2574_v46  ;;  %v2577_v60 = vpack.c.bf16 %v2554_v58, %v2554_v58  ;;  %v7121_v58 = vld [vmem:[#allocation12 + $0x28] ss:$20 sps:$4 sm:$0xff]  }
 0xb17   : > { %v2561_v12 = vrot.slane %v2523_v15, 4  ;;  %v2547_v39 = vrot.slane %v2546_v16, 1  ;;  %v2557_v55 = vrot.slane %v2556_v56, 2  ;;  %v2575_v49 = vpack.c.bf16 %v2542_v19, %v2542_v19 }
 0xb18   : > { %v2515_v10 = vpop.permute.xlu1 %2514 }
 0xb19   : > { %v2562_v36 = vadd.f32 %v2561_v12, %v2523_v15  ;;  %v2524_v21 = vmul.f32 %v2515_v10, %v7096_v6  ;;  %v2548_v27 = vadd.f32 %v2547_v39, %v2546_v16  ;;  %v2558_v54 = vadd.f32 %v2557_v55, %v2556_v56 }
 0xb1a   : > { %v2598_v15 = vunpack.c.l.b16 %v2573_v38  ;;  %v2600_v12 = vunpack.c.l.b16 %v2575_v49 }
 0xb1b   : > { %v2563_v42 = vrot.slane %v2562_v36, 2  ;;  %v2567_v8 = vrot.slane %v2524_v21, 4  ;;  %v2559_v0 = vrot.slane %v2558_v54, 1  ;;  %v2576_v41 = vpack.c.bf16 %v2548_v27, %v2548_v27 }
 0xb1c   : > { %v2606_v39 = vsel %vm1197_vm1, %v2599_v47, %v2598_v15  ;;  %v7127_v47 = vld [vmem:[#allocation12 + $0x54] ss:$20 sps:$4 sm:$0xff]   ;;  %v7136_v15 = vld [vmem:[#allocation12 + $0x58] ss:$20 sps:$4 sm:$0xff]  }
 0xb1d   : > { %v2564_v30 = vadd.f32 %v2563_v42, %v2562_v36  ;;  %v2568_v7 = vadd.f32 %v2567_v8, %v2524_v21  ;;  %v2560_v33 = vadd.f32 %v2559_v0, %v2558_v54  ;;  %v2601_v10 = vunpack.c.l.b16 %v2576_v41  ;;  %v7107_v41 = vld [vmem:[#allocation12] ss:$20 sps:$4 sm:$0xff]  }
 0xb1e   : > { %v2607_v55 = vsel %vm1199_vm2, %v2600_v12, %v2606_v39  ;;  %v2602_v36 = vunpack.c.l.b16 %v2577_v60  ;;  %v7139_v12 = vld [vmem:[#allocation12 + $0x7c] ss:$20 sps:$4 sm:$0xff]   ;;  %v7151_v60 = vld [vmem:[#allocation12 + $0xa4] ss:$20 sps:$4 sm:$0xff]   ;;  %v7154_v39 = vld [vmem:[#allocation12 + $0xac] ss:$20 sps:$4 sm:$0xff]  }
 0xb1f   : > { %v2565_v35 = vrot.slane %v2564_v30, 1  ;;  %v2569_v44 = vrot.slane %v2568_v7, 2  ;;  %v2578_v6 = vpack.c.bf16 %v2560_v33, %v2560_v33  ;;  %v2608_v48 = vsel %vm1201_vm3, %v2601_v10, %v2607_v55  ;;  %v7124_v33 = vld [vmem:[#allocation12 + $0x30] ss:$20 sps:$4 sm:$0xff]   ;;  %8122 = vst [vmem:[#allocation54_spill] sm:$0xff] %v7139_v12  ;;  %8126 = vst [vmem:[#allocation60_spill] sm:$0xff] %v7151_v60 }
 0xb20   : > { %v2609_v27 = vsel %vm1203_vm4, %v2602_v36, %v2608_v48  ;;  %v7142_v10 = vld [vmem:[#allocation12 + $0x84] ss:$20 sps:$4 sm:$0xff]   ;;  %8127 = vst [vmem:[#allocation38_spill] sm:$0xff] %v7154_v39  ;;  %v7163_v55 = vld [vmem:[#allocation12 + $0xcc] ss:$20 sps:$4 sm:$0xff]  }
 0xb21   : > { %v2566_v16 = vadd.f32 %v2565_v35, %v2564_v30  ;;  %v2570_v56 = vadd.f32 %v2569_v44, %v2568_v7  ;;  %v2603_v54 = vunpack.c.l.b16 %v2578_v6  ;;  %v7110_v6 = vld [vmem:[#allocation12 + $0x8] ss:$20 sps:$4 sm:$0xff]   ;;  %v7113_v30 = vld [vmem:[#allocation12 + $0x2c] ss:$20 sps:$4 sm:$0xff]   ;;  %v7133_v44 = vld [vmem:[#allocation12 + $0x50] ss:$20 sps:$4 sm:$0xff]  }
 0xb22   : > { %v7116_v7 = vld [vmem:[#allocation12 + $0x34] ss:$20 sps:$4 sm:$0xff]   ;;  %v7130_v35 = vld [vmem:[#allocation12 + $0x5c] ss:$20 sps:$4 sm:$0xff]   ;;  %8123 = vst [vmem:[#allocation56_spill] sm:$0xff] %v7142_v10  ;;  %8130 = vst [vmem:[#allocation40_spill] sm:$0xff] %v7163_v55 }
 0xb23   : > { %v2579_v51 = vpack.c.bf16 %v2566_v16, %v2566_v16  ;;  %v2571_v19 = vrot.slane %v2570_v56, 1  ;;  %v2610_v8 = vsel %vm1205_vm5, %v2603_v54, %v2609_v27  ;;  %v7145_v16 = vld [vmem:[#allocation12 + $0x78] ss:$20 sps:$4 sm:$0xff]   ;;  %v7166_v48 = vld [vmem:[#allocation12 + $0xd4] ss:$20 sps:$4 sm:$0xff]  }
 0xb24   : > { %8124 = vst [vmem:[#allocation33_spill] sm:$0xff] %v7145_v16  ;;  %8131 = vst [vmem:[#allocation66_spill] sm:$0xff] %v7166_v48  ;;  %v7169_v54 = vld [vmem:[#allocation12 + $0xc8] ss:$20 sps:$4 sm:$0xff]   ;;  %v7184_v27 = vld [vmem:[#allocation12 + $0xf8] ss:$20 sps:$4 sm:$0xff]  }
 0xb25   : > { %v2572_v46 = vadd.f32 %v2571_v19, %v2570_v56  ;;  %v2604_v21 = vunpack.c.l.b16 %v2579_v51  ;;  %v7148_v56 = vld [vmem:[#allocation12 + $0x80] ss:$20 sps:$4 sm:$0xff]   ;;  %v7160_v19 = vld [vmem:[#allocation12 + $0xa8] ss:$20 sps:$4 sm:$0xff]   ;;  %8132 = vst [vmem:[#allocation68_spill] sm:$0xff] %v7169_v54  ;;  %8137 = vst [vmem:[#allocation45_spill] sm:$0xff] %v7184_v27 }
 0xb26   : > { %8125 = vst [vmem:[#allocation58_spill] sm:$0xff] %v7148_v56  ;;  %v7157_v51 = vld [vmem:[#allocation12 + $0xa0] ss:$20 sps:$4 sm:$0xff]   ;;  %8129 = vst [vmem:[#allocation64_spill] sm:$0xff] %v7160_v19 }
 0xb27   : > { %v2580_v25 = vpack.c.bf16 %v2572_v46, %v2572_v46  ;;  %v2611_v38 = vsel %vm1207_vm6, %v2604_v21, %v2610_v8  ;;  %8128 = vst [vmem:[#allocation62_spill] sm:$0xff] %v7157_v51  ;;  %v7172_v46 = vld [vmem:[#allocation12 + $0xd0] ss:$20 sps:$4 sm:$0xff]   ;;  %v7175_v36 = vld [vmem:[#allocation12 + $0xf4] ss:$20 sps:$4 sm:$0xff]  }
 0xb28   : > { %8133 = vst [vmem:[#allocation42_spill] sm:$0xff] %v7172_v46  ;;  %8134 = vst [vmem:[#allocation44_spill] sm:$0xff] %v7175_v36  ;;  %v7178_v21 = vld [vmem:[#allocation12 + $0xfc] ss:$20 sps:$4 sm:$0xff]   ;;  %v7190_v8 = vld [vmem:[#allocation12 + $0x124] ss:$20 sps:$4 sm:$0xff]  }
 0xb29   : > { %v2605_v42 = vunpack.c.l.b16 %v2580_v25  ;;  %8135 = vst [vmem:[#allocation70_spill] sm:$0xff] %v7178_v21  ;;  %v7181_v25 = vld [vmem:[#allocation12 + $0xf0] ss:$20 sps:$4 sm:$0xff]   ;;  %8139 = vst [vmem:[#allocation48_spill] sm:$0xff] %v7190_v8 }
 0xb2a   : > { %8136 = vst [vmem:[#allocation72_spill] sm:$0xff] %v7181_v25 }
 0xb2b   : > { %v2612_v49 = vsel %vm1209_vm7, %v2605_v42, %v2611_v38  ;;  %v7187_v42 = vld [vmem:[#allocation12 + $0x11c] ss:$20 sps:$4 sm:$0xff]   ;;  %v7193_v38 = vld [vmem:[#allocation12 + $0x118] ss:$20 sps:$4 sm:$0xff]  }
 0xb2c   : > { %v2613_v0 = vpack.c.b16 %v2612_v49, %v2612_v49  ;;  %8138 = vst [vmem:[#allocation47_spill] sm:$0xff] %v7187_v42  ;;  %8140 = vst [vmem:[#allocation49_spill] sm:$0xff] %v7193_v38  ;;  %v7196_v49 = vld [vmem:[#allocation12 + $0x120] ss:$20 sps:$4 sm:$0xff]  }
 0xb2d   : > { %8141 = vst [vmem:[#allocation51_spill] sm:$0xff] %v7196_v49 }
 0xb2e   : > { %2648 = vmatmul.mubr.bf16.vlgmr.msra.gmra.mrb[16].mxu0 %v2613_v0  ;;  %4997 = vst [vmem:[%s6386_s16 + $0x4] sm:$0xf] %v2613_v0  ;;  %2689 = vmatmul.mubr.bf16.vlgmr.msra.gmra.mrb[16].mxu1 %v2613_v0  ;;  %v7200_v0 = vld [vmem:[#allocation13 + $0x4] ss:$16 sps:$4 sm:$0xff]  }
 0xb2f   : > { %2777 = vmatpush1.bf16.msra.mxu0 %v7107_v41  ;;  %2818 = vmatpush1.bf16.msra.mxu1 %v7110_v6  ;;  %8142 = vst [vmem:[#allocation53_spill] sm:$0xff] %v7200_v0 }
 0xb30   : > { %2778 = vmatprep.subr.bf16.mxu0 %v7113_v30  ;;  %2819 = vmatprep.subr.bf16.mxu1 %v7116_v7 }
 0xb31   : > { %2808 = vmatprep.mubr.bf16.mxu0 %v8071_v11  ;;  %2849 = vmatprep.mubr.bf16.mxu1 %v8071_v11 }
 0xb33   : > { %2779 = vmatpush1.bf16.msra.mxu0 %v7121_v58  ;;  %2820 = vmatpush1.bf16.msra.mxu1 %v7124_v33 }
 0xb34   : > { %2780 = vmatprep.subr.bf16.mxu0 %v7127_v47  ;;  %2821 = vmatprep.subr.bf16.mxu1 %v7130_v35 }
 0xb37   : > { %2781 = vmatpush1.bf16.msra.mxu0 %v7133_v44  ;;  %2822 = vmatpush1.bf16.msra.mxu1 %v7136_v15 }
 0xb38   : > { %2782 = vmatprep.subr.bf16.mxu0 %v7139_v12  ;;  %2823 = vmatprep.subr.bf16.mxu1 %v7142_v10 }
 0xb3b   : > { %2783 = vmatpush1.bf16.msra.mxu0 %v7145_v16  ;;  %2824 = vmatpush1.bf16.msra.mxu1 %v7148_v56 }
 0xb3c   : > { %2784 = vmatprep.subr.bf16.mxu0 %v7151_v60  ;;  %2825 = vmatprep.subr.bf16.mxu1 %v7154_v39 }
 0xb3f   : > { %2785 = vmatpush1.bf16.msra.mxu0 %v7157_v51  ;;  %2826 = vmatpush1.bf16.msra.mxu1 %v7160_v19 }
 0xb40   : > { %2786 = vmatprep.subr.bf16.mxu0 %v7163_v55  ;;  %2827 = vmatprep.subr.bf16.mxu1 %v7166_v48 }
 0xb43   : > { %2787 = vmatpush1.bf16.msra.mxu0 %v7169_v54  ;;  %2828 = vmatpush1.bf16.msra.mxu1 %v7172_v46 }
 0xb44   : > { %2788 = vmatprep.subr.bf16.mxu0 %v7175_v36  ;;  %2829 = vmatprep.subr.bf16.mxu1 %v7178_v21  ;;  %v4984_v21 = vld [vmem:[%s6365_s29 + $0x38] sm:$0xff] }
 0xb45   : > { %v2589_v46 = vadd.f32 %v4984_v21, %v6942_v53  ;;  %v7216_v21 = vld [vmem:[#allocation12 + $0x10] ss:$20 sps:$4 sm:$0xff]  }
 0xb46   : > { %8144 = vst [vmem:[#allocation57_spill] sm:$0xff] %v7216_v21 }
 0xb47   : > { %2789 = vmatpush1.bf16.msra.mxu0 %v7181_v25  ;;  %2830 = vmatpush1.bf16.msra.mxu1 %v7184_v27  ;;  %v4981_v27 = vld [vmem:[%s6365_s29 + $0x20] sm:$0xff]  ;;  %v4982_v25 = vld [vmem:[%s6365_s29 + $0x28] sm:$0xff] }
 0xb48   : > { %2790 = vmatprep.subr.bf16.mxu0 %v7187_v42  ;;  %2831 = vmatprep.subr.bf16.mxu1 %v7190_v8  ;;  %v4983_v42 = vld [vmem:[%s6365_s29 + $0x30] sm:$0xff]  ;;  %v2586_v8 = vadd.f32 %v4981_v27, %v6914_v62  ;;  %v7225_v27 = vld [vmem:[#allocation13 + $0x24] ss:$16 sps:$4 sm:$0xff]  }
 0xb49   : > { %v2588_v36 = vadd.f32 %v4983_v42, %v6916_v1  ;;  %8146 = vst [vmem:[#allocation61_spill] sm:$0xff] %v7225_v27  ;;  %v7229_v42 = vld [vmem:[#allocation12 + $0x38] ss:$20 sps:$4 sm:$0xff]  }
 0xb4a   : > { %8147 = vst [vmem:[#allocation63_spill] sm:$0xff] %v7229_v42 }
 0xb4b   : > { %2791 = vmatpush1.bf16.msra.mxu0 %v7193_v38  ;;  %2832 = vmatpush1.bf16.msra.mxu1 %v7196_v49  ;;  %v2587_v38 = vadd.f32 %v4982_v25, %v6911_v59 }
 0xb4c   : > { %5154 = vmatprep.subr.bf16.mxu0 %v8072_v22  ;;  %3521 = vmatprep.subr.bf16.mxu1 %v7200_v0 }
 0xc01   : > { %v2649_v54 = vpop.f32.mrb[16].mxu0  ;;  %v2690_v49 = vpop.f32.mrb[16].mxu1 }
 0xc02   : > { %v2697_v48 = vadd.f32 %v2649_v54, %v2586_v8  ;;  %v2699_v55 = vadd.f32 %v2690_v49, %v2588_v36  ;;  %v2651_v19 = vpop.f32.mrb[17].mxu0  ;;  %v2692_v51 = vpop.f32.mrb[17].mxu1  ;;  %v7233_v8 = vld [vmem:[#allocation13 + $0x20] ss:$16 sps:$4 sm:$0xff]  }
 0xc03   : > { %v2698_v39 = vadd.f32 %v2651_v19, %v2587_v38  ;;  %v2700_v0 = vadd.f32 %v2692_v51, %v2589_v46  ;;  %v2653_v60 = vpop.f32.mrb[18].mxu0  ;;  %v2694_v56 = vpop.f32.mrb[18].mxu1  ;;  %8148 = vst [vmem:[#allocation65_spill] sm:$0xff] %v7233_v8  ;;  %v7236_v38 = vld [vmem:[#allocation13 + $0x44] ss:$16 sps:$4 sm:$0xff]  }
 0xc04   : > { %v4985_v16 = vmul.f32 -1.442695, %v2697_v48  ;;  %v2654_v10 = vpop.f32.mrb[19].mxu0  ;;  %v2695_v12 = vpop.f32.mrb[19].mxu1  ;;  %8149 = vst [vmem:[#allocation67_spill] sm:$0xff] %v7236_v38 }
 0xc05   : > { %v4986_v62 = vmul.f32 -1.442695, %v2698_v39  ;;  %v4987_v1 = vmul.f32 -1.442695, %v2700_v0  ;;  %v7239_v49 = vld [vmem:[#allocation12 + $0x60] ss:$20 sps:$4 sm:$0xff]  }
 0xc06   : > { %5508 = vpow2.f32 %v4985_v16  ;;  %8150 = vst [vmem:[#allocation69_spill] sm:$0xff] %v7239_v49  ;;  %v7243_v0 = vld [vmem:[#allocation13 + $0x40] ss:$16 sps:$4 sm:$0xff]  }
 0xc07   : > { %5510 = vpow2.f32 %v4986_v62  ;;  %8151 = vst [vmem:[#allocation71_spill] sm:$0xff] %v7243_v0  ;;  %v7246_v62 = vld [vmem:[#allocation13 + $0x64] ss:$16 sps:$4 sm:$0xff]  }
 0xc08   : > { %5512 = vpow2.f32 %v4987_v1  ;;  %8152 = vst [vmem:[#allocation31_spill] sm:$0xff] %v7246_v62  ;;  %v7249_v1 = vld [vmem:[#allocation12 + $0x88] ss:$20 sps:$4 sm:$0xff]  }
 0xc09   : > { %5514 = vtanh.f32 %v2699_v55  ;;  %8153 = vst [vmem:[#allocation28_spill] sm:$0xff] %v7249_v1 }
 0xc10   : > { %v5509_v59 = vpop.eup %5508 }
 0xc11   : > { %v5511_v25 = vpop.eup %5510  ;;  %v2704_v53 = vadd.f32 1.0, %v5509_v59  ;;  %v7253_v59 = vld [vmem:[#allocation13 + $0x60] ss:$16 sps:$4 sm:$0xff]  }
 0xc12   : > { %v2710_v54 = vadd.f32 1.0, %v5511_v25  ;;  %v5513_v19 = vpop.eup %5512  ;;  %8154 = vst [vmem:[#allocation34_spill] sm:$0xff] %v7253_v59  ;;  %v7256_v25 = vld [vmem:[#allocation13 + $0x84] ss:$16 sps:$4 sm:$0xff]  }
 0xc13   : > { %5516 = vrcp.f32 %v2704_v53  ;;  %v5515_v51 = vpop.eup %5514  ;;  %v2717_v10 = vadd.f32 1.0, %v5513_v19  ;;  %8155 = vst [vmem:[#allocation35_spill] sm:$0xff] %v7256_v25  ;;  %v7259_v53 = vld [vmem:[#allocation12 + $0xb0] ss:$20 sps:$4 sm:$0xff]  }
 0xc14   : > { %5518 = vrcp.f32 %v2710_v54  ;;  %8156 = vst [vmem:[#allocation36_spill] sm:$0xff] %v7259_v53  ;;  %v7263_v54 = vld [vmem:[#allocation13 + $0x80] ss:$16 sps:$4 sm:$0xff]   ;;  %v7266_v19 = vld [vmem:[#allocation13 + $0xa4] ss:$16 sps:$4 sm:$0xff]  }
 0xc15   : > { %5520 = vrcp.f32 %v2717_v10  ;;  %8157 = vst [vmem:[#allocation37_spill] sm:$0xff] %v7263_v54  ;;  %8158 = vst [vmem:[#allocation39_spill] sm:$0xff] %v7266_v19  ;;  %v7283_v10 = vld [vmem:[#allocation13 + $0xc0] ss:$16 sps:$4 sm:$0xff]  }
 0xc16   : > { %8163 = vst [vmem:[#allocation74_spill] sm:$0xff] %v7283_v10 }
 0xc1d   : > { %v5517_v60 = vpop.eup %5516 }
 0xc1e   : > { %v5519_v56 = vpop.eup %5518  ;;  %v2721_v48 = vmul.f32 %v5517_v60, %v5515_v51  ;;  %v7269_v51 = vld [vmem:[#allocation12 + $0xd8] ss:$20 sps:$4 sm:$0xff]   ;;  %v7273_v60 = vld [vmem:[#allocation13 + $0xa0] ss:$16 sps:$4 sm:$0xff]  }
 0xc1f   : > { %v2720_v12 = vmul.f32 %v5519_v56, %v6855_v4  ;;  %v5521_v39 = vpop.eup %5520  ;;  %v7222_v4 = vld [vmem:[#allocation13] ss:$16 sps:$4 sm:$0xff]   ;;  %8159 = vst [vmem:[#allocation41_spill] sm:$0xff] %v7269_v51  ;;  %8160 = vst [vmem:[#allocation43_spill] sm:$0xff] %v7273_v60  ;;  %v7276_v56 = vld [vmem:[#allocation13 + $0xc4] ss:$16 sps:$4 sm:$0xff]  }
 0xc20   : > { %8145 = vst [vmem:[#allocation59_spill] sm:$0xff] %v7222_v4  ;;  %8161 = vst [vmem:[#allocation46_spill] sm:$0xff] %v7276_v56 }
 0xc21   : > { %v7212_v16 = vadd.f32 %v2721_v48, %v2720_v12  ;;  %v7279_v48 = vld [vmem:[#allocation12 + $0x100] ss:$20 sps:$4 sm:$0xff]  }
 0xc22   : > { %8162 = vst [vmem:[#allocation73_spill] sm:$0xff] %v7279_v48  ;;  %v7286_v12 = vld [vmem:[#allocation13 + $0xe4] ss:$16 sps:$4 sm:$0xff]  }
 0xc23   : > { %8143 = vst [vmem:[#allocation55_spill] sm:$0xff] %v7212_v16  ;;  %5522 = vtanh.f32 %v7212_v16  ;;  %8164 = vst [vmem:[#allocation75_spill] sm:$0xff] %v7286_v12 }
 0xc2d   : > { %v5523_v46 = vpop.eup %5522 }
 0xc2e   : > { %v2724_v55 = vmul.f32 %v5523_v46, %v5521_v39  ;;  %v7289_v39 = vld [vmem:[#allocation12 + $0x128] ss:$20 sps:$4 sm:$0xff]  }
 0xc2f   : > { %8165 = vst [vmem:[#allocation76_spill] sm:$0xff] %v7289_v39  ;;  %v7292_v46 = vld [vmem:[#allocation13 + $0xc] ss:$16 sps:$4 sm:$0xff]  }
 0xc30   : > { %v2725_v36 = vpack.c.bf16 %v2724_v55, %v2724_v55  ;;  %8166 = vst [vmem:[#allocation77_spill] sm:$0xff] %v7292_v46  ;;  %v7295_v55 = vld [vmem:[#allocation13 + $0xe0] ss:$16 sps:$4 sm:$0xff]  }
 0xc31   : > { %8167 = vst [vmem:[#allocation78_spill] sm:$0xff] %v7295_v55 }
 0xc32   : > { %4988 = vst [vmem:[%s6384_s27 + $0x4] sm:$0xf] %v2725_v36  ;;  %2809 = vmatmul.mubr.bf16.vlgmr.msra.gmra.mrb[20].mxu0 %v2725_v36  ;;  %2850 = vmatmul.mubr.bf16.vlgmr.msra.gmra.mrb[20].mxu1 %v2725_v36 }
 0xc33   : > { %5155 = vmatpush3.bf16.msra.mxu0 %v7216_v21  ;;  %5170 = vmatprep.mubr.msk.bf16.mxu0 %vm6053_vm9, %v8072_v22 }
 0xc34   : > { %5156 = vmatprep.subr.bf16.mxu0 %v8072_v22  ;;  %3522 = vmatpush1.bf16.msra.mxu1 %v7222_v4  ;;  %v5717_v4 = vld [vmem:[#allocation7 + $0x20] sm:$0xff] }
 0xc35   : > { %3523 = vmatprep.subr.bf16.mxu1 %v7225_v27  ;;  %3553 = vmatprep.mubr.bf16.mxu1 %v8071_v11 }
 0xc37   : > { %5157 = vmatpush3.bf16.msra.mxu0 %v7229_v42 }
 0xc38   : > { %5158 = vmatprep.subr.bf16.mxu0 %v8072_v22  ;;  %3524 = vmatpush1.bf16.msra.mxu1 %v7233_v8  ;;  %v5714_v8 = vld [vmem:[#allocation7 + $0x8] sm:$0xff] }
 0xc39   : > { %3525 = vmatprep.subr.bf16.mxu1 %v7236_v38 }
 0xc3b   : > { %5159 = vmatpush3.bf16.msra.mxu0 %v7239_v49 }
 0xc3c   : > { %5160 = vmatprep.subr.bf16.mxu0 %v8072_v22  ;;  %3526 = vmatpush1.bf16.msra.mxu1 %v7243_v0 }
 0xc3d   : > { %3527 = vmatprep.subr.bf16.mxu1 %v7246_v62 }
 0xc3f   : > { %5161 = vmatpush3.bf16.msra.mxu0 %v7249_v1 }
 0xc40   : > { %5162 = vmatprep.subr.bf16.mxu0 %v8072_v22  ;;  %3528 = vmatpush1.bf16.msra.mxu1 %v7253_v59 }
 0xc41   : > { %3529 = vmatprep.subr.bf16.mxu1 %v7256_v25 }
 0xc43   : > { %5163 = vmatpush3.bf16.msra.mxu0 %v7259_v53 }
 0xc44   : > { %5164 = vmatprep.subr.bf16.mxu0 %v8072_v22  ;;  %3530 = vmatpush1.bf16.msra.mxu1 %v7263_v54 }
 0xc45   : > { %3531 = vmatprep.subr.bf16.mxu1 %v7266_v19 }
 0xc47   : > { %5165 = vmatpush3.bf16.msra.mxu0 %v7269_v51 }
 0xc48   : > { %5166 = vmatprep.subr.bf16.mxu0 %v8072_v22  ;;  %3532 = vmatpush1.bf16.msra.mxu1 %v7273_v60 }
 0xc49   : > { %3533 = vmatprep.subr.bf16.mxu1 %v7276_v56 }
 0xc4b   : > { %5167 = vmatpush3.bf16.msra.mxu0 %v7279_v48  ;;  %v5696_v48 = vld [vmem:[#allocation12 + $0x4] ss:$20 sps:$4 sm:$0xff]  }
 0xc4c   : > { %5168 = vmatprep.subr.bf16.mxu0 %v8072_v22  ;;  %3534 = vmatpush1.bf16.msra.mxu1 %v7283_v10  ;;  %v7298_v10 = vld [vmem:[#allocation13 + $0x8] ss:$16 sps:$4 sm:$0xff]  }
 0xc4d   : > { %3535 = vmatprep.subr.bf16.mxu1 %v7286_v12  ;;  %8168 = vst [vmem:[#allocation79_spill] sm:$0xff] %v7298_v10  ;;  %v7302_v12 = vld [vmem:[#allocation13 + $0x2c] ss:$16 sps:$4 sm:$0xff]  }
 0xc4e   : > { %8169 = vst [vmem:[#allocation80_spill] sm:$0xff] %v7302_v12 }
 0xc4f   : > { %5169 = vmatpush3.bf16.msra.mxu0 %v7289_v39  ;;  %v7305_v39 = vld [vmem:[#allocation13 + $0x28] ss:$16 sps:$4 sm:$0xff]  }
 0xc50   : > { %3562 = vmatprep.subr.bf16.mxu0 %v7292_v46  ;;  %3536 = vmatpush1.bf16.msra.mxu1 %v7295_v55  ;;  %8170 = vst [vmem:[#allocation81_spill] sm:$0xff] %v7305_v39  ;;  %v7308_v46 = vld [vmem:[#allocation13 + $0x4c] ss:$16 sps:$4 sm:$0xff]  }
 0xc51   : > { %3682 = vmatprep.subr.bf16.mxu1 %v5696_v48  ;;  %8171 = vst [vmem:[#allocation82_spill] sm:$0xff] %v7308_v46  ;;  %v7311_v48 = vld [vmem:[#allocation13 + $0x48] ss:$16 sps:$4 sm:$0xff]  }
 0xc52   : > { %5171 = vmatmul.mubr.bf16.vlgmr.msra.gmra.mrb[24].mxu0 %v2725_v36  ;;  %8172 = vst [vmem:[#allocation83_spill] sm:$0xff] %v7311_v48  ;;  %v7314_v36 = vld [vmem:[#allocation13 + $0x6c] ss:$16 sps:$4 sm:$0xff]  }
 0xc53   : > { %3563 = vmatpush1.bf16.msra.mxu0 %v7298_v10  ;;  %3594 = vmatprep.mubr.bf16.mxu0 %v8071_v11  ;;  %8173 = vst [vmem:[#allocation84_spill] sm:$0xff] %v7314_v36  ;;  %v7317_v10 = vld [vmem:[#allocation13 + $0x68] ss:$16 sps:$4 sm:$0xff]  }
 0xc54   : > { %3564 = vmatprep.subr.bf16.mxu0 %v7302_v12  ;;  %8174 = vst [vmem:[#allocation85_spill] sm:$0xff] %v7317_v10  ;;  %v7320_v12 = vld [vmem:[#allocation13 + $0x8c] ss:$16 sps:$4 sm:$0xff]  }
 0xc55   : > { %8175 = vst [vmem:[#allocation86_spill] sm:$0xff] %v7320_v12 }
 0xc57   : > { %3565 = vmatpush1.bf16.msra.mxu0 %v7305_v39  ;;  %v7323_v39 = vld [vmem:[#allocation13 + $0x88] ss:$16 sps:$4 sm:$0xff]  }
 0xc58   : > { %3566 = vmatprep.subr.bf16.mxu0 %v7308_v46  ;;  %8176 = vst [vmem:[#allocation87_spill] sm:$0xff] %v7323_v39  ;;  %v7326_v46 = vld [vmem:[#allocation13 + $0xac] ss:$16 sps:$4 sm:$0xff]  }
 0xc59   : > { %8177 = vst [vmem:[#allocation88_spill] sm:$0xff] %v7326_v46 }
 0xc5b   : > { %3567 = vmatpush1.bf16.msra.mxu0 %v7311_v48  ;;  %v7329_v48 = vld [vmem:[#allocation13 + $0xa8] ss:$16 sps:$4 sm:$0xff]  }
 0xc5c   : > { %3568 = vmatprep.subr.bf16.mxu0 %v7314_v36  ;;  %8178 = vst [vmem:[#allocation89_spill] sm:$0xff] %v7329_v48  ;;  %v7332_v36 = vld [vmem:[#allocation13 + $0xcc] ss:$16 sps:$4 sm:$0xff]  }
 0xc5d   : > { %8179 = vst [vmem:[#allocation90_spill] sm:$0xff] %v7332_v36 }
 0xc5f   : > { %3569 = vmatpush1.bf16.msra.mxu0 %v7317_v10  ;;  %v7335_v10 = vld [vmem:[#allocation13 + $0xc8] ss:$16 sps:$4 sm:$0xff]  }
 0xc60   : > { %3570 = vmatprep.subr.bf16.mxu0 %v7320_v12  ;;  %8180 = vst [vmem:[#allocation91_spill] sm:$0xff] %v7335_v10  ;;  %v7338_v12 = vld [vmem:[#allocation13 + $0xec] ss:$16 sps:$4 sm:$0xff]  }
 0xc61   : > { %8181 = vst [vmem:[#allocation92_spill] sm:$0xff] %v7338_v12 }
 0xc63   : > { %3571 = vmatpush1.bf16.msra.mxu0 %v7323_v39  ;;  %v7341_v39 = vld [vmem:[#allocation13 + $0xe8] ss:$16 sps:$4 sm:$0xff]  }
 0xc64   : > { %3572 = vmatprep.subr.bf16.mxu0 %v7326_v46  ;;  %8182 = vst [vmem:[#allocation93_spill] sm:$0xff] %v7341_v39  ;;  %v5712_v46 = vld [vmem:[#allocation12 + $0xc] ss:$20 sps:$4 sm:$0xff]  }
 0xc67   : > { %3573 = vmatpush1.bf16.msra.mxu0 %v7329_v48 }
 0xc68   : > { %3574 = vmatprep.subr.bf16.mxu0 %v7332_v36 }
 0xc6b   : > { %3575 = vmatpush1.bf16.msra.mxu0 %v7335_v10 }
 0xc6c   : > { %3576 = vmatprep.subr.bf16.mxu0 %v7338_v12 }
 0xc6f   : > { %3577 = vmatpush1.bf16.msra.mxu0 %v7341_v39 }
 0xc70   : > { %3723 = vmatprep.subr.bf16.mxu0 %v5712_v46 }
 0xd05   : > { %v2810_v55 = vpop.f32.mrb[20].mxu0  ;;  %v7344_v48 = vpop.f32.mrb[20].mxu1 }
 0xd06   : > { %8183 = vst [vmem:[#allocation94_spill] sm:$0xff] %v7344_v48  ;;  %v2899_v56 = vcombine.high %v2810_v55, %v2810_v55  ;;  %v2906_v36 = vrot.slane %v2810_v55, %v8107_v2  ;;  %v7347_v60 = vpop.f32.mrb[21].mxu0  ;;  %v7349_v51 = vpop.f32.mrb[21].mxu1 }
 0xd07   : > { %8184 = vst [vmem:[#allocation95_spill] sm:$0xff] %v7347_v60  ;;  %8185 = vst [vmem:[#allocation96_spill] sm:$0xff] %v7349_v51  ;;  %v2814_v10 = vpop.f32.mrb[22].mxu0  ;;  %v2855_v19 = vpop.f32.mrb[22].mxu1 }
 0xd08   : > { %v2913_v12 = vrot.slane %v2899_v56, %v8107_v2  ;;  %v2914_v54 = vcombine.high %v2906_v36, %v2906_v36  ;;  %v2922_v53 = vrot.slane %v2906_v36, %v8107_v2  ;;  %v2815_v39 = vpop.f32.mrb[23].mxu0  ;;  %v2856_v25 = vpop.f32.mrb[23].mxu1 }
 0xd09   : > { %v5713_v39 = vld [vmem:[#allocation7] sm:$0xff] }
 0xd0a   : > { %v2915_v46 = vcombine.high %v2913_v12, %v2913_v12  ;;  %v2929_v59 = vrot.slane %v2913_v12, %v8107_v2  ;;  %v2936_v1 = vrot.slane %v2914_v54, %v8107_v2  ;;  %v2944_v62 = vcombine.high %v2922_v53, %v2922_v53 }
 0xd0b   : > { %v2959_v55 = vrot.slane %v2922_v53, %v6404_v14  ;;  %v5715_v53 = vld [vmem:[#allocation7 + $0x10] sm:$0xff] }
 0xd0c   : > { %v2943_v0 = vrot.slane %v2915_v46, %v8107_v2  ;;  %v2946_v49 = vcombine.high %v2936_v1, %v2936_v1  ;;  %v2963_v19 = vrot.slane %v2936_v1, %v6404_v14  ;;  %v2945_v10 = vcombine.high %v2929_v59, %v2929_v59  ;;  %v5716_v46 = vld [vmem:[#allocation7 + $0x18] sm:$0xff] }
 0xd0d   : > { %v2967_v56 = vrot.slane %v2944_v62, %v6404_v14  ;;  %v2975_v36 = vrot.slane %v2929_v59, %v6404_v14  ;;  %v2996_v25 = vadd.f32 %v5713_v39, %v2959_v55  ;;  %v5718_v55 = vld [vmem:[#allocation7 + $0x28] sm:$0xff] }
 0xd0e   : > { %v2947_v38 = vcombine.high %v2943_v0, %v2943_v0  ;;  %v2971_v12 = vrot.slane %v2946_v49, %v6404_v14  ;;  %v2979_v54 = vrot.slane %v2943_v0, %v6404_v14  ;;  %v2997_v42 = vadd.f32 %v5714_v8, %v2963_v19  ;;  %v5719_v49 = vld [vmem:[#allocation7 + $0x30] sm:$0xff]  ;;  %v5720_v8 = vld [vmem:[#allocation7 + $0x38] sm:$0xff] }
 0xd0f   : > { %v2998_v27 = vadd.f32 %v5715_v53, %v2967_v56  ;;  %5524 = vtanh.f32 %v2996_v25  ;;  %v2983_v1 = vrot.slane %v2945_v10, %v6404_v14  ;;  %v3000_v62 = vadd.f32 %v5717_v4, %v2975_v36 }
 0xd10   : > { %v2999_v2 = vadd.f32 %v5716_v46, %v2971_v12  ;;  %5526 = vtanh.f32 %v2997_v42  ;;  %v2987_v59 = vrot.slane %v2947_v38, %v6404_v14  ;;  %v3001_v39 = vadd.f32 %v5718_v55, %v2979_v54 }
 0xd11   : > { %5528 = vtanh.f32 %v2998_v27  ;;  %v3002_v0 = vadd.f32 %v5719_v49, %v2983_v1  ;;  %v7368_v27 = vld [vmem:[%s7859_s8] ss:$0 sm:$0xff] }
 0xd12   : > { %5530 = vtanh.f32 %v2999_v2  ;;  %v3003_v19 = vadd.f32 %v5720_v8, %v2987_v59  ;;  %8186 = vst [vmem:[#allocation97_spill] sm:$0xff] %v7368_v27  ;;  %v3044_v8 = vpop.permute.xlu1 %3043 }
 0xd13   : > { %5532 = vtanh.f32 %v3000_v62 }
 0xd14   : > { %5534 = vtanh.f32 %v3001_v39 }
 0xd15   : > { %5536 = vtanh.f32 %v3002_v0 }
 0xd16   : > { %5538 = vtanh.f32 %v3003_v19  ;;  %v3058_v19 = vpop.permute.xlu1 %3057 }
 0xd19   : > { %v5525_v56 = vpop.eup %5524 }
 0xd1a   : > { %v3012_v25 = vmul.f32 %v6934_v57, %v5525_v56  ;;  %v5527_v10 = vpop.eup %5526  ;;  %v3065_v56 = vpop.permute.xlu1 %3064 }
 0xd1b   : > { %v5529_v4 = vpop.eup %5528  ;;  %v3013_v2 = vmul.f32 %v7368_v27, %v5527_v10 }
 0xd1c   : > { %3020 = vadd.xlane.f32.xlu1 %v3012_v25  ;;  %v5531_v42 = vpop.eup %5530  ;;  %v3014_v38 = vmul.f32 %v7368_v27, %v5529_v4  ;;  %v3051_v25 = vpop.permute.xlu0 %3050 }
 0xd1d   : > { %3022 = vadd.xlane.f32.xlu0 %v3013_v2  ;;  %v5533_v36 = vpop.eup %5532  ;;  %v3015_v12 = vmul.f32 %v7368_v27, %v5531_v42 }
 0xd1e   : > { %v5535_v57 = vpop.eup %5534  ;;  %v3016_v54 = vmul.f32 %v7368_v27, %v5533_v36  ;;  %v3072_v10 = vpop.permute.xlu1 %3071 }
 0xd1f   : > { %v5537_v53 = vpop.eup %5536  ;;  %v3017_v46 = vmul.f32 %v7368_v27, %v5535_v57 }
 0xd20   : > { %3024 = vadd.xlane.f32.xlu1 %v3014_v38  ;;  %v5539_v1 = vpop.eup %5538  ;;  %v3018_v55 = vmul.f32 %v7368_v27, %v5537_v53  ;;  %v3079_v4 = vpop.permute.xlu0 %3078 }
 0xd21   : > { %3026 = vadd.xlane.f32.xlu0 %v3015_v12  ;;  %v3019_v0 = vmul.f32 %v7368_v27, %v5539_v1 }
 0xd24   : > { %3028 = vadd.xlane.f32.xlu1 %v3016_v54 }
 0xd25   : > { %v7375_v62 = vpop.f32.mrb[24].mxu0  ;;  %3030 = vadd.xlane.f32.xlu0 %v3017_v46 }
 0xd26   : > { %8187 = vst [vmem:[#allocation98_spill] sm:$0xff] %v7375_v62  ;;  %v5172_v59 = vpop.f32.mrb[25].mxu0 }
 0xd27   : > { %v2895_v39 = vpop.f32.mrb[26].mxu0 }
 0xd28   : > { %3032 = vadd.xlane.f32.xlu1 %v3018_v55  ;;  %v5173_v49 = vpop.f32.mrb[27].mxu0 }
 0xd29   : > { %3034 = vadd.xlane.f32.xlu0 %v3019_v0 }
 0xd39   : > { %3085 = vbcast.lane.b32.xlu1 %v6948_v32, 256 }
 0xd3f   : > { %3092 = vbcast.lane.b32.xlu0 %v6953_v31, 256 }
 0xda9   : > { %v3021_v2 = vpop.xlane.xlu1 %3020 }
 0xdaa   : > { %v3102_v42 = vadd.f32 %v3044_v8, %v3021_v2  ;;  %v3023_v38 = vpop.xlane.xlu0 %3022 }
 0xdab   : > { %v3103_v36 = vadd.f32 %v3051_v25, %v3023_v38 }
 0xdac   : > { %3119 = vperm.xlu1 %5319, %v3102_v42  }
 0xdad   : > { %v3025_v12 = vpop.xlane.xlu1 %3024  ;;  %3122 = vperm.xlu0 %5318, %v3103_v36  }
 0xdae   : > { %v3104_v57 = vadd.f32 %v3058_v19, %v3025_v12  ;;  %v3027_v54 = vpop.xlane.xlu0 %3026 }
 0xdaf   : > { %v3105_v53 = vadd.f32 %v3065_v56, %v3027_v54 }
 0xdb0   : > { %3125 = vperm.xlu1 %5319, %v3104_v57  }
 0xdb1   : > { %v3029_v32 = vpop.xlane.xlu1 %3028  ;;  %3128 = vperm.xlu0 %5318, %v3105_v53  }
 0xdb2   : > { %v3106_v46 = vadd.f32 %v3072_v10, %v3029_v32  ;;  %v3031_v31 = vpop.xlane.xlu0 %3030 }
 0xdb3   : > { %v3107_v1 = vadd.f32 %v3079_v4, %v3031_v31 }
 0xdb4   : > { %3131 = vperm.xlu1 %5319, %v3106_v46  }
 0xdb5   : > { %v3033_v59 = vpop.xlane.xlu1 %3032  ;;  %3134 = vperm.xlu0 %5318, %v3107_v1  }
 0xdb6   : > { %v3035_v55 = vpop.xlane.xlu0 %3034 }
 0xdb9   : > { %v3086_v39 = vpop.permute.xlu1 %3085 }
 0xdba   : > { %v3108_v49 = vadd.f32 %v3086_v39, %v3033_v59  ;;  %v3093_v0 = vpop.permute.xlu0 %3092 }
 0xdbb   : > { %v3109_v8 = vadd.f32 %v3093_v0, %v3035_v55 }
 0xdbc   : > { %3137 = vperm.xlu1 %5319, %v3108_v49  }
 0xdbd   : > { %3140 = vperm.xlu0 %5318, %v3109_v8  }
 0xe2b   : > { %v3120_v19 = vpop.permute.xlu1 %3119 }
 0xe2c   : > { %v3123_v25 = vpop.permute.xlu0 %3122  ;;  %v3145_v2 = vrot.slane %v3120_v19, %v8110_v34 }
 0xe2d   : > { %v3149_v56 = vrot.slane %v3123_v25, %v8110_v34 }
 0xe2f   : > { %v3126_v10 = vpop.permute.xlu1 %3125  ;;  %v3174_v4 = vsel %vm1197_vm1, %v3149_v56, %v3145_v2 }
 0xe30   : > { %v3153_v38 = vrot.slane %v3126_v10, %v8110_v34  ;;  %v3129_v12 = vpop.permute.xlu0 %3128 }
 0xe31   : > { %v3157_v54 = vrot.slane %v3129_v12, %v8110_v34 }
 0xe32   : > { %v3175_v31 = vsel %vm1199_vm2, %v3153_v38, %v3174_v4 }
 0xe33   : > { %v3132_v32 = vpop.permute.xlu1 %3131  ;;  %v3176_v39 = vsel %vm1201_vm3, %v3157_v54, %v3175_v31 }
 0xe34   : > { %v3161_v59 = vrot.slane %v3132_v32, %v8110_v34  ;;  %v3135_v55 = vpop.permute.xlu0 %3134 }
 0xe35   : > { %v3165_v0 = vrot.slane %v3135_v55, %v8110_v34 }
 0xe36   : > { %v3177_v19 = vsel %vm1203_vm4, %v3161_v59, %v3176_v39 }
 0xe37   : > { %v3178_v56 = vsel %vm1205_vm5, %v3165_v0, %v3177_v19 }
 0xe3b   : > { %v3138_v25 = vpop.permute.xlu1 %3137 }
 0xe3c   : > { %v3169_v10 = vrot.slane %v3138_v25, %v8110_v34  ;;  %v3141_v2 = vpop.permute.xlu0 %3140 }
 0xe3d   : > { %v3173_v12 = vrot.slane %v3141_v2, %v8110_v34 }
 0xe3e   : > { %v3179_v27 = vsel %vm1207_vm6, %v3169_v10, %v3178_v56 }
 0xe3f   : > { %v3180_v38 = vsel %vm1209_vm7, %v3173_v12, %v3179_v27 }
 0xe40   : > { %v3182_v4 = vsel %vm1212_vm8, %v3180_v38, -inf }
 0xe41   : > { %3183 = vmax.xlane.f32.xlu1 %v3182_v4 }
 0xece   : > { %v3184_v54 = vpop.xlane.xlu1 %3183 }
 0xecf   : > { %v3189_v32 = vrot.slane %v3184_v54, %v6404_v14  ;;  %v3193_v31 = vrot.slane %v3184_v54, %v6401_v13  ;;  %v3197_v59 = vrot.slane %v3184_v54, %v6407_v17  ;;  %v3201_v19 = vrot.slane %v3184_v54, %v6422_v23 }
 0xed0   : > { %v3205_v27 = vrot.slane %v3184_v54, %v6410_v18  ;;  %v3209_v12 = vrot.slane %v3184_v54, %v6429_v28 }
 0xed1   : > { %v3226_v55 = vsub.f32 %v3102_v42, %v3189_v32  ;;  %v3227_v39 = vsub.f32 %v3103_v36, %v3193_v31  ;;  %v3228_v25 = vsub.f32 %v3104_v57, %v3197_v59  ;;  %v3229_v56 = vsub.f32 %v3105_v53, %v3201_v19 }
 0xed2   : > { %v3230_v38 = vsub.f32 %v3106_v46, %v3205_v27  ;;  %v3213_v42 = vrot.slane %v3184_v54, %v8108_v40  ;;  %v3231_v36 = vsub.f32 %v3107_v1, %v3209_v12  ;;  %v3217_v53 = vrot.slane %v3184_v54, %v8109_v45 }
 0xed3   : > { %v3234_v0 = vmul.f32 1.442695, %v3226_v55  ;;  %v3236_v10 = vmul.f32 1.442695, %v3227_v39  ;;  %v3238_v2 = vmul.f32 1.442695, %v3228_v25 }
 0xed4   : > { %v3240_v4 = vmul.f32 1.442695, %v3229_v56  ;;  %v3242_v57 = vmul.f32 1.442695, %v3230_v38  ;;  %v3232_v31 = vsub.f32 %v3108_v49, %v3213_v42  ;;  %v3244_v46 = vmul.f32 1.442695, %v3231_v36 }
 0xed5   : > { %5540 = vpow2.f32 %v3234_v0  ;;  %v3233_v55 = vsub.f32 %v3109_v8, %v3217_v53 }
 0xed6   : > { %5542 = vpow2.f32 %v3236_v10  ;;  %v3246_v39 = vmul.f32 1.442695, %v3232_v31 }
 0xed7   : > { %5544 = vpow2.f32 %v3238_v2  ;;  %v3248_v1 = vmul.f32 1.442695, %v3233_v55 }
 0xed8   : > { %5546 = vpow2.f32 %v3240_v4 }
 0xed9   : > { %5548 = vpow2.f32 %v3242_v57 }
 0xeda   : > { %5550 = vpow2.f32 %v3244_v46 }
 0xedb   : > { %5552 = vpow2.f32 %v3246_v39 }
 0xedc   : > { %5554 = vpow2.f32 %v3248_v1 }
 0xedf   : > { %v7403_v21 = vpop.eup %5540 }
 0xee0   : > { %3259 = vperm.xlu0 %5318, %v7403_v21   ;;  %v7407_v32 = vpop.eup %5542 }
 0xee1   : > { %v5545_v59 = vpop.eup %5544 }
 0xee2   : > { %v5547_v0 = vpop.eup %5546 }
 0xee3   : > { %v5549_v19 = vpop.eup %5548 }
 0xee4   : > { %3262 = vperm.xlu0 %5318, %v7407_v32   ;;  %v5551_v25 = vpop.eup %5550 }
 0xee5   : > { %v5553_v10 = vpop.eup %5552 }
 0xee6   : > { %v5555_v54 = vpop.eup %5554 }
 0xee8   : > { %3265 = vperm.xlu0 %5318, %v5545_v59  }
 0xeec   : > { %3268 = vperm.xlu0 %5318, %v5547_v0  }
 0xef0   : > { %3271 = vperm.xlu0 %5318, %v5549_v19  }
 0xef4   : > { %3274 = vperm.xlu0 %5318, %v5551_v25  }
 0xef8   : > { %3277 = vperm.xlu0 %5318, %v5553_v10  }
 0xefc   : > { %3280 = vperm.xlu0 %5318, %v5555_v54  }
 0xf5f   : > { %v3260_v49 = vpop.permute.xlu0 %3259 }
 0xf60   : > { %v3285_v42 = vrot.slane %v3260_v49, %v8110_v34 }
 0xf63   : > { %v3263_v27 = vpop.permute.xlu0 %3262 }
 0xf64   : > { %v3289_v38 = vrot.slane %v3263_v27, %v8110_v34 }
 0xf66   : > { %v3314_v31 = vsel %vm1197_vm1, %v3289_v38, %v3285_v42  ;;  %v3665_v42 = vstv %s3664_s30  ;;  %s7996_s30 = sshll.u32 %s6140_s23, 8 }
 0xf67   : > { %v3266_v56 = vpop.permute.xlu0 %3265  ;;  %s7730_s26 = scalar_lea.hbm %s8261_s25, %s7996_s30 }
 0xf68   : > { %v3293_v4 = vrot.slane %v3266_v56, %v8110_v34 }
 0xf6a   : > { %v3315_v55 = vsel %vm1199_vm2, %v3293_v4, %v3314_v31 }
 0xf6b   : > { %v3269_v2 = vpop.permute.xlu0 %3268 }
 0xf6c   : > { %v3297_v36 = vrot.slane %v3269_v2, %v8110_v34 }
 0xf6e   : > { %v3316_v1 = vsel %vm1201_vm3, %v3297_v36, %v3315_v55 }
 0xf6f   : > { %v3272_v8 = vpop.permute.xlu0 %3271 }
 0xf70   : > { %v3301_v57 = vrot.slane %v3272_v8, %v8110_v34 }
 0xf72   : > { %v3317_v27 = vsel %vm1203_vm4, %v3301_v57, %v3316_v1 }
 0xf73   : > { %v3275_v12 = vpop.permute.xlu0 %3274 }
 0xf74   : > { %v3305_v46 = vrot.slane %v3275_v12, %v8110_v34 }
 0xf76   : > { %v3318_v49 = vsel %vm1205_vm5, %v3305_v46, %v3317_v27 }
 0xf77   : > { %v3278_v53 = vpop.permute.xlu0 %3277 }
 0xf78   : > { %v3309_v39 = vrot.slane %v3278_v53, %v8110_v34 }
 0xf7a   : > { %v3319_v8 = vsel %vm1207_vm6, %v3309_v39, %v3318_v49 }
 0xf7b   : > { %v3281_v56 = vpop.permute.xlu0 %3280 }
 0xf7c   : > { %v3313_v2 = vrot.slane %v3281_v56, %v8110_v34 }
 0xf7e   : > { %v3320_v16 = vsel %vm1209_vm7, %v3313_v2, %v3319_v8 }
 0xf7f   : > { %v3322_v38 = vsel %vm1212_vm8, %v3320_v16, 0.0 }
 0xf80   : > { %3323 = vadd.xlane.f32.xlu0 %v3322_v38 }
0x100d   : > { %v3324_v12 = vpop.xlane.xlu0 %3323 }
0x100e   : > { %5556 = vrcp.f32 %v3324_v12 }
0x1018   : > { %v5557_v4 = vpop.eup %5556 }
0x1019   : > { %v3346_v36 = vrot.slane %v5557_v4, %v6410_v18  ;;  %v3330_v57 = vrot.slane %v5557_v4, %v6404_v14  ;;  %v3334_v53 = vrot.slane %v5557_v4, %v6401_v13  ;;  %v3338_v31 = vrot.slane %v5557_v4, %v6407_v17 }
0x101a   : > { %v3342_v46 = vrot.slane %v5557_v4, %v6422_v23  ;;  %v3350_v16 = vrot.slane %v5557_v4, %v6429_v28  ;;  %v3354_v55 = vrot.slane %v5557_v4, %v8108_v40  ;;  %v3358_v39 = vrot.slane %v5557_v4, %v8109_v45 }
0x101b   : > { %v3371_v1 = vmul.f32 %v5549_v19, %v3346_v36  ;;  %v3367_v27 = vmul.f32 %v7403_v21, %v3330_v57  ;;  %v3368_v56 = vmul.f32 %v7407_v32, %v3334_v53  ;;  %v3369_v49 = vmul.f32 %v5545_v59, %v3338_v31  ;;  %v8188_v53 = vld [vmem:[#allocation50_spill] sm:$0xff] }
0x101c   : > { %v3370_v2 = vmul.f32 %v5547_v0, %v3342_v46  ;;  %v3372_v8 = vmul.f32 %v5551_v25, %v3350_v16  ;;  %v3373_v38 = vmul.f32 %v5553_v10, %v3354_v55  ;;  %v3374_v12 = vmul.f32 %v5555_v54, %v3358_v39 }
0x101d   : > { %3405 = vperm.xlu0 %5318, %v3371_v1   ;;  %v3670_v34 = vmul.f32 %v3665_v42, %v3371_v1  ;;  %3385 = vperm.xlu1 %5319, %v3367_v27   ;;  %v3666_v62 = vmul.f32 %v3665_v42, %v3367_v27  ;;  %v3667_v48 = vmul.f32 %v3665_v42, %v3368_v56 }
0x101e   : > { %v3668_v51 = vmul.f32 %v3665_v42, %v3369_v49  ;;  %v3669_v60 = vmul.f32 %v3665_v42, %v3370_v2  ;;  %v3671_v40 = vmul.f32 %v3665_v42, %v3372_v8  ;;  %v3672_v18 = vmul.f32 %v3665_v42, %v3373_v38 }
0x101f   : > { %v3673_v4 = vmul.f32 %v3665_v42, %v3374_v12  ;;  %v7439_v19 = vadd.f32 %v3666_v62, %v7055_v50  ;;  %v7442_v21 = vadd.f32 %v3667_v48, %v7057_v3  ;;  %v7445_v32 = vadd.f32 %v3670_v34, %v7053_v26 }
0x1020   : > { %v7448_v59 = vadd.f32 %v3669_v60, %v7061_v9  ;;  %v7451_v0 = vadd.f32 %v3671_v40, %v7063_v5  ;;  %v7454_v25 = vadd.f32 %v3668_v51, %v7059_v37  ;;  %v7457_v10 = vadd.f32 %v3672_v18, %v7065_v43 }
0x1021   : > { %3390 = vperm.xlu1 %5319, %v3368_v56   ;;  %v7460_v50 = vadd.f32 %v3673_v4, %v7067_v24  ;;  %v8189_v56 = vld [vmem:[#allocation52_spill] sm:$0xff] }
0x1025   : > { %3395 = vperm.xlu1 %5319, %v3369_v49  }
0x1029   : > { %3400 = vperm.xlu1 %5319, %v3370_v2  }
0x102d   : > { %3410 = vperm.xlu1 %5319, %v3372_v8  }
0x1031   : > { %3415 = vperm.xlu1 %5319, %v3373_v38  }
0x1035   : > { %3420 = vperm.xlu1 %5319, %v3374_v12  }
0x109c   : > { %v3386_v34 = vpop.permute.xlu1 %3385  ;;  %v3406_v40 = vpop.permute.xlu0 %3405 }
0x109d   : > { %v3423_v26 = vmul.f32 %v3386_v34, %v7075_v20  ;;  %v3427_v18 = vmul.f32 %v3406_v40, %v7080_v29 }
0x109f   : > { %v3431_v3 = vrot.slane %v3423_v26, 4  ;;  %v3455_v48 = vrot.slane %v3427_v18, 4 }
0x10a0   : > { %v3391_v9 = vpop.permute.xlu1 %3390 }
0x10a1   : > { %v3424_v37 = vmul.f32 %v3391_v9, %v7078_v52  ;;  %v3432_v43 = vadd.f32 %v3431_v3, %v3423_v26  ;;  %v3456_v20 = vadd.f32 %v3455_v48, %v3427_v18  ;;  %v8190_v48 = vld [vmem:[#allocation32_spill] sm:$0xff] }
0x10a3   : > { %v3437_v5 = vrot.slane %v3424_v37, 4  ;;  %v3433_v42 = vrot.slane %v3432_v43, 2  ;;  %v3457_v1 = vrot.slane %v3456_v20, 2 }
0x10a4   : > { %v3396_v51 = vpop.permute.xlu1 %3395 }
0x10a5   : > { %v3438_v24 = vadd.f32 %v3437_v5, %v3424_v37  ;;  %v3425_v60 = vmul.f32 %v3396_v51, %v7084_v63  ;;  %v3434_v52 = vadd.f32 %v3433_v42, %v3432_v43  ;;  %v3458_v26 = vadd.f32 %v3457_v1, %v3456_v20 }
0x10a7   : > { %v3439_v62 = vrot.slane %v3438_v24, 2  ;;  %v3443_v54 = vrot.slane %v3425_v60, 4  ;;  %v3435_v2 = vrot.slane %v3434_v52, 1 }
0x10a8   : > { %v3401_v36 = vpop.permute.xlu1 %3400 }
0x10a9   : > { %v3444_v57 = vadd.f32 %v3443_v54, %v3425_v60  ;;  %v3426_v31 = vmul.f32 %v3401_v36, %v8188_v53  ;;  %v3440_v46 = vadd.f32 %v3439_v62, %v3438_v24  ;;  %v3436_v18 = vadd.f32 %v3435_v2, %v3434_v52 }
0x10aa   : > { %v3459_v54 = vrot.slane %v3458_v26, 1 }
0x10ab   : > { %v3445_v16 = vrot.slane %v3444_v57, 2  ;;  %v3449_v55 = vrot.slane %v3426_v31, 4  ;;  %v3441_v63 = vrot.slane %v3440_v46, 1 }
0x10ac   : > { %v3411_v29 = vpop.permute.xlu1 %3410  ;;  %v3460_v52 = vadd.f32 %v3459_v54, %v3458_v26 }
0x10ad   : > { %v3446_v39 = vadd.f32 %v3445_v16, %v3444_v57  ;;  %v3450_v27 = vadd.f32 %v3449_v55, %v3426_v31  ;;  %v3428_v49 = vmul.f32 %v3411_v29, %v8189_v56  ;;  %v3442_v9 = vadd.f32 %v3441_v63, %v3440_v46 }
0x10af   : > { %v3447_v8 = vrot.slane %v3446_v39, 1  ;;  %v3451_v38 = vrot.slane %v3450_v27, 2  ;;  %v3461_v12 = vrot.slane %v3428_v49, 4  ;;  %v3480_v57 = vpack.c.bf16 %v3442_v9, %v3442_v9 }
0x10b0   : > { %v3416_v4 = vpop.permute.xlu1 %3415 }
0x10b1   : > { %v3429_v34 = vmul.f32 %v3416_v4, %v7093_v61  ;;  %v3452_v40 = vadd.f32 %v3451_v38, %v3450_v27  ;;  %v3462_v3 = vadd.f32 %v3461_v12, %v3428_v49  ;;  %v3448_v5 = vadd.f32 %v3447_v8, %v3446_v39 }
0x10b2   : > { %v3479_v61 = vpack.c.bf16 %v3436_v18, %v3436_v18  ;;  %v3505_v1 = vunpack.c.l.b16 %v3480_v57  ;;  %v3483_v4 = vpack.c.bf16 %v3460_v52, %v3460_v52  ;;  %v8202_v57 = vld [vmem:[#allocation42_spill] sm:$0xff]  ;;  %v8211_v52 = vld [vmem:[#allocation53_spill] sm:$0xff] }
0x10b3   : > { %v3467_v37 = vrot.slane %v3429_v34, 4  ;;  %v3453_v43 = vrot.slane %v3452_v40, 1  ;;  %v3463_v51 = vrot.slane %v3462_v3, 2  ;;  %v3481_v20 = vpack.c.bf16 %v3448_v5, %v3448_v5 }
0x10b4   : > { %v3421_v24 = vpop.permute.xlu1 %3420  ;;  %v3504_v49 = vunpack.c.l.b16 %v3479_v61  ;;  %v3508_v5 = vunpack.c.l.b16 %v3483_v4  ;;  %v8205_v61 = vld [vmem:[#allocation72_spill] sm:$0xff]  ;;  %v4999_v4 = vld [vmem:[%s6365_s29 + $0x48] sm:$0xff] }
0x10b5   : > { %v3468_v60 = vadd.f32 %v3467_v37, %v3429_v34  ;;  %v3430_v62 = vmul.f32 %v3421_v24, %v8190_v48  ;;  %v3454_v42 = vadd.f32 %v3453_v43, %v3452_v40  ;;  %v3464_v36 = vadd.f32 %v3463_v51, %v3462_v3 }
0x10b6   : > { %v3506_v63 = vunpack.c.l.b16 %v3481_v20  ;;  %v3512_v34 = vsel %vm1197_vm1, %v3505_v1, %v3504_v49  ;;  %v8206_v20 = vld [vmem:[#allocation45_spill] sm:$0xff] }
0x10b7   : > { %v3469_v53 = vrot.slane %v3468_v60, 2  ;;  %v3473_v31 = vrot.slane %v3430_v62, 4  ;;  %v3465_v16 = vrot.slane %v3464_v36, 1  ;;  %v3482_v55 = vpack.c.bf16 %v3454_v42, %v3454_v42 }
0x10b8   : > { %v3513_v9 = vsel %vm1199_vm2, %v3506_v63, %v3512_v34  ;;  %v5001_v34 = vld [vmem:[%s6365_s29 + $0x58] sm:$0xff] }
0x10b9   : > { %v3470_v46 = vadd.f32 %v3469_v53, %v3468_v60  ;;  %v3474_v29 = vadd.f32 %v3473_v31, %v3430_v62  ;;  %v3466_v39 = vadd.f32 %v3465_v16, %v3464_v36  ;;  %v3507_v2 = vunpack.c.l.b16 %v3482_v55  ;;  %v8195_v36 = vld [vmem:[#allocation60_spill] sm:$0xff]  ;;  %v8204_v31 = vld [vmem:[#allocation70_spill] sm:$0xff]  ;;  %v8207_v16 = vld [vmem:[#allocation47_spill] sm:$0xff] }
0x10ba   : > { %v8203_v53 = vld [vmem:[#allocation44_spill] sm:$0xff] }
0x10bb   : > { %v3471_v27 = vrot.slane %v3470_v46, 1  ;;  %v3475_v56 = vrot.slane %v3474_v29, 2  ;;  %v3484_v8 = vpack.c.bf16 %v3466_v39, %v3466_v39  ;;  %v3514_v26 = vsel %vm1201_vm3, %v3507_v2, %v3513_v9  ;;  %v8208_v55 = vld [vmem:[#allocation48_spill] sm:$0xff]  ;;  %v7515_v39 = vld [vmem:[%s8024_s3] sm:$0xff] }
0x10bc   : > { %v3515_v24 = vsel %vm1203_vm4, %v3508_v5, %v3514_v26  ;;  %v3947_v1 = vrot.slane %v7515_v39, %v6404_v14  ;;  %v3982_v49 = vrot.slane %v7515_v39, %v6429_v28  ;;  %v3968_v63 = vrot.slane %v7515_v39, %v6422_v23  ;;  %v8212_v2 = vld [vmem:[#allocation26_spill] sm:$0xff]  ;;  %v8214_v9 = vld [vmem:[#allocation96_spill] sm:$0xff] }
0x10bd   : > { %v3472_v38 = vadd.f32 %v3471_v27, %v3470_v46  ;;  %v3476_v12 = vadd.f32 %v3475_v56, %v3474_v29  ;;  %v3509_v37 = vunpack.c.l.b16 %v3484_v8  ;;  %v8209_v46 = vld [vmem:[#allocation49_spill] sm:$0xff]  ;;  %v8210_v29 = vld [vmem:[#allocation51_spill] sm:$0xff]  ;;  %v3954_v27 = vrot.slane %v7515_v39, %v6401_v13  ;;  %v8216_v5 = vld [vmem:[#allocation98_spill] sm:$0xff] }
0x10be   : > { %3949 = vbcast.lane.b32.xlu1 %v3947_v1, 256  ;;  %v3961_v56 = vrot.slane %v7515_v39, %v6407_v17  ;;  %v3975_v8 = vrot.slane %v7515_v39, %v8212_v2 }
0x10bf   : > { %v3485_v40 = vpack.c.bf16 %v3472_v38, %v3472_v38  ;;  %v3477_v3 = vrot.slane %v3476_v12, 1  ;;  %v3516_v60 = vsel %vm1205_vm5, %v3509_v37, %v3515_v24  ;;  %3956 = vbcast.lane.b32.xlu0 %v3954_v27, 256  ;;  %v4998_v38 = vld [vmem:[%s6365_s29 + $0x40] sm:$0xff]  ;;  %v8215_v37 = vld [vmem:[#allocation94_spill] sm:$0xff] }
0x10c1   : > { %v3478_v18 = vadd.f32 %v3477_v3, %v3476_v12  ;;  %v3510_v43 = vunpack.c.l.b16 %v3485_v40  ;;  %v5000_v12 = vld [vmem:[%s6365_s29 + $0x50] sm:$0xff]  ;;  %v8213_v40 = vld [vmem:[#allocation95_spill] sm:$0xff] }
0x10c2   : > { %3963 = vbcast.lane.b32.xlu1 %v3961_v56, 256  ;;  %v3492_v3 = vadd.f32 %v4998_v38, %v8213_v40  ;;  %v3494_v26 = vadd.f32 %v5000_v12, %v8214_v9  ;;  %v8220_v38 = vld [vmem:[#allocation61_spill] sm:$0xff]  ;;  %v8221_v12 = vld [vmem:[#allocation63_spill] sm:$0xff] }
0x10c3   : > { %v3486_v51 = vpack.c.bf16 %v3478_v18, %v3478_v18  ;;  %v3517_v62 = vsel %vm1207_vm6, %v3510_v43, %v3516_v60  ;;  %3984 = vbcast.lane.b32.xlu0 %v3982_v49, 256  ;;  %v3493_v18 = vadd.f32 %v4999_v4, %v8215_v37  ;;  %v3495_v43 = vadd.f32 %v5001_v34, %v8216_v5  ;;  %v8222_v4 = vld [vmem:[#allocation65_spill] sm:$0xff]  ;;  %v8223_v34 = vld [vmem:[#allocation67_spill] sm:$0xff]  ;;  %v8228_v37 = vld [vmem:[#allocation34_spill] sm:$0xff] }
0x10c4   : > { %v8224_v40 = vld [vmem:[#allocation69_spill] sm:$0xff]  ;;  %v8226_v9 = vld [vmem:[#allocation31_spill] sm:$0xff]  ;;  %v8230_v5 = vld [vmem:[#allocation36_spill] sm:$0xff] }
0x10c5   : > { %v3511_v48 = vunpack.c.l.b16 %v3486_v51 }
0x10c6   : > { %3970 = vbcast.lane.b32.xlu1 %v3968_v63, 256  ;;  %v8218_v63 = vld [vmem:[#allocation57_spill] sm:$0xff] }
0x10c7   : > { %v3518_v54 = vsel %vm1209_vm7, %v3511_v48, %v3517_v62 }
0x10c8   : > { %v3519_v42 = vpack.c.b16 %v3518_v54, %v3518_v54 }
0x10ca   : > { %3554 = vmatmul.mubr.bf16.vlgmr.msra.gmra.mrb[24].mxu1 %v3519_v42  ;;  %5014 = vst [vmem:[%s6386_s16 + $0x8] sm:$0xf] %v3519_v42  ;;  %3595 = vmatmul.mubr.bf16.vlgmr.msra.gmra.mrb[28].mxu0 %v3519_v42 }
0x10cb   : > { %3683 = vmatpush1.bf16.msra.mxu1 %v7107_v41  ;;  %3724 = vmatpush1.bf16.msra.mxu0 %v7110_v6  ;;  %v8191_v41 = vld [vmem:[#allocation54_spill] sm:$0xff]  ;;  %v8192_v6 = vld [vmem:[#allocation56_spill] sm:$0xff] }
0x10cc   : > { %3684 = vmatprep.subr.bf16.mxu1 %v7113_v30  ;;  %3725 = vmatprep.subr.bf16.mxu0 %v7116_v7  ;;  %v8193_v30 = vld [vmem:[#allocation33_spill] sm:$0xff]  ;;  %v8194_v7 = vld [vmem:[#allocation58_spill] sm:$0xff] }
0x10cd   : > { %3714 = vmatprep.mubr.bf16.mxu1 %v8071_v11  ;;  %3755 = vmatprep.mubr.bf16.mxu0 %v8071_v11 }
0x10ce   : > { %3977 = vbcast.lane.b32.xlu1 %v3975_v8, 256  ;;  %v8219_v8 = vld [vmem:[#allocation59_spill] sm:$0xff] }
0x10cf   : > { %3685 = vmatpush1.bf16.msra.mxu1 %v7121_v58  ;;  %3726 = vmatpush1.bf16.msra.mxu0 %v7124_v33  ;;  %v8196_v58 = vld [vmem:[#allocation38_spill] sm:$0xff] }
0x10d0   : > { %3686 = vmatprep.subr.bf16.mxu1 %v7127_v47  ;;  %3727 = vmatprep.subr.bf16.mxu0 %v7130_v35  ;;  %v8197_v33 = vld [vmem:[#allocation62_spill] sm:$0xff]  ;;  %v8198_v47 = vld [vmem:[#allocation64_spill] sm:$0xff] }
0x10d1   : > { %v8199_v35 = vld [vmem:[#allocation40_spill] sm:$0xff] }
0x10d3   : > { %3687 = vmatpush1.bf16.msra.mxu1 %v7133_v44  ;;  %3728 = vmatpush1.bf16.msra.mxu0 %v7136_v15  ;;  %v8200_v44 = vld [vmem:[#allocation66_spill] sm:$0xff]  ;;  %v8201_v15 = vld [vmem:[#allocation68_spill] sm:$0xff] }
0x10d4   : > { %3688 = vmatprep.subr.bf16.mxu1 %v8191_v41  ;;  %3729 = vmatprep.subr.bf16.mxu0 %v8192_v6 }
0x10d7   : > { %3689 = vmatpush1.bf16.msra.mxu1 %v8193_v30  ;;  %3730 = vmatpush1.bf16.msra.mxu0 %v8194_v7 }
0x10d8   : > { %3690 = vmatprep.subr.bf16.mxu1 %v8195_v36  ;;  %3731 = vmatprep.subr.bf16.mxu0 %v8196_v58 }
0x10db   : > { %3691 = vmatpush1.bf16.msra.mxu1 %v8197_v33  ;;  %3732 = vmatpush1.bf16.msra.mxu0 %v8198_v47 }
0x10dc   : > { %3692 = vmatprep.subr.bf16.mxu1 %v8199_v35  ;;  %3733 = vmatprep.subr.bf16.mxu0 %v8200_v44 }
0x10df   : > { %3693 = vmatpush1.bf16.msra.mxu1 %v8201_v15  ;;  %3734 = vmatpush1.bf16.msra.mxu0 %v8202_v57 }
0x10e0   : > { %3694 = vmatprep.subr.bf16.mxu1 %v8203_v53  ;;  %3735 = vmatprep.subr.bf16.mxu0 %v8204_v31 }
0x10e3   : > { %3695 = vmatpush1.bf16.msra.mxu1 %v8205_v61  ;;  %3736 = vmatpush1.bf16.msra.mxu0 %v8206_v20 }
0x10e4   : > { %3696 = vmatprep.subr.bf16.mxu1 %v8207_v16  ;;  %3737 = vmatprep.subr.bf16.mxu0 %v8208_v55 }
0x10e7   : > { %3697 = vmatpush1.bf16.msra.mxu1 %v8209_v46  ;;  %3738 = vmatpush1.bf16.msra.mxu0 %v8210_v29  ;;  %v8217_v46 = vld [vmem:[#allocation55_spill] sm:$0xff] }
0x10e8   : > { %5174 = vmatprep.subr.bf16.mxu1 %v8072_v22  ;;  %4427 = vmatprep.subr.bf16.mxu0 %v8211_v52 }
0x119d   : > { %v3555_v51 = vpop.f32.mrb[24].mxu1  ;;  %v3596_v24 = vpop.f32.mrb[28].mxu0 }
0x119e   : > { %v3603_v60 = vadd.f32 %v3555_v51, %v3492_v3  ;;  %v3605_v48 = vadd.f32 %v3596_v24, %v3494_v26  ;;  %v3557_v62 = vpop.f32.mrb[25].mxu1  ;;  %v3598_v54 = vpop.f32.mrb[29].mxu0  ;;  %v8225_v3 = vld [vmem:[#allocation71_spill] sm:$0xff]  ;;  %v8227_v26 = vld [vmem:[#allocation28_spill] sm:$0xff]  ;;  %v8233_v24 = vld [vmem:[#allocation41_spill] sm:$0xff] }
0x119f   : > { %v3604_v42 = vadd.f32 %v3557_v62, %v3493_v18  ;;  %v3606_v41 = vadd.f32 %v3598_v54, %v3495_v43  ;;  %v3559_v6 = vpop.f32.mrb[26].mxu1  ;;  %v3600_v30 = vpop.f32.mrb[30].mxu0  ;;  %v8229_v18 = vld [vmem:[#allocation35_spill] sm:$0xff]  ;;  %v8231_v43 = vld [vmem:[#allocation37_spill] sm:$0xff]  ;;  %v8237_v54 = vld [vmem:[#allocation74_spill] sm:$0xff] }
0x11a0   : > { %v5002_v7 = vmul.f32 -1.442695, %v3603_v60  ;;  %v3560_v36 = vpop.f32.mrb[27].mxu1  ;;  %v3601_v58 = vpop.f32.mrb[31].mxu0  ;;  %v8232_v51 = vld [vmem:[#allocation39_spill] sm:$0xff]  ;;  %v8236_v62 = vld [vmem:[#allocation73_spill] sm:$0xff] }
0x11a1   : > { %v5003_v33 = vmul.f32 -1.442695, %v3604_v42  ;;  %v5004_v47 = vmul.f32 -1.442695, %v3606_v41  ;;  %v8234_v60 = vld [vmem:[#allocation43_spill] sm:$0xff]  ;;  %v8239_v41 = vld [vmem:[#allocation76_spill] sm:$0xff] }
0x11a2   : > { %5558 = vpow2.f32 %v5002_v7  ;;  %v8238_v42 = vld [vmem:[#allocation75_spill] sm:$0xff]  ;;  %v8240_v6 = vld [vmem:[#allocation77_spill] sm:$0xff]  ;;  %v8241_v30 = vld [vmem:[#allocation78_spill] sm:$0xff] }
0x11a3   : > { %5560 = vpow2.f32 %v5003_v33  ;;  %v8242_v7 = vld [vmem:[#allocation79_spill] sm:$0xff]  ;;  %v8243_v36 = vld [vmem:[#allocation80_spill] sm:$0xff]  ;;  %v8244_v58 = vld [vmem:[#allocation81_spill] sm:$0xff] }
0x11a4   : > { %5562 = vpow2.f32 %v5004_v47  ;;  %v8246_v33 = vld [vmem:[#allocation83_spill] sm:$0xff]  ;;  %v8247_v47 = vld [vmem:[#allocation84_spill] sm:$0xff] }
0x11a5   : > { %5564 = vtanh.f32 %v3605_v48  ;;  %v8235_v48 = vld [vmem:[#allocation46_spill] sm:$0xff] }
0x11ac   : > { %v5559_v35 = vpop.eup %5558 }
0x11ad   : > { %v5561_v44 = vpop.eup %5560  ;;  %v3610_v15 = vadd.f32 1.0, %v5559_v35  ;;  %v8248_v35 = vld [vmem:[#allocation85_spill] sm:$0xff] }
0x11ae   : > { %v3616_v57 = vadd.f32 1.0, %v5561_v44  ;;  %v5563_v53 = vpop.eup %5562  ;;  %v8249_v44 = vld [vmem:[#allocation86_spill] sm:$0xff] }
0x11af   : > { %5566 = vrcp.f32 %v3610_v15  ;;  %v5565_v31 = vpop.eup %5564  ;;  %v3623_v55 = vadd.f32 1.0, %v5563_v53  ;;  %v8250_v15 = vld [vmem:[#allocation87_spill] sm:$0xff]  ;;  %v8252_v53 = vld [vmem:[#allocation89_spill] sm:$0xff] }
0x11b0   : > { %5568 = vrcp.f32 %v3616_v57  ;;  %v8251_v57 = vld [vmem:[#allocation88_spill] sm:$0xff] }
0x11b1   : > { %5570 = vrcp.f32 %v3623_v55 }
0x11b9   : > { %v5567_v61 = vpop.eup %5566 }
0x11ba   : > { %v5569_v20 = vpop.eup %5568  ;;  %v3627_v16 = vmul.f32 %v5567_v61, %v5565_v31  ;;  %v8254_v31 = vld [vmem:[#allocation91_spill] sm:$0xff]  ;;  %v8255_v61 = vld [vmem:[#allocation92_spill] sm:$0xff] }
0x11bb   : > { %v3626_v29 = vmul.f32 %v5569_v20, %v8217_v46  ;;  %v5571_v1 = vpop.eup %5570  ;;  %v8256_v20 = vld [vmem:[#allocation93_spill] sm:$0xff] }
0x11bd   : > { %v7538_v52 = vadd.f32 %v3627_v16, %v3626_v29  ;;  %v8257_v29 = vld [vmem:[#allocation27_spill] sm:$0xff] }
0x11bf   : > { %5572 = vtanh.f32 %v7538_v52 }
0x11c9   : > { %v5573_v27 = vpop.eup %5572 }
0x11ca   : > { %v3630_v56 = vmul.f32 %v5573_v27, %v5571_v1 }
0x11cc   : > { %v3631_v49 = vpack.c.bf16 %v3630_v56, %v3630_v56 }
0x11ce   : > { %5005 = vst [vmem:[%s6384_s27 + $0x8] sm:$0xf] %v3631_v49  ;;  %3715 = vmatmul.mubr.bf16.vlgmr.msra.gmra.mrb[28].mxu1 %v3631_v49  ;;  %3756 = vmatmul.mubr.bf16.vlgmr.msra.gmra.mrb[32].mxu0 %v3631_v49 }
0x11cf   : > { %5175 = vmatpush3.bf16.msra.mxu1 %v8218_v63  ;;  %5190 = vmatprep.mubr.msk.bf16.mxu1 %vm6053_vm9, %v8072_v22 }
0x11d0   : > { %5176 = vmatprep.subr.bf16.mxu1 %v8072_v22  ;;  %4428 = vmatpush1.bf16.msra.mxu0 %v8219_v8 }
0x11d1   : > { %4429 = vmatprep.subr.bf16.mxu0 %v8220_v38  ;;  %4459 = vmatprep.mubr.bf16.mxu0 %v8071_v11 }
0x11d3   : > { %5177 = vmatpush3.bf16.msra.mxu1 %v8221_v12 }
0x11d4   : > { %5178 = vmatprep.subr.bf16.mxu1 %v8072_v22  ;;  %4430 = vmatpush1.bf16.msra.mxu0 %v8222_v4 }
0x11d5   : > { %4431 = vmatprep.subr.bf16.mxu0 %v8223_v34 }
0x11d7   : > { %5179 = vmatpush3.bf16.msra.mxu1 %v8224_v40 }
0x11d8   : > { %5180 = vmatprep.subr.bf16.mxu1 %v8072_v22  ;;  %4432 = vmatpush1.bf16.msra.mxu0 %v8225_v3 }
0x11d9   : > { %4433 = vmatprep.subr.bf16.mxu0 %v8226_v9 }
0x11db   : > { %5181 = vmatpush3.bf16.msra.mxu1 %v8227_v26 }
0x11dc   : > { %5182 = vmatprep.subr.bf16.mxu1 %v8072_v22  ;;  %4434 = vmatpush1.bf16.msra.mxu0 %v8228_v37  ;;  %v3854_v37 = vld [vmem:[#allocation7] sm:$0xff] }
0x11dd   : > { %4435 = vmatprep.subr.bf16.mxu0 %v8229_v18 }
0x11df   : > { %5183 = vmatpush3.bf16.msra.mxu1 %v8230_v5 }
0x11e0   : > { %5184 = vmatprep.subr.bf16.mxu1 %v8072_v22  ;;  %4436 = vmatpush1.bf16.msra.mxu0 %v8231_v43 }
0x11e1   : > { %4437 = vmatprep.subr.bf16.mxu0 %v8232_v51  ;;  %v3855_v51 = vld [vmem:[#allocation7 + $0x8] sm:$0xff] }
0x11e3   : > { %5185 = vmatpush3.bf16.msra.mxu1 %v8233_v24  ;;  %v3856_v24 = vld [vmem:[#allocation7 + $0x10] sm:$0xff] }
0x11e4   : > { %5186 = vmatprep.subr.bf16.mxu1 %v8072_v22  ;;  %4438 = vmatpush1.bf16.msra.mxu0 %v8234_v60 }
0x11e5   : > { %4439 = vmatprep.subr.bf16.mxu0 %v8235_v48 }
0x11e7   : > { %5187 = vmatpush3.bf16.msra.mxu1 %v8236_v62  ;;  %v3857_v62 = vld [vmem:[#allocation7 + $0x18] sm:$0xff] }
0x11e8   : > { %5188 = vmatprep.subr.bf16.mxu1 %v8072_v22  ;;  %4440 = vmatpush1.bf16.msra.mxu0 %v8237_v54  ;;  %v8245_v22 = vld [vmem:[#allocation82_spill] sm:$0xff] }
0x11e9   : > { %4441 = vmatprep.subr.bf16.mxu0 %v8238_v42 }
0x11eb   : > { %5189 = vmatpush3.bf16.msra.mxu1 %v8239_v41 }
0x11ec   : > { %4468 = vmatprep.subr.bf16.mxu1 %v8240_v6  ;;  %4442 = vmatpush1.bf16.msra.mxu0 %v8241_v30  ;;  %v3858_v30 = vld [vmem:[#allocation7 + $0x20] sm:$0xff] }
0x11ee   : > { %5191 = vmatmul.mubr.bf16.vlgmr.msra.gmra.mrb[32].mxu1 %v3631_v49 }
0x11ef   : > { %4469 = vmatpush1.bf16.msra.mxu1 %v8242_v7  ;;  %4500 = vmatprep.mubr.bf16.mxu1 %v8071_v11  ;;  %v8253_v11 = vld [vmem:[#allocation90_spill] sm:$0xff] }
0x11f0   : > { %4470 = vmatprep.subr.bf16.mxu1 %v8243_v36 }
0x11f3   : > { %4471 = vmatpush1.bf16.msra.mxu1 %v8244_v58 }
0x11f4   : > { %4472 = vmatprep.subr.bf16.mxu1 %v8245_v22 }
0x11f7   : > { %4473 = vmatpush1.bf16.msra.mxu1 %v8246_v33  ;;  %v3859_v33 = vld [vmem:[#allocation7 + $0x28] sm:$0xff] }
0x11f8   : > { %4474 = vmatprep.subr.bf16.mxu1 %v8247_v47 }
0x11fb   : > { %4475 = vmatpush1.bf16.msra.mxu1 %v8248_v35 }
0x11fc   : > { %4476 = vmatprep.subr.bf16.mxu1 %v8249_v44 }
0x11ff   : > { %4477 = vmatpush1.bf16.msra.mxu1 %v8250_v15  ;;  %v3860_v15 = vld [vmem:[#allocation7 + $0x30] sm:$0xff] }
0x1200   : > { %4478 = vmatprep.subr.bf16.mxu1 %v8251_v57 }
0x1203   : > { %4479 = vmatpush1.bf16.msra.mxu1 %v8252_v53 }
0x1204   : > { %4480 = vmatprep.subr.bf16.mxu1 %v8253_v11  ;;  %v3861_v11 = vld [vmem:[#allocation7 + $0x38] sm:$0xff] }
0x1207   : > { %4481 = vmatpush1.bf16.msra.mxu1 %v8254_v31 }
0x1208   : > { %4482 = vmatprep.subr.bf16.mxu1 %v8255_v61 }
0x120b   : > { %4483 = vmatpush1.bf16.msra.mxu1 %v8256_v20 }
0x12a1   : > { %v3716_v16 = vpop.f32.mrb[28].mxu1  ;;  %v7592_v55 = vpop.f32.mrb[32].mxu0 }
0x12a2   : > { %v3805_v46 = vcombine.high %v3716_v16, %v3716_v16  ;;  %v3812_v1 = vrot.slane %v3716_v16, %v8257_v29  ;;  %v7595_v27 = vpop.f32.mrb[29].mxu1  ;;  %v7597_v56 = vpop.f32.mrb[33].mxu0  ;;  %v8258_v16 = vld [vmem:[#allocation97_spill] sm:$0xff] }
0x12a3   : > { %v3720_v49 = vpop.f32.mrb[30].mxu1  ;;  %v3761_v63 = vpop.f32.mrb[34].mxu0 }
0x12a4   : > { %v3819_v8 = vrot.slane %v3805_v46, %v8257_v29  ;;  %v3820_v38 = vcombine.high %v3812_v1, %v3812_v1  ;;  %v3828_v12 = vrot.slane %v3812_v1, %v8257_v29  ;;  %v3721_v4 = vpop.f32.mrb[31].mxu1  ;;  %v3762_v34 = vpop.f32.mrb[35].mxu0 }
0x12a6   : > { %v3821_v40 = vcombine.high %v3819_v8, %v3819_v8  ;;  %v3835_v3 = vrot.slane %v3819_v8, %v8257_v29  ;;  %v3842_v9 = vrot.slane %v3820_v38, %v8257_v29  ;;  %v3850_v26 = vcombine.high %v3828_v12, %v3828_v12 }
0x12a7   : > { %v3865_v18 = vrot.slane %v3828_v12, %v6404_v14 }
0x12a8   : > { %v3849_v5 = vrot.slane %v3821_v40, %v8257_v29  ;;  %v3852_v43 = vcombine.high %v3842_v9, %v3842_v9  ;;  %v3869_v60 = vrot.slane %v3842_v9, %v6404_v14  ;;  %v3851_v48 = vcombine.high %v3835_v3, %v3835_v3 }
0x12a9   : > { %v3873_v54 = vrot.slane %v3850_v26, %v6404_v14  ;;  %v3881_v42 = vrot.slane %v3835_v3, %v6404_v14  ;;  %v3902_v41 = vadd.f32 %v3865_v18, %v3854_v37  ;;  %v5722_v3 = vld [vmem:[%s7859_s8] ss:$0 sm:$0xff] }
0x12aa   : > { %v3853_v6 = vcombine.high %v3849_v5, %v3849_v5  ;;  %v3877_v7 = vrot.slane %v3852_v43, %v6404_v14  ;;  %v3885_v36 = vrot.slane %v3849_v5, %v6404_v14  ;;  %v3903_v58 = vadd.f32 %v3869_v60, %v3855_v51  ;;  %v8259_v60 = vld [vmem:[#allocation29_spill] sm:$0xff] }
0x12ab   : > { %v3904_v22 = vadd.f32 %v3873_v54, %v3856_v24  ;;  %5574 = vtanh.f32 %v3902_v41  ;;  %v3889_v35 = vrot.slane %v3851_v48, %v6404_v14  ;;  %v3906_v44 = vadd.f32 %v3881_v42, %v3858_v30  ;;  %v3950_v54 = vpop.permute.xlu1 %3949 }
0x12ac   : > { %v3905_v47 = vadd.f32 %v3877_v7, %v3857_v62  ;;  %5576 = vtanh.f32 %v3903_v58  ;;  %v3893_v57 = vrot.slane %v3853_v6, %v6404_v14  ;;  %v3907_v53 = vadd.f32 %v3885_v36, %v3859_v33  ;;  %v3957_v6 = vpop.permute.xlu0 %3956 }
0x12ad   : > { %5578 = vtanh.f32 %v3904_v22  ;;  %v3908_v31 = vadd.f32 %v3889_v35, %v3860_v15  ;;  %v3989_v48 = vrot.slane %v7515_v39, %v8259_v60  ;;  %v3996_v62 = vrot.slane %v7515_v39, %v8109_v45 }
0x12ae   : > { %5580 = vtanh.f32 %v3905_v47  ;;  %v3909_v61 = vadd.f32 %v3893_v57, %v3861_v11 }
0x12af   : > { %5582 = vtanh.f32 %v3906_v44  ;;  %v3964_v42 = vpop.permute.xlu1 %3963 }
0x12b0   : > { %5584 = vtanh.f32 %v3907_v53  ;;  %v3985_v7 = vpop.permute.xlu0 %3984 }
0x12b1   : > { %5586 = vtanh.f32 %v3908_v31 }
0x12b2   : > { %5588 = vtanh.f32 %v3909_v61 }
0x12b3   : > { %v3971_v41 = vpop.permute.xlu1 %3970 }
0x12b5   : > { %v5575_v20 = vpop.eup %5574 }
0x12b6   : > { %v3918_v46 = vmul.f32 %v8258_v16, %v5575_v20  ;;  %v5577_v29 = vpop.eup %5576 }
0x12b7   : > { %v5579_v1 = vpop.eup %5578  ;;  %v3919_v49 = vmul.f32 %v8258_v16, %v5577_v29  ;;  %v3978_v30 = vpop.permute.xlu1 %3977 }
0x12b8   : > { %3926 = vadd.xlane.f32.xlu1 %v3918_v46  ;;  %v5581_v63 = vpop.eup %5580  ;;  %v3920_v8 = vmul.f32 %v8258_v16, %v5579_v1 }
0x12b9   : > { %3928 = vadd.xlane.f32.xlu0 %v3919_v49  ;;  %v5583_v38 = vpop.eup %5582  ;;  %v3921_v12 = vmul.f32 %v8258_v16, %v5581_v63  ;;  %v8260_v63 = vld [vmem:[#allocation30_spill] sm:$0xff] }
0x12ba   : > { %v5585_v4 = vpop.eup %5584  ;;  %v3922_v34 = vmul.f32 %v8258_v16, %v5583_v38 }
0x12bb   : > { %v5587_v40 = vpop.eup %5586  ;;  %v3923_v9 = vmul.f32 %v5722_v3, %v5585_v4 }
0x12bc   : > { %3930 = vadd.xlane.f32.xlu1 %v3920_v8  ;;  %v5589_v26 = vpop.eup %5588  ;;  %v3924_v5 = vmul.f32 %v5722_v3, %v5587_v40 }
0x12bd   : > { %3932 = vadd.xlane.f32.xlu0 %v3921_v12  ;;  %v3925_v24 = vmul.f32 %v5722_v3, %v5589_v26 }
0x12c0   : > { %3934 = vadd.xlane.f32.xlu1 %v3922_v34 }
0x12c1   : > { %v7620_v37 = vpop.f32.mrb[32].mxu1  ;;  %3936 = vadd.xlane.f32.xlu0 %v3923_v9 }
0x12c2   : > { %v5192_v18 = vpop.f32.mrb[33].mxu1 }
0x12c3   : > { %v3801_v43 = vpop.f32.mrb[34].mxu1 }
0x12c4   : > { %3938 = vadd.xlane.f32.xlu1 %v3924_v5  ;;  %v5193_v51 = vpop.f32.mrb[35].mxu1 }
0x12c5   : > { %3940 = vadd.xlane.f32.xlu0 %v3925_v24 }
0x12d5   : > { %3991 = vbcast.lane.b32.xlu1 %v3989_v48, 256 }
0x12db   : > { %3998 = vbcast.lane.b32.xlu0 %v3996_v62, 256 }
0x1345   : > { %v3927_v36 = vpop.xlane.xlu1 %3926 }
0x1346   : > { %v4008_v58 = vadd.f32 %v3950_v54, %v3927_v36  ;;  %v3929_v22 = vpop.xlane.xlu0 %3928 }
0x1347   : > { %v4009_v33 = vadd.f32 %v3957_v6, %v3929_v22 }
0x1348   : > { %4025 = vperm.xlu1 %5319, %v4008_v58  }
0x1349   : > { %v3931_v47 = vpop.xlane.xlu1 %3930  ;;  %4028 = vperm.xlu0 %5318, %v4009_v33  }
0x134a   : > { %v4010_v35 = vadd.f32 %v3964_v42, %v3931_v47  ;;  %v3933_v44 = vpop.xlane.xlu0 %3932 }
0x134b   : > { %v4011_v15 = vadd.f32 %v3971_v41, %v3933_v44 }
0x134c   : > { %4031 = vperm.xlu1 %5319, %v4010_v35  }
0x134d   : > { %v3935_v57 = vpop.xlane.xlu1 %3934  ;;  %4034 = vperm.xlu0 %5318, %v4011_v15  }
0x134e   : > { %v4012_v39 = vadd.f32 %v3978_v30, %v3935_v57  ;;  %v3937_v53 = vpop.xlane.xlu0 %3936 }
0x134f   : > { %v4013_v11 = vadd.f32 %v3985_v7, %v3937_v53 }
0x1350   : > { %4037 = vperm.xlu1 %5319, %v4012_v39  }
0x1351   : > { %v3939_v31 = vpop.xlane.xlu1 %3938  ;;  %4040 = vperm.xlu0 %5318, %v4013_v11  }
0x1352   : > { %v3941_v61 = vpop.xlane.xlu0 %3940 }
0x1355   : > { %v3992_v20 = vpop.permute.xlu1 %3991 }
0x1356   : > { %v4014_v16 = vadd.f32 %v3992_v20, %v3939_v31  ;;  %v3999_v46 = vpop.permute.xlu0 %3998 }
0x1357   : > { %v4015_v29 = vadd.f32 %v3999_v46, %v3941_v61 }
0x1358   : > { %4043 = vperm.xlu1 %5319, %v4014_v16  }
0x1359   : > { %4046 = vperm.xlu0 %5318, %v4015_v29  }
0x13c7   : > { %v4026_v1 = vpop.permute.xlu1 %4025 }
0x13c8   : > { %v4029_v49 = vpop.permute.xlu0 %4028  ;;  %v4051_v38 = vrot.slane %v4026_v1, %v8260_v63 }
0x13c9   : > { %v4055_v8 = vrot.slane %v4029_v49, %v8260_v63 }
0x13cb   : > { %v4032_v12 = vpop.permute.xlu1 %4031  ;;  %v4080_v34 = vsel %vm1197_vm1, %v4055_v8, %v4051_v38 }
0x13cc   : > { %v4059_v4 = vrot.slane %v4032_v12, %v8260_v63  ;;  %v4035_v40 = vpop.permute.xlu0 %4034 }
0x13cd   : > { %v4063_v3 = vrot.slane %v4035_v40, %v8260_v63 }
0x13ce   : > { %v4081_v26 = vsel %vm1199_vm2, %v4059_v4, %v4080_v34 }
0x13cf   : > { %v4038_v9 = vpop.permute.xlu1 %4037  ;;  %v4082_v43 = vsel %vm1201_vm3, %v4063_v3, %v4081_v26 }
0x13d0   : > { %v4067_v18 = vrot.slane %v4038_v9, %v8260_v63  ;;  %v4041_v5 = vpop.permute.xlu0 %4040 }
0x13d1   : > { %v4071_v51 = vrot.slane %v4041_v5, %v8260_v63 }
0x13d2   : > { %v4083_v24 = vsel %vm1203_vm4, %v4067_v18, %v4082_v43 }
0x13d3   : > { %v4084_v54 = vsel %vm1205_vm5, %v4071_v51, %v4083_v24 }
0x13d7   : > { %v4044_v48 = vpop.permute.xlu1 %4043 }
0x13d8   : > { %v4075_v62 = vrot.slane %v4044_v48, %v8260_v63  ;;  %v4047_v42 = vpop.permute.xlu0 %4046 }
0x13d9   : > { %v4079_v41 = vrot.slane %v4047_v42, %v8260_v63 }
0x13da   : > { %v4085_v6 = vsel %vm1207_vm6, %v4075_v62, %v4084_v54 }
0x13db   : > { %v4086_v30 = vsel %vm1209_vm7, %v4079_v41, %v4085_v6 }
0x13dc   : > { %v4088_v7 = vsel %vm1212_vm8, %v4086_v30, -inf }
0x13dd   : > { %4089 = vmax.xlane.f32.xlu1 %v4088_v7 }
0x146a   : > { %v4090_v36 = vpop.xlane.xlu1 %4089 }
0x146b   : > { %v4095_v22 = vrot.slane %v4090_v36, %v6404_v14  ;;  %v4099_v47 = vrot.slane %v4090_v36, %v6401_v13  ;;  %v4103_v44 = vrot.slane %v4090_v36, %v6407_v17  ;;  %v4107_v61 = vrot.slane %v4090_v36, %v6422_v23 }
0x146c   : > { %v4111_v1 = vrot.slane %v4090_v36, %v8212_v2  ;;  %v4115_v38 = vrot.slane %v4090_v36, %v6429_v28 }
0x146d   : > { %v4132_v57 = vsub.f32 %v4008_v58, %v4095_v22  ;;  %v4133_v53 = vsub.f32 %v4009_v33, %v4099_v47  ;;  %v4134_v20 = vsub.f32 %v4010_v35, %v4103_v44  ;;  %v4135_v49 = vsub.f32 %v4011_v15, %v4107_v61 }
0x146e   : > { %v4136_v12 = vsub.f32 %v4012_v39, %v4111_v1  ;;  %v4119_v58 = vrot.slane %v4090_v36, %v8259_v60  ;;  %v4137_v33 = vsub.f32 %v4013_v11, %v4115_v38  ;;  %v4123_v15 = vrot.slane %v4090_v36, %v8109_v45 }
0x146f   : > { %v4140_v31 = vmul.f32 1.442695, %v4132_v57  ;;  %v4142_v46 = vmul.f32 1.442695, %v4133_v53  ;;  %v4144_v8 = vmul.f32 1.442695, %v4134_v20 }
0x1470   : > { %v4146_v4 = vmul.f32 1.442695, %v4135_v49  ;;  %v4148_v35 = vmul.f32 1.442695, %v4136_v12  ;;  %v4138_v3 = vsub.f32 %v4014_v16, %v4119_v58  ;;  %v4150_v39 = vmul.f32 1.442695, %v4137_v33 }
0x1471   : > { %5590 = vpow2.f32 %v4140_v31  ;;  %v4139_v26 = vsub.f32 %v4015_v29, %v4123_v15 }
0x1472   : > { %5592 = vpow2.f32 %v4142_v46  ;;  %v4152_v18 = vmul.f32 1.442695, %v4138_v3  ;;  %v4571_v3 = vstv %s4570_s15  ;;  %s5893_s15 = scalar_lea.vmem %s7733_s24, 256 }
0x1473   : > { %5594 = vpow2.f32 %v4144_v8  ;;  %v4154_v11 = vmul.f32 1.442695, %v4139_v26  ;;  %p5894_p2 = scmp.ne.s32.totalorder %s7733_s24, %s5893_s15  ;;  %p5901_p11 = scmp.lt.s32.totalorder %s5899_s2, %s5893_s15 }
0x1474   : > { %5596 = vpow2.f32 %v4146_v4 }
0x1475   : > { %5598 = vpow2.f32 %v4148_v35  ;;  %p5895_p0 = pnand %p5894_p2, %p8262_p6  ;;  %p5902_p9 = por %p5901_p11, %p5900_p5 }
0x1476   : > { %5600 = vpow2.f32 %v4150_v39 }
0x1477   : > { %5602 = vpow2.f32 %v4152_v18  ;;  %p5896_p7 = pneg %p5895_p0 }
0x1478   : > { %5604 = vpow2.f32 %v4154_v11 }
0x1479   : > { %p5903_p4 = pnand %p5902_p9, %p5896_p7 }
0x147b   : > { %v7648_v34 = vpop.eup %5590 }
0x147c   : > { %4165 = vperm.xlu0 %5318, %v7648_v34   ;;  %v7652_v40 = vpop.eup %5592 }
0x147d   : > { %v7656_v9 = vpop.eup %5594 }
0x147e   : > { %v5597_v5 = vpop.eup %5596 }
0x147f   : > { %v5599_v43 = vpop.eup %5598 }
0x1480   : > { %4168 = vperm.xlu0 %5318, %v7652_v40   ;;  %v5601_v51 = vpop.eup %5600 }
0x1481   : > { %v7659_v24 = vpop.eup %5602 }
0x1482   : > { %v5605_v16 = vpop.eup %5604 }
0x1484   : > { %4171 = vperm.xlu0 %5318, %v7656_v9  }
0x1488   : > { %4174 = vperm.xlu0 %5318, %v5597_v5  }
0x148c   : > { %4177 = vperm.xlu0 %5318, %v5599_v43  }
0x1490   : > { %4180 = vperm.xlu0 %5318, %v5601_v51  }
0x1494   : > { %4183 = vperm.xlu0 %5318, %v7659_v24  }
0x1498   : > { %4186 = vperm.xlu0 %5318, %v5605_v16  }
0x14fb   : > { %v4166_v48 = vpop.permute.xlu0 %4165 }
0x14fc   : > { %v4191_v7 = vrot.slane %v4166_v48, %v8260_v63 }
0x14ff   : > { %v4169_v62 = vpop.permute.xlu0 %4168 }
0x1500   : > { %v4195_v6 = vrot.slane %v4169_v62, %v8260_v63 }
0x1502   : > { %v4220_v44 = vsel %vm1197_vm1, %v4195_v6, %v4191_v7  ;;  %v4281_v6 = vld [vmem:[#allocation9] sm:$0xff]  ;;  %v4282_v7 = vld [vmem:[#allocation9 + $0x8] sm:$0xff] }
0x1503   : > { %v4172_v29 = vpop.permute.xlu0 %4171 }
0x1504   : > { %v4199_v30 = vrot.slane %v4172_v29, %v8260_v63 }
0x1506   : > { %v4221_v53 = vsel %vm1199_vm2, %v4199_v30, %v4220_v44 }
0x1507   : > { %v4175_v54 = vpop.permute.xlu0 %4174 }
0x1508   : > { %v4203_v36 = vrot.slane %v4175_v54, %v8260_v63 }
0x150a   : > { %v4222_v61 = vsel %vm1201_vm3, %v4203_v36, %v4221_v53  ;;  %v4285_v36 = vld [vmem:[#allocation9 + $0x20] sm:$0xff]  ;;  %v4283_v53 = vld [vmem:[#allocation9 + $0x10] sm:$0xff] }
0x150b   : > { %v4178_v42 = vpop.permute.xlu0 %4177 }
0x150c   : > { %v4207_v22 = vrot.slane %v4178_v42, %v8260_v63 }
0x150e   : > { %v4223_v20 = vsel %vm1203_vm4, %v4207_v22, %v4222_v61 }
0x150f   : > { %v4181_v41 = vpop.permute.xlu0 %4180 }
0x1510   : > { %v4211_v57 = vrot.slane %v4181_v41, %v8260_v63 }
0x1512   : > { %v4224_v1 = vsel %vm1205_vm5, %v4211_v57, %v4223_v20 }
0x1513   : > { %v4184_v47 = vpop.permute.xlu0 %4183 }
0x1514   : > { %v4215_v31 = vrot.slane %v4184_v47, %v8260_v63 }
0x1516   : > { %v4225_v8 = vsel %vm1207_vm6, %v4215_v31, %v4224_v1 }
0x1517   : > { %v4187_v46 = vpop.permute.xlu0 %4186 }
0x1518   : > { %v4219_v49 = vrot.slane %v4187_v46, %v8260_v63 }
0x151a   : > { %v4226_v38 = vsel %vm1209_vm7, %v4219_v49, %v4225_v8 }
0x151b   : > { %v4228_v12 = vsel %vm1212_vm8, %v4226_v38, 0.0 }
0x151c   : > { %4229 = vadd.xlane.f32.xlu0 %v4228_v12 }
0x15a9   : > { %v4230_v4 = vpop.xlane.xlu0 %4229 }
0x15aa   : > { %5606 = vrcp.f32 %v4230_v4 }
0x15b4   : > { %v5607_v58 = vpop.eup %5606 }
0x15b5   : > { %v4252_v33 = vrot.slane %v5607_v58, %v8212_v2  ;;  %v4236_v35 = vrot.slane %v5607_v58, %v6404_v14  ;;  %v4248_v15 = vrot.slane %v5607_v58, %v6422_v23  ;;  %v4240_v39 = vrot.slane %v5607_v58, %v6401_v13 }
0x15b6   : > { %v4256_v26 = vrot.slane %v5607_v58, %v6429_v28  ;;  %v4264_v62 = vrot.slane %v5607_v58, %v8109_v45  ;;  %v4244_v2 = vrot.slane %v5607_v58, %v6407_v17  ;;  %v4260_v17 = vrot.slane %v5607_v58, %v8259_v60 }
0x15b7   : > { %v4277_v18 = vmul.f32 %v5599_v43, %v4252_v33  ;;  %v4273_v11 = vmul.f32 %v7648_v34, %v4236_v35  ;;  %v4276_v48 = vmul.f32 %v5597_v5, %v4248_v15  ;;  %v4274_v23 = vmul.f32 %v7652_v40, %v4240_v39  ;;  %v4286_v33 = vld [vmem:[#allocation9 + $0x28] sm:$0xff] }
0x15b8   : > { %v4278_v29 = vmul.f32 %v5601_v51, %v4256_v26  ;;  %v4280_v13 = vmul.f32 %v5605_v16, %v4264_v62  ;;  %v4275_v34 = vmul.f32 %v7656_v9, %v4244_v2 }
0x15b9   : > { %4311 = vperm.xlu0 %5318, %v4277_v18   ;;  %4291 = vperm.xlu1 %5319, %v4273_v11   ;;  %v4575_v54 = vmul.f32 %v4571_v3, %v4276_v48  ;;  %v4572_v40 = vmul.f32 %v4571_v3, %v4273_v11  ;;  %v4576_v16 = vmul.f32 %v4571_v3, %v4277_v18 }
0x15ba   : > { %v4577_v42 = vmul.f32 %v4571_v3, %v4278_v29  ;;  %v4579_v5 = vmul.f32 %v4571_v3, %v4280_v13  ;;  %v4574_v51 = vmul.f32 %v4571_v3, %v4275_v34 }
0x15bb   : > { %v4583_v14 = vadd.f32 %v4575_v54, %v7448_v59  ;;  %v4279_v59 = vmul.f32 %v7659_v24, %v4260_v17  ;;  %v4580_v43 = vadd.f32 %v4572_v40, %v7439_v19  ;;  %v4584_v60 = vadd.f32 %v4576_v16, %v7445_v32  ;;  %v4288_v17 = vld [vmem:[#allocation9 + $0x38] sm:$0xff] }
0x15bc   : > { %v4585_v28 = vadd.f32 %v4577_v42, %v7451_v0  ;;  %v4587_v45 = vadd.f32 %v4579_v5, %v7460_v50  ;;  %v4573_v0 = vmul.f32 %v4571_v3, %v4274_v23  ;;  %v4582_v50 = vadd.f32 %v4574_v51, %v7454_v25 }
0x15bd   : > { %4609 = vperm.xlu0 %5318, %v4583_v14   ;;  %4296 = vperm.xlu1 %5319, %v4274_v23   ;;  %v4578_v41 = vmul.f32 %v4571_v3, %v4279_v59 }
0x15be   : > { %v4581_v9 = vadd.f32 %v4573_v0, %v7442_v21 }
0x15bf   : > { %v4586_v24 = vadd.f32 %v4578_v41, %v7457_v10  ;;  %v4284_v10 = vld [vmem:[#allocation9 + $0x18] sm:$0xff] }
0x15c1   : > { %4615 = vperm.xlu0 %5318, %v4585_v28   ;;  %4301 = vperm.xlu1 %5319, %v4275_v34  }
0x15c5   : > { %4621 = vperm.xlu0 %5318, %v4587_v45   ;;  %4306 = vperm.xlu1 %5319, %v4276_v48  }
0x15c9   : > { %4316 = vperm.xlu1 %5319, %v4278_v29   ;;  %v4287_v29 = vld [vmem:[#allocation9 + $0x30] sm:$0xff] }
0x15cd   : > { %4321 = vperm.xlu1 %5319, %v4279_v59  }
0x15d1   : > { %4326 = vperm.xlu1 %5319, %v4280_v13  }
0x15d5   : > { %4600 = vperm.xlu1 %5319, %v4580_v43  }
0x15d9   : > { %4603 = vperm.xlu1 %5319, %v4581_v9  }
0x15dd   : > { %4606 = vperm.xlu1 %5319, %v4582_v50  }
0x15e1   : > { %4612 = vperm.xlu1 %5319, %v4584_v60  }
0x15e5   : > { %4618 = vperm.xlu1 %5319, %v4586_v24  }
0x1638   : > { %v4292_v30 = vpop.permute.xlu1 %4291  ;;  %v4312_v22 = vpop.permute.xlu0 %4311 }
0x1639   : > { %v4329_v19 = vmul.f32 %v4292_v30, %v4281_v6  ;;  %v4333_v57 = vmul.f32 %v4312_v22, %v4285_v36 }
0x163b   : > { %v4337_v21 = vrot.slane %v4329_v19, 4  ;;  %v4361_v20 = vrot.slane %v4333_v57, 4 }
0x163c   : > { %v4297_v47 = vpop.permute.xlu1 %4296 }
0x163d   : > { %v4330_v44 = vmul.f32 %v4297_v47, %v4282_v7  ;;  %v4338_v31 = vadd.f32 %v4337_v21, %v4329_v19  ;;  %v4362_v12 = vadd.f32 %v4361_v20, %v4333_v57 }
0x163f   : > { %v4343_v25 = vrot.slane %v4330_v44, 4  ;;  %v4339_v49 = vrot.slane %v4338_v31, 2  ;;  %v4363_v11 = vrot.slane %v4362_v12, 2 }
0x1640   : > { %v4302_v61 = vpop.permute.xlu1 %4301 }
0x1641   : > { %v4344_v32 = vadd.f32 %v4343_v25, %v4330_v44  ;;  %v4331_v46 = vmul.f32 %v4302_v61, %v4283_v53  ;;  %v4340_v15 = vadd.f32 %v4339_v49, %v4338_v31  ;;  %v4364_v5 = vadd.f32 %v4363_v11, %v4362_v12  ;;  %v4610_v61 = vpop.permute.xlu0 %4609 }
0x1643   : > { %v4345_v1 = vrot.slane %v4344_v32, 2  ;;  %v4349_v8 = vrot.slane %v4331_v46, 4  ;;  %v4341_v14 = vrot.slane %v4340_v15, 1  ;;  %v4365_v24 = vrot.slane %v4364_v5, 1 }
0x1644   : > { %v4307_v38 = vpop.permute.xlu1 %4306 }
0x1645   : > { %v4350_v4 = vadd.f32 %v4349_v8, %v4331_v46  ;;  %v4332_v58 = vmul.f32 %v4307_v38, %v4284_v10  ;;  %v4346_v35 = vadd.f32 %v4345_v1, %v4344_v32  ;;  %v4342_v0 = vadd.f32 %v4341_v14, %v4340_v15  ;;  %v4616_v11 = vpop.permute.xlu0 %4615 }
0x1646   : > { %v4366_v31 = vadd.f32 %v4365_v24, %v4364_v5 }
0x1647   : > { %v4351_v3 = vrot.slane %v4350_v4, 2  ;;  %v4355_v39 = vrot.slane %v4332_v58, 4  ;;  %v4347_v54 = vrot.slane %v4346_v35, 1  ;;  %v4385_v22 = vpack.c.bf16 %v4342_v0, %v4342_v0 }
0x1648   : > { %v4317_v26 = vpop.permute.xlu1 %4316 }
0x1649   : > { %v4334_v18 = vmul.f32 %v4317_v26, %v4286_v33  ;;  %v4352_v48 = vadd.f32 %v4351_v3, %v4350_v4  ;;  %v4356_v62 = vadd.f32 %v4355_v39, %v4332_v58  ;;  %v4348_v59 = vadd.f32 %v4347_v54, %v4346_v35  ;;  %v4622_v0 = vpop.permute.xlu0 %4621 }
0x164a   : > { %v4410_v1 = vunpack.c.l.b16 %v4385_v22  ;;  %v4389_v58 = vpack.c.bf16 %v4366_v31, %v4366_v31  ;;  %v4654_v24 = vrot.slane %v4622_v0, %v8260_v63 }
0x164b   : > { %v4367_v2 = vrot.slane %v4334_v18, 4  ;;  %v4353_v23 = vrot.slane %v4352_v48, 1  ;;  %v4357_v42 = vrot.slane %v4356_v62, 2  ;;  %v4386_v30 = vpack.c.bf16 %v4348_v59, %v4348_v59 }
0x164c   : > { %v4322_v13 = vpop.permute.xlu1 %4321 }
0x164d   : > { %v4368_v28 = vadd.f32 %v4367_v2, %v4334_v18  ;;  %v4335_v34 = vmul.f32 %v4322_v13, %v4287_v29  ;;  %v4358_v45 = vadd.f32 %v4357_v42, %v4356_v62  ;;  %v4354_v9 = vadd.f32 %v4353_v23, %v4352_v48 }
0x164e   : > { %v4411_v32 = vunpack.c.l.b16 %v4386_v30  ;;  %v4414_v2 = vunpack.c.l.b16 %v4389_v58  ;;  %v4590_v30 = vld [vmem:[#allocation18] sm:$0xff] }
0x164f   : > { %v4369_v40 = vrot.slane %v4368_v28, 2  ;;  %v4373_v43 = vrot.slane %v4335_v34, 4  ;;  %v4359_v51 = vrot.slane %v4358_v45, 1  ;;  %v4387_v21 = vpack.c.bf16 %v4354_v9, %v4354_v9 }
0x1650   : > { %v4327_v50 = vpop.permute.xlu1 %4326  ;;  %v4418_v35 = vsel %vm1197_vm1, %v4411_v32, %v4410_v1 }
0x1651   : > { %v4370_v16 = vadd.f32 %v4369_v40, %v4368_v28  ;;  %v4374_v60 = vadd.f32 %v4373_v43, %v4335_v34  ;;  %v4336_v41 = vmul.f32 %v4327_v50, %v4288_v17  ;;  %v4360_v6 = vadd.f32 %v4359_v51, %v4358_v45 }
0x1652   : > { %v4412_v10 = vunpack.c.l.b16 %v4387_v21  ;;  %v4638_v28 = vrot.slane %v4610_v61, %v8260_v63  ;;  %v4646_v50 = vrot.slane %v4616_v11, %v8260_v63 }
0x1653   : > { %v4371_v19 = vrot.slane %v4370_v16, 1  ;;  %v4375_v7 = vrot.slane %v4374_v60, 2  ;;  %v4379_v36 = vrot.slane %v4336_v41, 4  ;;  %v4388_v44 = vpack.c.bf16 %v4360_v6, %v4360_v6 }
0x1654   : > { %v4601_v47 = vpop.permute.xlu1 %4600  ;;  %v4419_v39 = vsel %vm1199_vm2, %v4412_v10, %v4418_v35 }
0x1655   : > { %v4372_v57 = vadd.f32 %v4371_v19, %v4370_v16  ;;  %v4376_v25 = vadd.f32 %v4375_v7, %v4374_v60  ;;  %v4380_v53 = vadd.f32 %v4379_v36, %v4336_v41  ;;  %v4413_v8 = vunpack.c.l.b16 %v4388_v44 }
0x1656   : > { %v4626_v26 = vrot.slane %v4601_v47, %v8260_v63 }
0x1657   : > { %v4377_v20 = vrot.slane %v4376_v25, 1  ;;  %v4381_v46 = vrot.slane %v4380_v53, 2  ;;  %v4390_v38 = vpack.c.bf16 %v4372_v57, %v4372_v57  ;;  %v4420_v48 = vsel %vm1201_vm3, %v4413_v8, %v4419_v39 }
0x1658   : > { %v4604_v49 = vpop.permute.xlu1 %4603  ;;  %v4421_v34 = vsel %vm1203_vm4, %v4414_v2, %v4420_v48 }
0x1659   : > { %v4378_v12 = vadd.f32 %v4377_v20, %v4376_v25  ;;  %v4382_v4 = vadd.f32 %v4381_v46, %v4380_v53  ;;  %v4630_v33 = vrot.slane %v4604_v49, %v8260_v63  ;;  %v4415_v62 = vunpack.c.l.b16 %v4390_v38 }
0x165b   : > { %v4391_v15 = vpack.c.bf16 %v4378_v12, %v4378_v12  ;;  %v4383_v3 = vrot.slane %v4382_v4, 1  ;;  %v4655_v23 = vsel %vm1197_vm1, %v4630_v33, %v4626_v26  ;;  %v4422_v45 = vsel %vm1205_vm5, %v4415_v62, %v4421_v34 }
0x165c   : > { %v4607_v18 = vpop.permute.xlu1 %4606 }
0x165d   : > { %v4384_v29 = vadd.f32 %v4383_v3, %v4382_v4  ;;  %v4634_v54 = vrot.slane %v4607_v18, %v8260_v63  ;;  %v4416_v14 = vunpack.c.l.b16 %v4391_v15 }
0x165f   : > { %v4392_v42 = vpack.c.bf16 %v4384_v29, %v4384_v29  ;;  %v4656_v13 = vsel %vm1199_vm2, %v4634_v54, %v4655_v23  ;;  %v4423_v43 = vsel %vm1207_vm6, %v4416_v14, %v4422_v45 }
0x1660   : > { %v4613_v5 = vpop.permute.xlu1 %4612  ;;  %v4657_v40 = vsel %vm1201_vm3, %v4638_v28, %v4656_v13 }
0x1661   : > { %v4417_v17 = vunpack.c.l.b16 %v4392_v42  ;;  %v4642_v59 = vrot.slane %v4613_v5, %v8260_v63 }
0x1663   : > { %v4658_v9 = vsel %vm1203_vm4, %v4642_v59, %v4657_v40  ;;  %v4424_v51 = vsel %vm1209_vm7, %v4417_v17, %v4423_v43 }
0x1664   : > { %v4619_v16 = vpop.permute.xlu1 %4618  ;;  %v4425_v60 = vpack.c.b16 %v4424_v51, %v4424_v51  ;;  %v4659_v6 = vsel %vm1205_vm5, %v4646_v50, %v4658_v9 }
0x1665   : > { %v4650_v41 = vrot.slane %v4619_v16, %v8260_v63 }
0x1666   : > { %4460 = vmatmul.mubr.bf16.vlgmr.msra.gmra.mrb[36].mxu0 %v4425_v60  ;;  %5031 = vst [vmem:[%s6386_s16 + $0xc] sm:$0xf] %v4425_v60  ;;  %4501 = vmatmul.mubr.bf16.vlgmr.msra.gmra.mrb[36].mxu1 %v4425_v60 }
0x1667   : > { %v4660_v19 = vsel %vm1207_vm6, %v4650_v41, %v4659_v6 }
0x1668   : > { %v4661_v7 = vsel %vm1209_vm7, %v4654_v24, %v4660_v19 }
0x1669   : > { %v4663_v36 = vadd.f32 %v4661_v7, %v4590_v30 }
0x166b   : > { %4664 = vst.msk [vmem:[#allocation18] sm:$0xff] %vm1212_vm8, %v4663_v36 }
0x166c   : > { %5906 = shalt.err (!%p5903_p4)
}
0x166d   : > { %s5907_s16 = scalar_lea.hbm %s7730_s26, 256  ;;  %s5911_s0 = scalar_lea.hbm %s8261_s25, 512 }
0x166e   : > { %p5908_p10 = scmp.ne.s32.totalorder %s7730_s26, %s5907_s16  ;;  %p5912_p12 = scmp.lt.u32.totalorder %s7730_s26, %s8261_s25 }
0x166f   : > { %p5913_p1 = scmp.lt.u32.totalorder %s5911_s0, %s5907_s16  ;;  %p5915_p2 = scmp.lt.u32.totalorder %s5907_s16, %s7730_s26 }
0x1670   : > { %p5909_p8 = pnand %p5908_p10, %p8262_p6 }
0x1671   : > { %p5914_p13 = por %p5913_p1, %p5912_p12 }
0x1672   : > { %p5910_p3 = pneg %p5909_p8 }
0x1673   : > { %p5916_p0 = por %p5915_p2, %p5914_p13 }
0x1675   : > { %p5917_p7 = pnand %p5916_p0, %p5910_p3 }
0x1677   : > { %5920 = shalt.err (!%p5917_p7)
}
0x1678   : > { %s6055_s2 = smov 64   ;;  %s6056_s15 = smov 4  }
0x1679   : > { %5217 = dma.vmem_to_hbm [thread:$0]  (%p8262_p6), %s7733_s24, 256, %s7730_s26, %s7735_s22, %s6055_s2, %s6055_s2, %s6056_s15  }
0x167a   : > { %s6057_s14 = smov [#allocation18]   ;;  %p8263_p11 = scmp.eq.s32.totalorder %s6140_s23, 1 }
0x167b   : > { %s4714_s9 = sshll.u32 %s6057_s14, 4  ;;  %s4715_s9 = int_to_ptr.vmem [resolvable:$true] %s4714_s9 }
0x167c   : > { %s5921_s0 = scalar_lea.vmem %s4715_s9, 128  ;;  %p5928_p10 = scmp.lt.s32.totalorder %s4715_s9, %s4715_s9 }
0x167d   : > { %p5922_p5 = scmp.ne.s32.totalorder %s4715_s9, %s5921_s0  ;;  %p5929_p8 = scmp.lt.s32.totalorder %s5921_s0, %s5921_s0 }
0x167f   : > { %p5923_p9 = pnand %p5922_p5, %p8263_p11  ;;  %p5930_p3 = por %p5929_p8, %p5928_p10 }
0x1681   : > { %p5924_p4 = pneg %p5923_p9 }
0x1683   : > { %p5931_p12 = pnand %p5930_p3, %p5924_p4 }
0x1685   : > { %5934 = shalt.err (!%p5931_p12)
}
0x1686   : > { %s8264_s1 = sld [smem:[#allocation105_spill]]  ;;  %p8265_p13 = pmov %p8263_p11 }
0x168c   : > { %s5935_s30 = scalar_lea.hbm %s8264_s1, 128 }
0x168d   : > { %p5936_p1 = scmp.ne.s32.totalorder %s8264_s1, %s5935_s30  ;;  %p5941_p7 = scmp.lt.u32.totalorder %s5935_s30, %s8264_s1 }
0x168f   : > { %p5937_p2 = pnand %p5936_p1, %p8265_p13 }
0x1691   : > { %p5938_p0 = pneg %p5937_p2 }
0x1693   : > { %p5943_p5 = pnand %p5941_p7, %p5938_p0 }
0x1695   : > { %5946 = shalt.err (!%p5943_p5)
}
0x1696   : > { %5219 = dma.vmem_to_hbm [thread:$0]  (%p8263_p11), %s4715_s9, 128, %s8264_s1, [#allocation17]   ;;  %v5015_v63 = vld [vmem:[%s6365_s29 + $0x60] sm:$0xff]  ;;  %v5017_v22 = vld [vmem:[%s6365_s29 + $0x70] sm:$0xff]  ;;  %v5016_v21 = vld [vmem:[%s6365_s29 + $0x68] sm:$0xff] }
0x1697   : > { %v5018_v47 = vld [vmem:[%s6365_s29 + $0x78] sm:$0xff]  ;;  %v4398_v44 = vadd.f32 %v5015_v63, %v7595_v27  ;;  %v4400_v57 = vadd.f32 %v5017_v22, %v7597_v56  ;;  %v4399_v25 = vadd.f32 %v5016_v21, %v7592_v55  ;;  %s4684_s3 = sshll.u32 %s6384_s27, 4  ;;  %s8266_s29 = sshll.u32 %s6140_s23, 8  ;;  %s7797_s3 = int_to_ptr.vmem [resolvable:$true] %s4684_s3 }
0x1698   : > { %v4401_v53 = vadd.f32 %v5018_v47, %v7620_v37  ;;  %s8267_s16 = sld [smem:[#allocation103_spill]]  ;;  %s4666_s26 = scalar_lea.sflag [#allocation6], %s6361_s12 }
0x1699   : > { %s5947_s24 = scalar_lea.vmem %s7797_s3, 256  ;;  %s6058_s22 = smov [#allocation15]  }
0x169a   : > { %p5948_p9 = scmp.ne.s32.totalorder %s7797_s3, %s5947_s24  ;;  %s5951_s14 = sshll.u32 %s6058_s22, 4  ;;  %s5952_s14 = int_to_ptr.vmem [resolvable:$false] %s5951_s14 }
0x169b   : > { %s5953_s0 = scalar_lea.vmem %s5952_s14, 512  ;;  %p5954_p8 = scmp.lt.s32.totalorder %s7797_s3, %s5952_s14 }
0x169c   : > { %p5949_p4 = pnand %p5948_p9, %p8262_p6  ;;  %p5955_p3 = scmp.lt.s32.totalorder %s5953_s0, %s5947_s24 }
0x169e   : > { %s7795_s11 = scalar_lea.hbm %s8267_s16, %s8266_s29  ;;  %p5950_p10 = pneg %p5949_p4 }
0x169f   : > { %p5956_p12 = por %p5955_p3, %p5954_p8 }
0x16a1   : > { %p5957_p1 = pnand %p5956_p12, %p5950_p10 }
0x1739   : > { %v4461_v31 = vpop.f32.mrb[36].mxu0  ;;  %v4502_v61 = vpop.f32.mrb[36].mxu1 }
0x173a   : > { %v4509_v32 = vadd.f32 %v4461_v31, %v4398_v44  ;;  %v4511_v20 = vadd.f32 %v4502_v61, %v4400_v57  ;;  %v4463_v46 = vpop.f32.mrb[37].mxu0  ;;  %v4504_v1 = vpop.f32.mrb[37].mxu1 }
0x173b   : > { %v4510_v10 = vadd.f32 %v4463_v46, %v4399_v25  ;;  %v4512_v49 = vadd.f32 %v4504_v1, %v4401_v53  ;;  %v4465_v8 = vpop.f32.mrb[38].mxu0  ;;  %v4506_v38 = vpop.f32.mrb[38].mxu1 }
0x173c   : > { %v5019_v12 = vmul.f32 -1.442695, %v4509_v32  ;;  %v4466_v4 = vpop.f32.mrb[39].mxu0  ;;  %v4507_v58 = vpop.f32.mrb[39].mxu1 }
0x173d   : > { %v5020_v27 = vmul.f32 -1.442695, %v4510_v10  ;;  %v5021_v56 = vmul.f32 -1.442695, %v4512_v49 }
0x173e   : > { %5608 = vpow2.f32 %v5019_v12 }
0x173f   : > { %5610 = vpow2.f32 %v5020_v27 }
0x1740   : > { %5612 = vpow2.f32 %v5021_v56 }
0x1741   : > { %5614 = vtanh.f32 %v4511_v20 }
0x1748   : > { %v5609_v55 = vpop.eup %5608 }
0x1749   : > { %v5611_v33 = vpop.eup %5610  ;;  %v4516_v37 = vadd.f32 1.0, %v5609_v55 }
0x174a   : > { %v4522_v35 = vadd.f32 1.0, %v5611_v33  ;;  %v5613_v15 = vpop.eup %5612 }
0x174b   : > { %5616 = vrcp.f32 %v4516_v37  ;;  %v5615_v3 = vpop.eup %5614  ;;  %v4529_v11 = vadd.f32 1.0, %v5613_v15 }
0x174c   : > { %5618 = vrcp.f32 %v4522_v35 }
0x174d   : > { %5620 = vrcp.f32 %v4529_v11 }
0x1755   : > { %v5617_v39 = vpop.eup %5616 }
0x1756   : > { %v5619_v26 = vpop.eup %5618  ;;  %v4533_v18 = vmul.f32 %v5617_v39, %v5615_v3 }
0x1757   : > { %v4532_v48 = vmul.f32 %v5619_v26, %v7538_v52  ;;  %v5621_v29 = vpop.eup %5620 }
0x1759   : > { %v4534_v62 = vadd.f32 %v4533_v18, %v4532_v48 }
0x175b   : > { %5622 = vtanh.f32 %v4534_v62  ;;  %4589 = vst [vmem:[#allocation3] sm:$0xff] %v4534_v62 }
0x1765   : > { %v5623_v54 = vpop.eup %5622 }
0x1766   : > { %v4536_v2 = vmul.f32 %v5623_v54, %v5621_v29 }
0x1768   : > { %v4537_v14 = vpack.c.bf16 %v4536_v2, %v4536_v2  ;;  %4588 = vst [vmem:[#allocation2] sm:$0xff] %v4536_v2 }
0x176a   : > { %5022 = vst [vmem:[%s6384_s27 + $0xc] sm:$0xf] %v4537_v14 }
0x176b   : > { %5960 = shalt.err (!%p5957_p1)
}
0x176c   : > { %s5961_s27 = scalar_lea.hbm %s7795_s11, 256  ;;  %s5965_s9 = scalar_lea.hbm %s8267_s16, 512 }
0x176d   : > { %p5962_p13 = scmp.ne.s32.totalorder %s7795_s11, %s5961_s27  ;;  %p5966_p7 = scmp.lt.u32.totalorder %s7795_s11, %s8267_s16 }
0x176e   : > { %p5967_p5 = scmp.lt.u32.totalorder %s5965_s9, %s5961_s27  ;;  %p5969_p9 = scmp.lt.u32.totalorder %s5961_s27, %s7795_s11 }
0x176f   : > { %p5963_p2 = pnand %p5962_p13, %p8262_p6 }
0x1770   : > { %p5968_p11 = por %p5967_p5, %p5966_p7 }
0x1771   : > { %p5964_p0 = pneg %p5963_p2 }
0x1772   : > { %p5970_p4 = por %p5969_p9, %p5968_p11 }
0x1774   : > { %p5971_p10 = pnand %p5970_p4, %p5964_p0 }
0x1776   : > { %5974 = shalt.err (!%p5971_p10)
}
0x1777   : > { %5216 = dma.vmem_to_hbm [thread:$0]  (%p8262_p6), %s7797_s3, 256, %s7795_s11, %s4666_s26, %s6055_s2, %s6055_s2, %s6056_s15  }
0x1778   : > { %p8268_p8 = scmp.eq.s32.totalorder %s6140_s23, 1 }
0x177a   : > { %6008 = dma.done.wait (%p8268_p8), [#allocation17], 128   ;;  %p8269_p3 = pmov %p8268_p8 }
0x177c   : > { %6010 = vsyncadd (%p8269_p3), [#allocation17], 4294967168 }
0x177d PF: > { %s4730_s24 = sand.u32 1, %s6021_s17   ;;  %p8270_p12 = scmp.ne.s32.totalorder %s8012_s28, 0 }
0x177e   : > { %p8271_p1 = scmp.ge.s32.totalorder %s6033_s20, 2  ;;  %s4731_s13 = scalar_lea.sflag [#allocation6], %s4730_s24 }
0x1780   : > { %p5245_p13 = pnand %p8271_p1, %p8270_p12 }
0x1782   : > { %6012 = dma.done.wait (!%p5245_p13), %s4731_s13, 256  }
0x1783   : > { %6014 = vsyncadd (!%p5245_p13), %s4731_s13, 4294967040  ;;  %s8272_s12 = sadd.s32 4294967294, %s6033_s20  }
0x1784   : > { %s4739_s0 = sand.u32 1, %s8272_s12  }
0x1785   : > { %s4740_s2 = scalar_lea.sflag [#allocation17], %s4739_s0 }
0x1786   : > { %6016 = dma.done.wait (!%p5245_p13), %s4740_s2, 256  }
0x1787   : > { %6018 = vsyncadd (!%p5245_p13), %s4740_s2, 4294967040  ;;  %p31_p6 = scmp.ge.s32.totalorder %s6284_s10, 4   ;;  %s8273_s17 = smov %s6025_s18 }
0x1788   : > { %s8274_s18 = smov %s6029_s19  ;;  %s8275_s19 = smov %s6296_s21 }
0x1789   : > { %s8276_s20 = smov %s6284_s10  ;;  %33 = sbr.rel (!%p31_p6) target bundleno = 18 (0x12), region = 159 }
0x1790   :  { %4745 = vsyncpa [#allocation5], 1 }
0x1791   :  { %4747 = vsyncpa [#allocation5 + $0x1], 1 }
0x1792   :  { %4748 = vsyncpa [#allocation8], 1 }
0x1793   :  { %4749 = vsyncpa [#allocation11], 1 }
0x1794   :  { %4750 = vsyncpa [#allocation14], 1 }
0x1795   :  { %4751 = vsyncpa [#allocation6], 1 }
0x1796   :  { %4753 = vsyncpa [#allocation6 + $0x1], 1 }
0x1797   :  { %4754 = vsyncpa [#allocation17], 1 }
0x1798   :  { %4756 = vsyncpa [#allocation17 + $0x1], 1 }

</bundles_post_ra>
